<compile_context>
chip_gen: v7x
topology: tpu7x:2x2x1
jax: 0.10.0
libtpu: 0.0.40
codegen_flags: <defaults>
</compile_context>

<pallas_src>
import functools

import jax
import jax.numpy as jnp
from jax import lax
from jax.experimental import pallas as pl
from jax.experimental.pallas import tpu as pltpu


def _roi_pool_kernel(meta_ref, feat_ref, out_ref, *, ph_bins, pw_bins):
    """meta_ref: SMEM int32 [1 + 2*PH + 2*PW, K]
                 rows = (batch, hs[PH], he[PH], ws[PW], we[PW]).
    feat_ref:  VMEM float32 [1, W, H, C] -- the ROI's batch element,
               selected by the BlockSpec index_map (C dense on lanes).
    out_ref:   VMEM float32 [1, PH, PW, C] -- lane-dense output block."""
    _, Wdim, Hdim, _ = feat_ref.shape
    g = pl.program_id(0)
    neg = jnp.float32(-jnp.inf)

    # Static iota columns (H / W on the sublane axis), hoisted.
    h_col = lax.broadcasted_iota(jnp.int32, (Hdim, 1), 0)        # [H, 1]
    w_col = lax.broadcasted_iota(jnp.int32, (Wdim, 1), 0)        # [W, 1]

    hs_base = 1
    he_base = 1 + ph_bins
    ws_base = 1 + 2 * ph_bins
    we_base = 1 + 2 * ph_bins + pw_bins

    # Per-output-column (pw) scalar bounds, hoisted out of the PH loop.
    w_bounds = []
    for q in range(pw_bins):
        ws_q = meta_ref[ws_base + q, g]
        we_q = meta_ref[we_base + q, g]
        w_bounds.append((ws_q, we_q, we_q <= ws_q))

    for p in range(ph_bins):                                     # static, 7x
        hs_p = meta_ref[hs_base + p, g]
        he_p = meta_ref[he_base + p, g]
        empty_h = he_p <= hs_p

        mask_h = (h_col >= hs_p) & (h_col < he_p)                # [H, 1]
        # Masked max over H: C stays dense on lanes; the reduction is
        # elementwise VPU maxes across sublane vregs for every leading w.
        # (feat is re-read from VMEM per bin row to keep liveness bounded
        #  instead of holding the whole slice live across the PH loop.)
        t_p = jnp.max(jnp.where(mask_h, feat_ref[0], neg), axis=1)   # [W, C]

        cols = []
        for q in range(pw_bins):                                 # static, 7x
            ws_q, we_q, empty_w = w_bounds[q]
            mask_w = (w_col >= ws_q) & (w_col < we_q)            # [W, 1]
            v = jnp.max(jnp.where(mask_w, t_p, neg),
                        axis=0, keepdims=True)                   # [1, C]
            # Empty bins produce 0 (torchvision semantics).
            cols.append(jnp.where(jnp.logical_or(empty_h, empty_w),
                                  jnp.float32(0.0), v))
        # Write this PH row directly (sublane-stacked [PW, C], C on lanes).
        out_ref[0, p] = jnp.concatenate(cols, axis=0).astype(out_ref.dtype)


def _compute_bins(rois, spatial_scale, num_batches, H, W, ph, pw):
    """torchvision roi_pool bin boundaries, computed once in plain XLA."""
    batch = jnp.clip(rois[:, 0].astype(jnp.int32), 0, num_batches - 1)
    coords = rois[:, 1:5] * jnp.float32(spatial_scale)
    # std::round -> round half away from zero.
    coords = (jnp.sign(coords) * jnp.floor(jnp.abs(coords) + 0.5)).astype(jnp.int32)
    x1, y1, x2, y2 = coords[:, 0], coords[:, 1], coords[:, 2], coords[:, 3]
    roi_w = jnp.maximum(x2 - x1 + 1, 1).astype(jnp.float32)
    roi_h = jnp.maximum(y2 - y1 + 1, 1).astype(jnp.float32)
    bin_h = roi_h / jnp.float32(ph)                              # [K]
    bin_w = roi_w / jnp.float32(pw)

    p = jnp.arange(ph, dtype=jnp.float32)[None, :]               # [1, PH]
    q = jnp.arange(pw, dtype=jnp.float32)[None, :]               # [1, PW]
    hs = jnp.floor(p * bin_h[:, None]).astype(jnp.int32) + y1[:, None]
    he = jnp.ceil((p + 1.0) * bin_h[:, None]).astype(jnp.int32) + y1[:, None]
    ws = jnp.floor(q * bin_w[:, None]).astype(jnp.int32) + x1[:, None]
    we = jnp.ceil((q + 1.0) * bin_w[:, None]).astype(jnp.int32) + x1[:, None]
    # torchvision clamps AFTER adding the ROI offset.
    hs = jnp.clip(hs, 0, H)
    he = jnp.clip(he, 0, H)
    ws = jnp.clip(ws, 0, W)
    we = jnp.clip(we, 0, W)
    return batch, hs, he, ws, we


def roi_pool_model(feats, rois, kernel_size=7, spatial_scale=1.0 / 16.0):
    """Equivalent of RoIPoolModel(kernel_size, spatial_scale).forward(feats, rois)."""
    N, C, H, W = feats.shape
    K = rois.shape[0]
    PH = PW = kernel_size

    batch, hs, he, ws, we = _compute_bins(rois, spatial_scale, N, H, W, PH, PW)

    # [1 + 2*PH + 2*PW, K] int32, long axis last (SMEM-friendly padding).
    meta = jnp.concatenate(
        [batch[None, :], hs.T, he.T, ws.T, we.T], axis=0).astype(jnp.int32)

    # Sort ROIs by batch so consecutive grid steps mostly reuse the resident
    # feature block (the pipeline only re-DMAs when the block index changes).
    order = jnp.argsort(batch, stable=True)
    meta_sorted = meta[:, order]

    # NCHW -> (N, W, H, C): C dense on the 128-lane axis, H on sublanes.
    feats_whc = jnp.transpose(feats, (0, 3, 2, 1))

    feat_block_bytes = W * H * C * feats.dtype.itemsize
    out_block_bytes = PH * PW * C * feats.dtype.itemsize
    vmem_limit = int(
        min(max(32 << 20,
                2 * feat_block_bytes + 2 * out_block_bytes + (4 << 20)),
            64 << 20))

    out_sorted = pl.pallas_call(
        functools.partial(_roi_pool_kernel, ph_bins=PH, pw_bins=PW),
        out_shape=jax.ShapeDtypeStruct((K, PH, PW, C), feats.dtype),
        grid_spec=pltpu.PrefetchScalarGridSpec(
            num_scalar_prefetch=1,
            grid=(K,),
            in_specs=[
                # The ROI's batch element is selected via the index_map from
                # the scalar-prefetched metadata: no per-ROI dynamic slice and
                # only 1/N of the feature map resident in VMEM.
                pl.BlockSpec((1, W, H, C), lambda g, meta: (meta[0, g], 0, 0, 0)),
            ],
            out_specs=pl.BlockSpec((1, PH, PW, C), lambda g, meta: (g, 0, 0, 0)),
        ),
        compiler_params=pltpu.CompilerParams(
            # Each grid step writes a disjoint output block -> legal to shard
            # across v7x's 2 TensorCores; harmless on v5e/v6e.
            dimension_semantics=("parallel",),
            vmem_limit_bytes=vmem_limit,
        ),
        cost_estimate=pl.CostEstimate(
            flops=int(K) * (PH * 2 * H * W * C + PH * PW * 2 * W * C),
            transcendentals=0,
            bytes_accessed=int(feats.size) * 4 + int(K) * PH * PW * C * 4
            + int(meta.size) * 4,
        ),
    )(meta_sorted, feats_whc)

    inv = jnp.argsort(order)
    out = out_sorted[inv]                          # back to original ROI order
    return jnp.transpose(out, (0, 3, 1, 2))        # (K, C, PH, PW)


def _roi_pool_ref(feats, rois, kernel_size=7, spatial_scale=1.0 / 16.0):
    """Pure-JAX reference (same math, no Pallas) for a correctness check."""
    N, C, H, W = feats.shape
    PH = PW = kernel_size
    batch, hs, he, ws, we = _compute_bins(rois, spatial_scale, N, H, W, PH, PW)
    neg = jnp.float32(-jnp.inf)

    def one(b, hs_i, he_i, ws_i, we_i):
        f = feats[b]                                               # [C, H, W]
        h_idx = jnp.arange(H, dtype=jnp.int32)[None, :]
        w_idx = jnp.arange(W, dtype=jnp.int32)[None, :]
        mask_h = (h_idx >= hs_i[:, None]) & (h_idx < he_i[:, None])   # [PH, H]
        mask_w = (w_idx >= ws_i[:, None]) & (w_idx < we_i[:, None])   # [PW, W]
        t = jnp.max(jnp.where(mask_h[None, :, :, None], f[:, None, :, :], neg), axis=2)
        o = jnp.max(jnp.where(mask_w[None, None, :, :], t[:, :, None, :], neg), axis=3)
        empty = (he_i <= hs_i)[:, None] | (we_i <= ws_i)[None, :]     # [PH, PW]
        return jnp.where(empty[None, :, :], jnp.float32(0.0), o)

    return jax.vmap(one)(batch, hs, he, ws, we)


if __name__ == "__main__":
    key = jax.random.PRNGKey(0)
    k1, k2, k3, k4 = jax.random.split(key, 4)

    # Small shapes consistent with the module: feature map 2x4x16x16.
    N, C, H, W = 2, 4, 16, 16
    feats = jax.random.normal(k1, (N, C, H, W), dtype=jnp.float32)

    K_rand = 3
    batch = jax.random.randint(k2, (K_rand,), 0, N).astype(jnp.float32)
    xy1 = jax.random.uniform(k3, (K_rand, 2), minval=0.0, maxval=128.0, dtype=jnp.float32)
    wh = jax.random.uniform(k4, (K_rand, 2), minval=16.0, maxval=120.0, dtype=jnp.float32)
    xy2 = jnp.clip(xy1 + wh, 0.0, 255.0)
    # rois: (batch_idx, x1, y1, x2, y2)
    rois = jnp.concatenate(
        [batch[:, None], xy1[:, 0:1], xy1[:, 1:2], xy2[:, 0:1], xy2[:, 1:2]], axis=1
    )
    # One ROI fully outside the feature map: all bins empty -> zeros.
    rois = jnp.concatenate(
        [rois, jnp.array([[1.0, 4000.0, 4000.0, 4100.0, 4100.0]], dtype=jnp.float32)],
        axis=0,
    ).astype(jnp.float32)
    K = rois.shape[0]

    out = roi_pool_model(feats, rois, kernel_size=7, spatial_scale=1.0 / 16.0)
    out = jax.block_until_ready(out)
    assert out.shape == (K, C, 7, 7), out.shape

    ref = jax.block_until_ready(_roi_pool_ref(feats, rois, 7, 1.0 / 16.0))
    import numpy as np
    np.testing.assert_allclose(np.asarray(out), np.asarray(ref), atol=1e-5, rtol=1e-5)

    print("KERNEL_OK")
</pallas_src>

<mosaic_0001>
module attributes {stable_mosaic.version = 11 : i64} {
  func.func @_roi_pool_kernel(%arg0: i32, %arg1: memref<29x4xi32, #tpu.memory_space<smem>>, %arg2: memref<1x16x16x4xf32, #tpu.memory_space<vmem>>, %arg3: memref<1x7x7x4xf32, #tpu.memory_space<vmem>>) attributes {dimension_semantics = [#tpu.dimension_semantics<parallel>], iteration_bounds = array<i64: 4>, scalar_prefetch = 1 : i64, scratch_operands = 0 : i64, tpu.core_type = #tpu.core_type<tc>, window_params = [{transform_indices = @transform_0, window_bounds = array<i64: 1, 16, 16, 4>}, {transform_indices = @transform_1, window_bounds = array<i64: 1, 7, 7, 4>}]} {
    %0 = tpu.iota {dimensions = array<i32: 0>} : vector<16x1xi32>
    %1 = tpu.iota {dimensions = array<i32: 0>} : vector<16x1xi32>
    %c15 = arith.constant 15 : index
    %2 = arith.index_cast %arg0 : i32 to index
    %3 = memref.load %arg1[%c15, %2] : memref<29x4xi32, #tpu.memory_space<smem>>
    %c22 = arith.constant 22 : index
    %4 = arith.index_cast %arg0 : i32 to index
    %5 = memref.load %arg1[%c22, %4] : memref<29x4xi32, #tpu.memory_space<smem>>
    %6 = arith.cmpi sle, %5, %3 : i32
    %c16 = arith.constant 16 : index
    %7 = arith.index_cast %arg0 : i32 to index
    %8 = memref.load %arg1[%c16, %7] : memref<29x4xi32, #tpu.memory_space<smem>>
    %c23 = arith.constant 23 : index
    %9 = arith.index_cast %arg0 : i32 to index
    %10 = memref.load %arg1[%c23, %9] : memref<29x4xi32, #tpu.memory_space<smem>>
    %11 = arith.cmpi sle, %10, %8 : i32
    %c17 = arith.constant 17 : index
    %12 = arith.index_cast %arg0 : i32 to index
    %13 = memref.load %arg1[%c17, %12] : memref<29x4xi32, #tpu.memory_space<smem>>
    %c24 = arith.constant 24 : index
    %14 = arith.index_cast %arg0 : i32 to index
    %15 = memref.load %arg1[%c24, %14] : memref<29x4xi32, #tpu.memory_space<smem>>
    %16 = arith.cmpi sle, %15, %13 : i32
    %c18 = arith.constant 18 : index
    %17 = arith.index_cast %arg0 : i32 to index
    %18 = memref.load %arg1[%c18, %17] : memref<29x4xi32, #tpu.memory_space<smem>>
    %c25 = arith.constant 25 : index
    %19 = arith.index_cast %arg0 : i32 to index
    %20 = memref.load %arg1[%c25, %19] : memref<29x4xi32, #tpu.memory_space<smem>>
    %21 = arith.cmpi sle, %20, %18 : i32
    %c19 = arith.constant 19 : index
    %22 = arith.index_cast %arg0 : i32 to index
    %23 = memref.load %arg1[%c19, %22] : memref<29x4xi32, #tpu.memory_space<smem>>
    %c26 = arith.constant 26 : index
    %24 = arith.index_cast %arg0 : i32 to index
    %25 = memref.load %arg1[%c26, %24] : memref<29x4xi32, #tpu.memory_space<smem>>
    %26 = arith.cmpi sle, %25, %23 : i32
    %c20 = arith.constant 20 : index
    %27 = arith.index_cast %arg0 : i32 to index
    %28 = memref.load %arg1[%c20, %27] : memref<29x4xi32, #tpu.memory_space<smem>>
    %c27 = arith.constant 27 : index
    %29 = arith.index_cast %arg0 : i32 to index
    %30 = memref.load %arg1[%c27, %29] : memref<29x4xi32, #tpu.memory_space<smem>>
    %31 = arith.cmpi sle, %30, %28 : i32
    %c21 = arith.constant 21 : index
    %32 = arith.index_cast %arg0 : i32 to index
    %33 = memref.load %arg1[%c21, %32] : memref<29x4xi32, #tpu.memory_space<smem>>
    %c28 = arith.constant 28 : index
    %34 = arith.index_cast %arg0 : i32 to index
    %35 = memref.load %arg1[%c28, %34] : memref<29x4xi32, #tpu.memory_space<smem>>
    %36 = arith.cmpi sle, %35, %33 : i32
    %c1 = arith.constant 1 : index
    %37 = arith.index_cast %arg0 : i32 to index
    %38 = memref.load %arg1[%c1, %37] : memref<29x4xi32, #tpu.memory_space<smem>>
    %c8 = arith.constant 8 : index
    %39 = arith.index_cast %arg0 : i32 to index
    %40 = memref.load %arg1[%c8, %39] : memref<29x4xi32, #tpu.memory_space<smem>>
    %41 = arith.cmpi sle, %40, %38 : i32
    %42 = vector.broadcast %38 : i32 to vector<16x1xi32>
    %43 = arith.cmpi sge, %0, %42 : vector<16x1xi32>
    %44 = vector.broadcast %40 : i32 to vector<16x1xi32>
    %45 = arith.cmpi slt, %0, %44 : vector<16x1xi32>
    %46 = arith.andi %43, %45 : vector<16x1xi1>
    %c0 = arith.constant 0 : index
    %c0_0 = arith.constant 0 : index
    %c0_1 = arith.constant 0 : index
    %c0_2 = arith.constant 0 : index
    %47 = vector.load %arg2[%c0, %c0_0, %c0_1, %c0_2] : memref<1x16x16x4xf32, #tpu.memory_space<vmem>>, vector<1x16x16x4xf32>
    %48 = vector.shape_cast %47 : vector<1x16x16x4xf32> to vector<16x16x4xf32>
    %cst = arith.constant 0xFF800000 : f32
    %49 = vector.shape_cast %46 : vector<16x1xi1> to vector<1x16x1xi1>
    %50 = vector.broadcast %49 : vector<1x16x1xi1> to vector<16x16x4xi1>
    %51 = vector.broadcast %cst : f32 to vector<16x16x4xf32>
    %52 = arith.select %50, %48, %51 : vector<16x16x4xi1>, vector<16x16x4xf32>
    %cst_3 = arith.constant dense<0xFF800000> : vector<16x4xf32>
    %53 = vector.multi_reduction <maximumf>, %52, %cst_3 [1] : vector<16x16x4xf32> to vector<16x4xf32>
    %54 = vector.broadcast %3 : i32 to vector<16x1xi32>
    %55 = arith.cmpi sge, %1, %54 : vector<16x1xi32>
    %56 = vector.broadcast %5 : i32 to vector<16x1xi32>
    %57 = arith.cmpi slt, %1, %56 : vector<16x1xi32>
    %58 = arith.andi %55, %57 : vector<16x1xi1>
    %cst_4 = arith.constant 0xFF800000 : f32
    %59 = vector.shape_cast %58 : vector<16x1xi1> to vector<16x1xi1>
    %60 = vector.broadcast %59 : vector<16x1xi1> to vector<16x4xi1>
    %61 = vector.broadcast %cst_4 : f32 to vector<16x4xf32>
    %62 = arith.select %60, %53, %61 : vector<16x4xi1>, vector<16x4xf32>
    %cst_5 = arith.constant dense<0xFF800000> : vector<4xf32>
    %63 = vector.multi_reduction <maximumf>, %62, %cst_5 [0] : vector<16x4xf32> to vector<4xf32>
    %64 = vector.shape_cast %63 : vector<4xf32> to vector<1x4xf32>
    %65 = arith.ori %41, %6 : i1
    %cst_6 = arith.constant 0.000000e+00 : f32
    %66 = vector.broadcast %cst_6 : f32 to vector<1x4xf32>
    %67 = arith.select %65, %66, %64 : vector<1x4xf32>
    %68 = vector.broadcast %8 : i32 to vector<16x1xi32>
    %69 = arith.cmpi sge, %1, %68 : vector<16x1xi32>
    %70 = vector.broadcast %10 : i32 to vector<16x1xi32>
    %71 = arith.cmpi slt, %1, %70 : vector<16x1xi32>
    %72 = arith.andi %69, %71 : vector<16x1xi1>
    %cst_7 = arith.constant 0xFF800000 : f32
    %73 = vector.shape_cast %72 : vector<16x1xi1> to vector<16x1xi1>
    %74 = vector.broadcast %73 : vector<16x1xi1> to vector<16x4xi1>
    %75 = vector.broadcast %cst_7 : f32 to vector<16x4xf32>
    %76 = arith.select %74, %53, %75 : vector<16x4xi1>, vector<16x4xf32>
    %cst_8 = arith.constant dense<0xFF800000> : vector<4xf32>
    %77 = vector.multi_reduction <maximumf>, %76, %cst_8 [0] : vector<16x4xf32> to vector<4xf32>
    %78 = vector.shape_cast %77 : vector<4xf32> to vector<1x4xf32>
    %79 = arith.ori %41, %11 : i1
    %cst_9 = arith.constant 0.000000e+00 : f32
    %80 = vector.broadcast %cst_9 : f32 to vector<1x4xf32>
    %81 = arith.select %79, %80, %78 : vector<1x4xf32>
    %82 = vector.broadcast %13 : i32 to vector<16x1xi32>
    %83 = arith.cmpi sge, %1, %82 : vector<16x1xi32>
    %84 = vector.broadcast %15 : i32 to vector<16x1xi32>
    %85 = arith.cmpi slt, %1, %84 : vector<16x1xi32>
    %86 = arith.andi %83, %85 : vector<16x1xi1>
    %cst_10 = arith.constant 0xFF800000 : f32
    %87 = vector.shape_cast %86 : vector<16x1xi1> to vector<16x1xi1>
    %88 = vector.broadcast %87 : vector<16x1xi1> to vector<16x4xi1>
    %89 = vector.broadcast %cst_10 : f32 to vector<16x4xf32>
    %90 = arith.select %88, %53, %89 : vector<16x4xi1>, vector<16x4xf32>
    %cst_11 = arith.constant dense<0xFF800000> : vector<4xf32>
    %91 = vector.multi_reduction <maximumf>, %90, %cst_11 [0] : vector<16x4xf32> to vector<4xf32>
    %92 = vector.shape_cast %91 : vector<4xf32> to vector<1x4xf32>
    %93 = arith.ori %41, %16 : i1
    %cst_12 = arith.constant 0.000000e+00 : f32
    %94 = vector.broadcast %cst_12 : f32 to vector<1x4xf32>
    %95 = arith.select %93, %94, %92 : vector<1x4xf32>
    %96 = vector.broadcast %18 : i32 to vector<16x1xi32>
    %97 = arith.cmpi sge, %1, %96 : vector<16x1xi32>
    %98 = vector.broadcast %20 : i32 to vector<16x1xi32>
    %99 = arith.cmpi slt, %1, %98 : vector<16x1xi32>
    %100 = arith.andi %97, %99 : vector<16x1xi1>
    %cst_13 = arith.constant 0xFF800000 : f32
    %101 = vector.shape_cast %100 : vector<16x1xi1> to vector<16x1xi1>
    %102 = vector.broadcast %101 : vector<16x1xi1> to vector<16x4xi1>
    %103 = vector.broadcast %cst_13 : f32 to vector<16x4xf32>
    %104 = arith.select %102, %53, %103 : vector<16x4xi1>, vector<16x4xf32>
    %cst_14 = arith.constant dense<0xFF800000> : vector<4xf32>
    %105 = vector.multi_reduction <maximumf>, %104, %cst_14 [0] : vector<16x4xf32> to vector<4xf32>
    %106 = vector.shape_cast %105 : vector<4xf32> to vector<1x4xf32>
    %107 = arith.ori %41, %21 : i1
    %cst_15 = arith.constant 0.000000e+00 : f32
    %108 = vector.broadcast %cst_15 : f32 to vector<1x4xf32>
    %109 = arith.select %107, %108, %106 : vector<1x4xf32>
    %110 = vector.broadcast %23 : i32 to vector<16x1xi32>
    %111 = arith.cmpi sge, %1, %110 : vector<16x1xi32>
    %112 = vector.broadcast %25 : i32 to vector<16x1xi32>
    %113 = arith.cmpi slt, %1, %112 : vector<16x1xi32>
    %114 = arith.andi %111, %113 : vector<16x1xi1>
    %cst_16 = arith.constant 0xFF800000 : f32
    %115 = vector.shape_cast %114 : vector<16x1xi1> to vector<16x1xi1>
    %116 = vector.broadcast %115 : vector<16x1xi1> to vector<16x4xi1>
    %117 = vector.broadcast %cst_16 : f32 to vector<16x4xf32>
    %118 = arith.select %116, %53, %117 : vector<16x4xi1>, vector<16x4xf32>
    %cst_17 = arith.constant dense<0xFF800000> : vector<4xf32>
    %119 = vector.multi_reduction <maximumf>, %118, %cst_17 [0] : vector<16x4xf32> to vector<4xf32>
    %120 = vector.shape_cast %119 : vector<4xf32> to vector<1x4xf32>
    %121 = arith.ori %41, %26 : i1
    %cst_18 = arith.constant 0.000000e+00 : f32
    %122 = vector.broadcast %cst_18 : f32 to vector<1x4xf32>
    %123 = arith.select %121, %122, %120 : vector<1x4xf32>
    %124 = vector.broadcast %28 : i32 to vector<16x1xi32>
    %125 = arith.cmpi sge, %1, %124 : vector<16x1xi32>
    %126 = vector.broadcast %30 : i32 to vector<16x1xi32>
    %127 = arith.cmpi slt, %1, %126 : vector<16x1xi32>
    %128 = arith.andi %125, %127 : vector<16x1xi1>
    %cst_19 = arith.constant 0xFF800000 : f32
    %129 = vector.shape_cast %128 : vector<16x1xi1> to vector<16x1xi1>
    %130 = vector.broadcast %129 : vector<16x1xi1> to vector<16x4xi1>
    %131 = vector.broadcast %cst_19 : f32 to vector<16x4xf32>
    %132 = arith.select %130, %53, %131 : vector<16x4xi1>, vector<16x4xf32>
    %cst_20 = arith.constant dense<0xFF800000> : vector<4xf32>
    %133 = vector.multi_reduction <maximumf>, %132, %cst_20 [0] : vector<16x4xf32> to vector<4xf32>
    %134 = vector.shape_cast %133 : vector<4xf32> to vector<1x4xf32>
    %135 = arith.ori %41, %31 : i1
    %cst_21 = arith.constant 0.000000e+00 : f32
    %136 = vector.broadcast %cst_21 : f32 to vector<1x4xf32>
    %137 = arith.select %135, %136, %134 : vector<1x4xf32>
    %138 = vector.broadcast %33 : i32 to vector<16x1xi32>
    %139 = arith.cmpi sge, %1, %138 : vector<16x1xi32>
    %140 = vector.broadcast %35 : i32 to vector<16x1xi32>
    %141 = arith.cmpi slt, %1, %140 : vector<16x1xi32>
    %142 = arith.andi %139, %141 : vector<16x1xi1>
    %cst_22 = arith.constant 0xFF800000 : f32
    %143 = vector.shape_cast %142 : vector<16x1xi1> to vector<16x1xi1>
    %144 = vector.broadcast %143 : vector<16x1xi1> to vector<16x4xi1>
    %145 = vector.broadcast %cst_22 : f32 to vector<16x4xf32>
    %146 = arith.select %144, %53, %145 : vector<16x4xi1>, vector<16x4xf32>
    %cst_23 = arith.constant dense<0xFF800000> : vector<4xf32>
    %147 = vector.multi_reduction <maximumf>, %146, %cst_23 [0] : vector<16x4xf32> to vector<4xf32>
    %148 = vector.shape_cast %147 : vector<4xf32> to vector<1x4xf32>
    %149 = arith.ori %41, %36 : i1
    %cst_24 = arith.constant 0.000000e+00 : f32
    %150 = vector.broadcast %cst_24 : f32 to vector<1x4xf32>
    %151 = arith.select %149, %150, %148 : vector<1x4xf32>
    %152 = tpu.concatenate %67, %81, %95, %109, %123, %137, %151 in 0 : vector<1x4xf32>, vector<1x4xf32>, vector<1x4xf32>, vector<1x4xf32>, vector<1x4xf32>, vector<1x4xf32>, vector<1x4xf32> -> vector<7x4xf32>
    %c0_25 = arith.constant 0 : index
    %c0_26 = arith.constant 0 : index
    %c0_27 = arith.constant 0 : index
    %c0_28 = arith.constant 0 : index
    %153 = vector.load %arg3[%c0_25, %c0_26, %c0_27, %c0_28] : memref<1x7x7x4xf32, #tpu.memory_space<vmem>>, vector<1x1x7x4xf32>
    %154 = vector.shape_cast %153 : vector<1x1x7x4xf32> to vector<7x4xf32>
    %155 = vector.shape_cast %152 : vector<7x4xf32> to vector<1x1x7x4xf32>
    tpu.vector_store %arg3[%c0_25, %c0_26, %c0_27, %c0_28], %155 {strides = array<i32>} : memref<1x7x7x4xf32, #tpu.memory_space<vmem>>, vector<1x1x7x4xf32>,
    %c2 = arith.constant 2 : index
    %156 = arith.index_cast %arg0 : i32 to index
    %157 = memref.load %arg1[%c2, %156] : memref<29x4xi32, #tpu.memory_space<smem>>
    %c9 = arith.constant 9 : index
    %158 = arith.index_cast %arg0 : i32 to index
    %159 = memref.load %arg1[%c9, %158] : memref<29x4xi32, #tpu.memory_space<smem>>
    %160 = arith.cmpi sle, %159, %157 : i32
    %161 = vector.broadcast %157 : i32 to vector<16x1xi32>
    %162 = arith.cmpi sge, %0, %161 : vector<16x1xi32>
    %163 = vector.broadcast %159 : i32 to vector<16x1xi32>
    %164 = arith.cmpi slt, %0, %163 : vector<16x1xi32>
    %165 = arith.andi %162, %164 : vector<16x1xi1>
    %c0_29 = arith.constant 0 : index
    %c0_30 = arith.constant 0 : index
    %c0_31 = arith.constant 0 : index
    %c0_32 = arith.constant 0 : index
    %166 = vector.load %arg2[%c0_29, %c0_30, %c0_31, %c0_32] : memref<1x16x16x4xf32, #tpu.memory_space<vmem>>, vector<1x16x16x4xf32>
    %167 = vector.shape_cast %166 : vector<1x16x16x4xf32> to vector<16x16x4xf32>
    %cst_33 = arith.constant 0xFF800000 : f32
    %168 = vector.shape_cast %165 : vector<16x1xi1> to vector<1x16x1xi1>
    %169 = vector.broadcast %168 : vector<1x16x1xi1> to vector<16x16x4xi1>
    %170 = vector.broadcast %cst_33 : f32 to vector<16x16x4xf32>
    %171 = arith.select %169, %167, %170 : vector<16x16x4xi1>, vector<16x16x4xf32>
    %cst_34 = arith.constant dense<0xFF800000> : vector<16x4xf32>
    %172 = vector.multi_reduction <maximumf>, %171, %cst_34 [1] : vector<16x16x4xf32> to vector<16x4xf32>
    %173 = vector.broadcast %3 : i32 to vector<16x1xi32>
    %174 = arith.cmpi sge, %1, %173 : vector<16x1xi32>
    %175 = vector.broadcast %5 : i32 to vector<16x1xi32>
    %176 = arith.cmpi slt, %1, %175 : vector<16x1xi32>
    %177 = arith.andi %174, %176 : vector<16x1xi1>
    %cst_35 = arith.constant 0xFF800000 : f32
    %178 = vector.shape_cast %177 : vector<16x1xi1> to vector<16x1xi1>
    %179 = vector.broadcast %178 : vector<16x1xi1> to vector<16x4xi1>
    %180 = vector.broadcast %cst_35 : f32 to vector<16x4xf32>
    %181 = arith.select %179, %172, %180 : vector<16x4xi1>, vector<16x4xf32>
    %cst_36 = arith.constant dense<0xFF800000> : vector<4xf32>
    %182 = vector.multi_reduction <maximumf>, %181, %cst_36 [0] : vector<16x4xf32> to vector<4xf32>
    %183 = vector.shape_cast %182 : vector<4xf32> to vector<1x4xf32>
    %184 = arith.ori %160, %6 : i1
    %cst_37 = arith.constant 0.000000e+00 : f32
    %185 = vector.broadcast %cst_37 : f32 to vector<1x4xf32>
    %186 = arith.select %184, %185, %183 : vector<1x4xf32>
    %187 = vector.broadcast %8 : i32 to vector<16x1xi32>
    %188 = arith.cmpi sge, %1, %187 : vector<16x1xi32>
    %189 = vector.broadcast %10 : i32 to vector<16x1xi32>
    %190 = arith.cmpi slt, %1, %189 : vector<16x1xi32>
    %191 = arith.andi %188, %190 : vector<16x1xi1>
    %cst_38 = arith.constant 0xFF800000 : f32
    %192 = vector.shape_cast %191 : vector<16x1xi1> to vector<16x1xi1>
    %193 = vector.broadcast %192 : vector<16x1xi1> to vector<16x4xi1>
    %194 = vector.broadcast %cst_38 : f32 to vector<16x4xf32>
    %195 = arith.select %193, %172, %194 : vector<16x4xi1>, vector<16x4xf32>
    %cst_39 = arith.constant dense<0xFF800000> : vector<4xf32>
    %196 = vector.multi_reduction <maximumf>, %195, %cst_39 [0] : vector<16x4xf32> to vector<4xf32>
    %197 = vector.shape_cast %196 : vector<4xf32> to vector<1x4xf32>
    %198 = arith.ori %160, %11 : i1
    %cst_40 = arith.constant 0.000000e+00 : f32
    %199 = vector.broadcast %cst_40 : f32 to vector<1x4xf32>
    %200 = arith.select %198, %199, %197 : vector<1x4xf32>
    %201 = vector.broadcast %13 : i32 to vector<16x1xi32>
    %202 = arith.cmpi sge, %1, %201 : vector<16x1xi32>
    %203 = vector.broadcast %15 : i32 to vector<16x1xi32>
    %204 = arith.cmpi slt, %1, %203 : vector<16x1xi32>
    %205 = arith.andi %202, %204 : vector<16x1xi1>
    %cst_41 = arith.constant 0xFF800000 : f32
    %206 = vector.shape_cast %205 : vector<16x1xi1> to vector<16x1xi1>
    %207 = vector.broadcast %206 : vector<16x1xi1> to vector<16x4xi1>
    %208 = vector.broadcast %cst_41 : f32 to vector<16x4xf32>
    %209 = arith.select %207, %172, %208 : vector<16x4xi1>, vector<16x4xf32>
    %cst_42 = arith.constant dense<0xFF800000> : vector<4xf32>
    %210 = vector.multi_reduction <maximumf>, %209, %cst_42 [0] : vector<16x4xf32> to vector<4xf32>
    %211 = vector.shape_cast %210 : vector<4xf32> to vector<1x4xf32>
    %212 = arith.ori %160, %16 : i1
    %cst_43 = arith.constant 0.000000e+00 : f32
    %213 = vector.broadcast %cst_43 : f32 to vector<1x4xf32>
    %214 = arith.select %212, %213, %211 : vector<1x4xf32>
    %215 = vector.broadcast %18 : i32 to vector<16x1xi32>
    %216 = arith.cmpi sge, %1, %215 : vector<16x1xi32>
    %217 = vector.broadcast %20 : i32 to vector<16x1xi32>
    %218 = arith.cmpi slt, %1, %217 : vector<16x1xi32>
    %219 = arith.andi %216, %218 : vector<16x1xi1>
    %cst_44 = arith.constant 0xFF800000 : f32
    %220 = vector.shape_cast %219 : vector<16x1xi1> to vector<16x1xi1>
    %221 = vector.broadcast %220 : vector<16x1xi1> to vector<16x4xi1>
    %222 = vector.broadcast %cst_44 : f32 to vector<16x4xf32>
    %223 = arith.select %221, %172, %222 : vector<16x4xi1>, vector<16x4xf32>
    %cst_45 = arith.constant dense<0xFF800000> : vector<4xf32>
    %224 = vector.multi_reduction <maximumf>, %223, %cst_45 [0] : vector<16x4xf32> to vector<4xf32>
    %225 = vector.shape_cast %224 : vector<4xf32> to vector<1x4xf32>
    %226 = arith.ori %160, %21 : i1
    %cst_46 = arith.constant 0.000000e+00 : f32
    %227 = vector.broadcast %cst_46 : f32 to vector<1x4xf32>
    %228 = arith.select %226, %227, %225 : vector<1x4xf32>
    %229 = vector.broadcast %23 : i32 to vector<16x1xi32>
    %230 = arith.cmpi sge, %1, %229 : vector<16x1xi32>
    %231 = vector.broadcast %25 : i32 to vector<16x1xi32>
    %232 = arith.cmpi slt, %1, %231 : vector<16x1xi32>
    %233 = arith.andi %230, %232 : vector<16x1xi1>
    %cst_47 = arith.constant 0xFF800000 : f32
    %234 = vector.shape_cast %233 : vector<16x1xi1> to vector<16x1xi1>
    %235 = vector.broadcast %234 : vector<16x1xi1> to vector<16x4xi1>
    %236 = vector.broadcast %cst_47 : f32 to vector<16x4xf32>
    %237 = arith.select %235, %172, %236 : vector<16x4xi1>, vector<16x4xf32>
    %cst_48 = arith.constant dense<0xFF800000> : vector<4xf32>
    %238 = vector.multi_reduction <maximumf>, %237, %cst_48 [0] : vector<16x4xf32> to vector<4xf32>
    %239 = vector.shape_cast %238 : vector<4xf32> to vector<1x4xf32>
    %240 = arith.ori %160, %26 : i1
    %cst_49 = arith.constant 0.000000e+00 : f32
    %241 = vector.broadcast %cst_49 : f32 to vector<1x4xf32>
    %242 = arith.select %240, %241, %239 : vector<1x4xf32>
    %243 = vector.broadcast %28 : i32 to vector<16x1xi32>
    %244 = arith.cmpi sge, %1, %243 : vector<16x1xi32>
    %245 = vector.broadcast %30 : i32 to vector<16x1xi32>
    %246 = arith.cmpi slt, %1, %245 : vector<16x1xi32>
    %247 = arith.andi %244, %246 : vector<16x1xi1>
    %cst_50 = arith.constant 0xFF800000 : f32
    %248 = vector.shape_cast %247 : vector<16x1xi1> to vector<16x1xi1>
    %249 = vector.broadcast %248 : vector<16x1xi1> to vector<16x4xi1>
    %250 = vector.broadcast %cst_50 : f32 to vector<16x4xf32>
    %251 = arith.select %249, %172, %250 : vector<16x4xi1>, vector<16x4xf32>
    %cst_51 = arith.constant dense<0xFF800000> : vector<4xf32>
    %252 = vector.multi_reduction <maximumf>, %251, %cst_51 [0] : vector<16x4xf32> to vector<4xf32>
    %253 = vector.shape_cast %252 : vector<4xf32> to vector<1x4xf32>
    %254 = arith.ori %160, %31 : i1
    %cst_52 = arith.constant 0.000000e+00 : f32
    %255 = vector.broadcast %cst_52 : f32 to vector<1x4xf32>
    %256 = arith.select %254, %255, %253 : vector<1x4xf32>
    %257 = vector.broadcast %33 : i32 to vector<16x1xi32>
    %258 = arith.cmpi sge, %1, %257 : vector<16x1xi32>
    %259 = vector.broadcast %35 : i32 to vector<16x1xi32>
    %260 = arith.cmpi slt, %1, %259 : vector<16x1xi32>
    %261 = arith.andi %258, %260 : vector<16x1xi1>
    %cst_53 = arith.constant 0xFF800000 : f32
    %262 = vector.shape_cast %261 : vector<16x1xi1> to vector<16x1xi1>
    %263 = vector.broadcast %262 : vector<16x1xi1> to vector<16x4xi1>
    %264 = vector.broadcast %cst_53 : f32 to vector<16x4xf32>
    %265 = arith.select %263, %172, %264 : vector<16x4xi1>, vector<16x4xf32>
    %cst_54 = arith.constant dense<0xFF800000> : vector<4xf32>
    %266 = vector.multi_reduction <maximumf>, %265, %cst_54 [0] : vector<16x4xf32> to vector<4xf32>
    %267 = vector.shape_cast %266 : vector<4xf32> to vector<1x4xf32>
    %268 = arith.ori %160, %36 : i1
    %cst_55 = arith.constant 0.000000e+00 : f32
    %269 = vector.broadcast %cst_55 : f32 to vector<1x4xf32>
    %270 = arith.select %268, %269, %267 : vector<1x4xf32>
    %271 = tpu.concatenate %186, %200, %214, %228, %242, %256, %270 in 0 : vector<1x4xf32>, vector<1x4xf32>, vector<1x4xf32>, vector<1x4xf32>, vector<1x4xf32>, vector<1x4xf32>, vector<1x4xf32> -> vector<7x4xf32>
    %c0_56 = arith.constant 0 : index
    %c1_57 = arith.constant 1 : index
    %c0_58 = arith.constant 0 : index
    %c0_59 = arith.constant 0 : index
    %272 = vector.load %arg3[%c0_56, %c1_57, %c0_58, %c0_59] : memref<1x7x7x4xf32, #tpu.memory_space<vmem>>, vector<1x1x7x4xf32>
    %273 = vector.shape_cast %272 : vector<1x1x7x4xf32> to vector<7x4xf32>
    %274 = vector.shape_cast %271 : vector<7x4xf32> to vector<1x1x7x4xf32>
    tpu.vector_store %arg3[%c0_56, %c1_57, %c0_58, %c0_59], %274 {strides = array<i32>} : memref<1x7x7x4xf32, #tpu.memory_space<vmem>>, vector<1x1x7x4xf32>,
    %c3 = arith.constant 3 : index
    %275 = arith.index_cast %arg0 : i32 to index
    %276 = memref.load %arg1[%c3, %275] : memref<29x4xi32, #tpu.memory_space<smem>>
    %c10 = arith.constant 10 : index
    %277 = arith.index_cast %arg0 : i32 to index
    %278 = memref.load %arg1[%c10, %277] : memref<29x4xi32, #tpu.memory_space<smem>>
    %279 = arith.cmpi sle, %278, %276 : i32
    %280 = vector.broadcast %276 : i32 to vector<16x1xi32>
    %281 = arith.cmpi sge, %0, %280 : vector<16x1xi32>
    %282 = vector.broadcast %278 : i32 to vector<16x1xi32>
    %283 = arith.cmpi slt, %0, %282 : vector<16x1xi32>
    %284 = arith.andi %281, %283 : vector<16x1xi1>
    %c0_60 = arith.constant 0 : index
    %c0_61 = arith.constant 0 : index
    %c0_62 = arith.constant 0 : index
    %c0_63 = arith.constant 0 : index
    %285 = vector.load %arg2[%c0_60, %c0_61, %c0_62, %c0_63] : memref<1x16x16x4xf32, #tpu.memory_space<vmem>>, vector<1x16x16x4xf32>
    %286 = vector.shape_cast %285 : vector<1x16x16x4xf32> to vector<16x16x4xf32>
    %cst_64 = arith.constant 0xFF800000 : f32
    %287 = vector.shape_cast %284 : vector<16x1xi1> to vector<1x16x1xi1>
    %288 = vector.broadcast %287 : vector<1x16x1xi1> to vector<16x16x4xi1>
    %289 = vector.broadcast %cst_64 : f32 to vector<16x16x4xf32>
    %290 = arith.select %288, %286, %289 : vector<16x16x4xi1>, vector<16x16x4xf32>
    %cst_65 = arith.constant dense<0xFF800000> : vector<16x4xf32>
    %291 = vector.multi_reduction <maximumf>, %290, %cst_65 [1] : vector<16x16x4xf32> to vector<16x4xf32>
    %292 = vector.broadcast %3 : i32 to vector<16x1xi32>
    %293 = arith.cmpi sge, %1, %292 : vector<16x1xi32>
    %294 = vector.broadcast %5 : i32 to vector<16x1xi32>
    %295 = arith.cmpi slt, %1, %294 : vector<16x1xi32>
    %296 = arith.andi %293, %295 : vector<16x1xi1>
    %cst_66 = arith.constant 0xFF800000 : f32
    %297 = vector.shape_cast %296 : vector<16x1xi1> to vector<16x1xi1>
    %298 = vector.broadcast %297 : vector<16x1xi1> to vector<16x4xi1>
    %299 = vector.broadcast %cst_66 : f32 to vector<16x4xf32>
    %300 = arith.select %298, %291, %299 : vector<16x4xi1>, vector<16x4xf32>
    %cst_67 = arith.constant dense<0xFF800000> : vector<4xf32>
    %301 = vector.multi_reduction <maximumf>, %300, %cst_67 [0] : vector<16x4xf32> to vector<4xf32>
    %302 = vector.shape_cast %301 : vector<4xf32> to vector<1x4xf32>
    %303 = arith.ori %279, %6 : i1
    %cst_68 = arith.constant 0.000000e+00 : f32
    %304 = vector.broadcast %cst_68 : f32 to vector<1x4xf32>
    %305 = arith.select %303, %304, %302 : vector<1x4xf32>
    %306 = vector.broadcast %8 : i32 to vector<16x1xi32>
    %307 = arith.cmpi sge, %1, %306 : vector<16x1xi32>
    %308 = vector.broadcast %10 : i32 to vector<16x1xi32>
    %309 = arith.cmpi slt, %1, %308 : vector<16x1xi32>
    %310 = arith.andi %307, %309 : vector<16x1xi1>
    %cst_69 = arith.constant 0xFF800000 : f32
    %311 = vector.shape_cast %310 : vector<16x1xi1> to vector<16x1xi1>
    %312 = vector.broadcast %311 : vector<16x1xi1> to vector<16x4xi1>
    %313 = vector.broadcast %cst_69 : f32 to vector<16x4xf32>
    %314 = arith.select %312, %291, %313 : vector<16x4xi1>, vector<16x4xf32>
    %cst_70 = arith.constant dense<0xFF800000> : vector<4xf32>
    %315 = vector.multi_reduction <maximumf>, %314, %cst_70 [0] : vector<16x4xf32> to vector<4xf32>
    %316 = vector.shape_cast %315 : vector<4xf32> to vector<1x4xf32>
    %317 = arith.ori %279, %11 : i1
    %cst_71 = arith.constant 0.000000e+00 : f32
    %318 = vector.broadcast %cst_71 : f32 to vector<1x4xf32>
    %319 = arith.select %317, %318, %316 : vector<1x4xf32>
    %320 = vector.broadcast %13 : i32 to vector<16x1xi32>
    %321 = arith.cmpi sge, %1, %320 : vector<16x1xi32>
    %322 = vector.broadcast %15 : i32 to vector<16x1xi32>
    %323 = arith.cmpi slt, %1, %322 : vector<16x1xi32>
    %324 = arith.andi %321, %323 : vector<16x1xi1>
    %cst_72 = arith.constant 0xFF800000 : f32
    %325 = vector.shape_cast %324 : vector<16x1xi1> to vector<16x1xi1>
    %326 = vector.broadcast %325 : vector<16x1xi1> to vector<16x4xi1>
    %327 = vector.broadcast %cst_72 : f32 to vector<16x4xf32>
    %328 = arith.select %326, %291, %327 : vector<16x4xi1>, vector<16x4xf32>
    %cst_73 = arith.constant dense<0xFF800000> : vector<4xf32>
    %329 = vector.multi_reduction <maximumf>, %328, %cst_73 [0] : vector<16x4xf32> to vector<4xf32>
    %330 = vector.shape_cast %329 : vector<4xf32> to vector<1x4xf32>
    %331 = arith.ori %279, %16 : i1
    %cst_74 = arith.constant 0.000000e+00 : f32
    %332 = vector.broadcast %cst_74 : f32 to vector<1x4xf32>
    %333 = arith.select %331, %332, %330 : vector<1x4xf32>
    %334 = vector.broadcast %18 : i32 to vector<16x1xi32>
    %335 = arith.cmpi sge, %1, %334 : vector<16x1xi32>
    %336 = vector.broadcast %20 : i32 to vector<16x1xi32>
    %337 = arith.cmpi slt, %1, %336 : vector<16x1xi32>
    %338 = arith.andi %335, %337 : vector<16x1xi1>
    %cst_75 = arith.constant 0xFF800000 : f32
    %339 = vector.shape_cast %338 : vector<16x1xi1> to vector<16x1xi1>
    %340 = vector.broadcast %339 : vector<16x1xi1> to vector<16x4xi1>
    %341 = vector.broadcast %cst_75 : f32 to vector<16x4xf32>
    %342 = arith.select %340, %291, %341 : vector<16x4xi1>, vector<16x4xf32>
    %cst_76 = arith.constant dense<0xFF800000> : vector<4xf32>
    %343 = vector.multi_reduction <maximumf>, %342, %cst_76 [0] : vector<16x4xf32> to vector<4xf32>
    %344 = vector.shape_cast %343 : vector<4xf32> to vector<1x4xf32>
    %345 = arith.ori %279, %21 : i1
    %cst_77 = arith.constant 0.000000e+00 : f32
    %346 = vector.broadcast %cst_77 : f32 to vector<1x4xf32>
    %347 = arith.select %345, %346, %344 : vector<1x4xf32>
    %348 = vector.broadcast %23 : i32 to vector<16x1xi32>
    %349 = arith.cmpi sge, %1, %348 : vector<16x1xi32>
    %350 = vector.broadcast %25 : i32 to vector<16x1xi32>
    %351 = arith.cmpi slt, %1, %350 : vector<16x1xi32>
    %352 = arith.andi %349, %351 : vector<16x1xi1>
    %cst_78 = arith.constant 0xFF800000 : f32
    %353 = vector.shape_cast %352 : vector<16x1xi1> to vector<16x1xi1>
    %354 = vector.broadcast %353 : vector<16x1xi1> to vector<16x4xi1>
    %355 = vector.broadcast %cst_78 : f32 to vector<16x4xf32>
    %356 = arith.select %354, %291, %355 : vector<16x4xi1>, vector<16x4xf32>
    %cst_79 = arith.constant dense<0xFF800000> : vector<4xf32>
    %357 = vector.multi_reduction <maximumf>, %356, %cst_79 [0] : vector<16x4xf32> to vector<4xf32>
    %358 = vector.shape_cast %357 : vector<4xf32> to vector<1x4xf32>
    %359 = arith.ori %279, %26 : i1
    %cst_80 = arith.constant 0.000000e+00 : f32
    %360 = vector.broadcast %cst_80 : f32 to vector<1x4xf32>
    %361 = arith.select %359, %360, %358 : vector<1x4xf32>
    %362 = vector.broadcast %28 : i32 to vector<16x1xi32>
    %363 = arith.cmpi sge, %1, %362 : vector<16x1xi32>
    %364 = vector.broadcast %30 : i32 to vector<16x1xi32>
    %365 = arith.cmpi slt, %1, %364 : vector<16x1xi32>
    %366 = arith.andi %363, %365 : vector<16x1xi1>
    %cst_81 = arith.constant 0xFF800000 : f32
    %367 = vector.shape_cast %366 : vector<16x1xi1> to vector<16x1xi1>
    %368 = vector.broadcast %367 : vector<16x1xi1> to vector<16x4xi1>
    %369 = vector.broadcast %cst_81 : f32 to vector<16x4xf32>
    %370 = arith.select %368, %291, %369 : vector<16x4xi1>, vector<16x4xf32>
    %cst_82 = arith.constant dense<0xFF800000> : vector<4xf32>
    %371 = vector.multi_reduction <maximumf>, %370, %cst_82 [0] : vector<16x4xf32> to vector<4xf32>
    %372 = vector.shape_cast %371 : vector<4xf32> to vector<1x4xf32>
    %373 = arith.ori %279, %31 : i1
    %cst_83 = arith.constant 0.000000e+00 : f32
    %374 = vector.broadcast %cst_83 : f32 to vector<1x4xf32>
    %375 = arith.select %373, %374, %372 : vector<1x4xf32>
    %376 = vector.broadcast %33 : i32 to vector<16x1xi32>
    %377 = arith.cmpi sge, %1, %376 : vector<16x1xi32>
    %378 = vector.broadcast %35 : i32 to vector<16x1xi32>
    %379 = arith.cmpi slt, %1, %378 : vector<16x1xi32>
    %380 = arith.andi %377, %379 : vector<16x1xi1>
    %cst_84 = arith.constant 0xFF800000 : f32
    %381 = vector.shape_cast %380 : vector<16x1xi1> to vector<16x1xi1>
    %382 = vector.broadcast %381 : vector<16x1xi1> to vector<16x4xi1>
    %383 = vector.broadcast %cst_84 : f32 to vector<16x4xf32>
    %384 = arith.select %382, %291, %383 : vector<16x4xi1>, vector<16x4xf32>
    %cst_85 = arith.constant dense<0xFF800000> : vector<4xf32>
    %385 = vector.multi_reduction <maximumf>, %384, %cst_85 [0] : vector<16x4xf32> to vector<4xf32>
    %386 = vector.shape_cast %385 : vector<4xf32> to vector<1x4xf32>
    %387 = arith.ori %279, %36 : i1
    %cst_86 = arith.constant 0.000000e+00 : f32
    %388 = vector.broadcast %cst_86 : f32 to vector<1x4xf32>
    %389 = arith.select %387, %388, %386 : vector<1x4xf32>
    %390 = tpu.concatenate %305, %319, %333, %347, %361, %375, %389 in 0 : vector<1x4xf32>, vector<1x4xf32>, vector<1x4xf32>, vector<1x4xf32>, vector<1x4xf32>, vector<1x4xf32>, vector<1x4xf32> -> vector<7x4xf32>
    %c0_87 = arith.constant 0 : index
    %c2_88 = arith.constant 2 : index
    %c0_89 = arith.constant 0 : index
    %c0_90 = arith.constant 0 : index
    %391 = vector.load %arg3[%c0_87, %c2_88, %c0_89, %c0_90] : memref<1x7x7x4xf32, #tpu.memory_space<vmem>>, vector<1x1x7x4xf32>
    %392 = vector.shape_cast %391 : vector<1x1x7x4xf32> to vector<7x4xf32>
    %393 = vector.shape_cast %390 : vector<7x4xf32> to vector<1x1x7x4xf32>
    tpu.vector_store %arg3[%c0_87, %c2_88, %c0_89, %c0_90], %393 {strides = array<i32>} : memref<1x7x7x4xf32, #tpu.memory_space<vmem>>, vector<1x1x7x4xf32>,
    %c4 = arith.constant 4 : index
    %394 = arith.index_cast %arg0 : i32 to index
    %395 = memref.load %arg1[%c4, %394] : memref<29x4xi32, #tpu.memory_space<smem>>
    %c11 = arith.constant 11 : index
    %396 = arith.index_cast %arg0 : i32 to index
    %397 = memref.load %arg1[%c11, %396] : memref<29x4xi32, #tpu.memory_space<smem>>
    %398 = arith.cmpi sle, %397, %395 : i32
    %399 = vector.broadcast %395 : i32 to vector<16x1xi32>
    %400 = arith.cmpi sge, %0, %399 : vector<16x1xi32>
    %401 = vector.broadcast %397 : i32 to vector<16x1xi32>
    %402 = arith.cmpi slt, %0, %401 : vector<16x1xi32>
    %403 = arith.andi %400, %402 : vector<16x1xi1>
    %c0_91 = arith.constant 0 : index
    %c0_92 = arith.constant 0 : index
    %c0_93 = arith.constant 0 : index
    %c0_94 = arith.constant 0 : index
    %404 = vector.load %arg2[%c0_91, %c0_92, %c0_93, %c0_94] : memref<1x16x16x4xf32, #tpu.memory_space<vmem>>, vector<1x16x16x4xf32>
    %405 = vector.shape_cast %404 : vector<1x16x16x4xf32> to vector<16x16x4xf32>
    %cst_95 = arith.constant 0xFF800000 : f32
    %406 = vector.shape_cast %403 : vector<16x1xi1> to vector<1x16x1xi1>
    %407 = vector.broadcast %406 : vector<1x16x1xi1> to vector<16x16x4xi1>
    %408 = vector.broadcast %cst_95 : f32 to vector<16x16x4xf32>
    %409 = arith.select %407, %405, %408 : vector<16x16x4xi1>, vector<16x16x4xf32>
    %cst_96 = arith.constant dense<0xFF800000> : vector<16x4xf32>
    %410 = vector.multi_reduction <maximumf>, %409, %cst_96 [1] : vector<16x16x4xf32> to vector<16x4xf32>
    %411 = vector.broadcast %3 : i32 to vector<16x1xi32>
    %412 = arith.cmpi sge, %1, %411 : vector<16x1xi32>
    %413 = vector.broadcast %5 : i32 to vector<16x1xi32>
    %414 = arith.cmpi slt, %1, %413 : vector<16x1xi32>
    %415 = arith.andi %412, %414 : vector<16x1xi1>
    %cst_97 = arith.constant 0xFF800000 : f32
    %416 = vector.shape_cast %415 : vector<16x1xi1> to vector<16x1xi1>
    %417 = vector.broadcast %416 : vector<16x1xi1> to vector<16x4xi1>
    %418 = vector.broadcast %cst_97 : f32 to vector<16x4xf32>
    %419 = arith.select %417, %410, %418 : vector<16x4xi1>, vector<16x4xf32>
    %cst_98 = arith.constant dense<0xFF800000> : vector<4xf32>
    %420 = vector.multi_reduction <maximumf>, %419, %cst_98 [0] : vector<16x4xf32> to vector<4xf32>
    %421 = vector.shape_cast %420 : vector<4xf32> to vector<1x4xf32>
    %422 = arith.ori %398, %6 : i1
    %cst_99 = arith.constant 0.000000e+00 : f32
    %423 = vector.broadcast %cst_99 : f32 to vector<1x4xf32>
    %424 = arith.select %422, %423, %421 : vector<1x4xf32>
    %425 = vector.broadcast %8 : i32 to vector<16x1xi32>
    %426 = arith.cmpi sge, %1, %425 : vector<16x1xi32>
    %427 = vector.broadcast %10 : i32 to vector<16x1xi32>
    %428 = arith.cmpi slt, %1, %427 : vector<16x1xi32>
    %429 = arith.andi %426, %428 : vector<16x1xi1>
    %cst_100 = arith.constant 0xFF800000 : f32
    %430 = vector.shape_cast %429 : vector<16x1xi1> to vector<16x1xi1>
    %431 = vector.broadcast %430 : vector<16x1xi1> to vector<16x4xi1>
    %432 = vector.broadcast %cst_100 : f32 to vector<16x4xf32>
    %433 = arith.select %431, %410, %432 : vector<16x4xi1>, vector<16x4xf32>
    %cst_101 = arith.constant dense<0xFF800000> : vector<4xf32>
    %434 = vector.multi_reduction <maximumf>, %433, %cst_101 [0] : vector<16x4xf32> to vector<4xf32>
    %435 = vector.shape_cast %434 : vector<4xf32> to vector<1x4xf32>
    %436 = arith.ori %398, %11 : i1
    %cst_102 = arith.constant 0.000000e+00 : f32
    %437 = vector.broadcast %cst_102 : f32 to vector<1x4xf32>
    %438 = arith.select %436, %437, %435 : vector<1x4xf32>
    %439 = vector.broadcast %13 : i32 to vector<16x1xi32>
    %440 = arith.cmpi sge, %1, %439 : vector<16x1xi32>
    %441 = vector.broadcast %15 : i32 to vector<16x1xi32>
    %442 = arith.cmpi slt, %1, %441 : vector<16x1xi32>
    %443 = arith.andi %440, %442 : vector<16x1xi1>
    %cst_103 = arith.constant 0xFF800000 : f32
    %444 = vector.shape_cast %443 : vector<16x1xi1> to vector<16x1xi1>
    %445 = vector.broadcast %444 : vector<16x1xi1> to vector<16x4xi1>
    %446 = vector.broadcast %cst_103 : f32 to vector<16x4xf32>
    %447 = arith.select %445, %410, %446 : vector<16x4xi1>, vector<16x4xf32>
    %cst_104 = arith.constant dense<0xFF800000> : vector<4xf32>
    %448 = vector.multi_reduction <maximumf>, %447, %cst_104 [0] : vector<16x4xf32> to vector<4xf32>
    %449 = vector.shape_cast %448 : vector<4xf32> to vector<1x4xf32>
    %450 = arith.ori %398, %16 : i1
    %cst_105 = arith.constant 0.000000e+00 : f32
    %451 = vector.broadcast %cst_105 : f32 to vector<1x4xf32>
    %452 = arith.select %450, %451, %449 : vector<1x4xf32>
    %453 = vector.broadcast %18 : i32 to vector<16x1xi32>
    %454 = arith.cmpi sge, %1, %453 : vector<16x1xi32>
    %455 = vector.broadcast %20 : i32 to vector<16x1xi32>
    %456 = arith.cmpi slt, %1, %455 : vector<16x1xi32>
    %457 = arith.andi %454, %456 : vector<16x1xi1>
    %cst_106 = arith.constant 0xFF800000 : f32
    %458 = vector.shape_cast %457 : vector<16x1xi1> to vector<16x1xi1>
    %459 = vector.broadcast %458 : vector<16x1xi1> to vector<16x4xi1>
    %460 = vector.broadcast %cst_106 : f32 to vector<16x4xf32>
    %461 = arith.select %459, %410, %460 : vector<16x4xi1>, vector<16x4xf32>
    %cst_107 = arith.constant dense<0xFF800000> : vector<4xf32>
    %462 = vector.multi_reduction <maximumf>, %461, %cst_107 [0] : vector<16x4xf32> to vector<4xf32>
    %463 = vector.shape_cast %462 : vector<4xf32> to vector<1x4xf32>
    %464 = arith.ori %398, %21 : i1
    %cst_108 = arith.constant 0.000000e+00 : f32
    %465 = vector.broadcast %cst_108 : f32 to vector<1x4xf32>
    %466 = arith.select %464, %465, %463 : vector<1x4xf32>
    %467 = vector.broadcast %23 : i32 to vector<16x1xi32>
    %468 = arith.cmpi sge, %1, %467 : vector<16x1xi32>
    %469 = vector.broadcast %25 : i32 to vector<16x1xi32>
    %470 = arith.cmpi slt, %1, %469 : vector<16x1xi32>
    %471 = arith.andi %468, %470 : vector<16x1xi1>
    %cst_109 = arith.constant 0xFF800000 : f32
    %472 = vector.shape_cast %471 : vector<16x1xi1> to vector<16x1xi1>
    %473 = vector.broadcast %472 : vector<16x1xi1> to vector<16x4xi1>
    %474 = vector.broadcast %cst_109 : f32 to vector<16x4xf32>
    %475 = arith.select %473, %410, %474 : vector<16x4xi1>, vector<16x4xf32>
    %cst_110 = arith.constant dense<0xFF800000> : vector<4xf32>
    %476 = vector.multi_reduction <maximumf>, %475, %cst_110 [0] : vector<16x4xf32> to vector<4xf32>
    %477 = vector.shape_cast %476 : vector<4xf32> to vector<1x4xf32>
    %478 = arith.ori %398, %26 : i1
    %cst_111 = arith.constant 0.000000e+00 : f32
    %479 = vector.broadcast %cst_111 : f32 to vector<1x4xf32>
    %480 = arith.select %478, %479, %477 : vector<1x4xf32>
    %481 = vector.broadcast %28 : i32 to vector<16x1xi32>
    %482 = arith.cmpi sge, %1, %481 : vector<16x1xi32>
    %483 = vector.broadcast %30 : i32 to vector<16x1xi32>
    %484 = arith.cmpi slt, %1, %483 : vector<16x1xi32>
    %485 = arith.andi %482, %484 : vector<16x1xi1>
    %cst_112 = arith.constant 0xFF800000 : f32
    %486 = vector.shape_cast %485 : vector<16x1xi1> to vector<16x1xi1>
    %487 = vector.broadcast %486 : vector<16x1xi1> to vector<16x4xi1>
    %488 = vector.broadcast %cst_112 : f32 to vector<16x4xf32>
    %489 = arith.select %487, %410, %488 : vector<16x4xi1>, vector<16x4xf32>
    %cst_113 = arith.constant dense<0xFF800000> : vector<4xf32>
    %490 = vector.multi_reduction <maximumf>, %489, %cst_113 [0] : vector<16x4xf32> to vector<4xf32>
    %491 = vector.shape_cast %490 : vector<4xf32> to vector<1x4xf32>
    %492 = arith.ori %398, %31 : i1
    %cst_114 = arith.constant 0.000000e+00 : f32
    %493 = vector.broadcast %cst_114 : f32 to vector<1x4xf32>
    %494 = arith.select %492, %493, %491 : vector<1x4xf32>
    %495 = vector.broadcast %33 : i32 to vector<16x1xi32>
    %496 = arith.cmpi sge, %1, %495 : vector<16x1xi32>
    %497 = vector.broadcast %35 : i32 to vector<16x1xi32>
    %498 = arith.cmpi slt, %1, %497 : vector<16x1xi32>
    %499 = arith.andi %496, %498 : vector<16x1xi1>
    %cst_115 = arith.constant 0xFF800000 : f32
    %500 = vector.shape_cast %499 : vector<16x1xi1> to vector<16x1xi1>
    %501 = vector.broadcast %500 : vector<16x1xi1> to vector<16x4xi1>
    %502 = vector.broadcast %cst_115 : f32 to vector<16x4xf32>
    %503 = arith.select %501, %410, %502 : vector<16x4xi1>, vector<16x4xf32>
    %cst_116 = arith.constant dense<0xFF800000> : vector<4xf32>
    %504 = vector.multi_reduction <maximumf>, %503, %cst_116 [0] : vector<16x4xf32> to vector<4xf32>
    %505 = vector.shape_cast %504 : vector<4xf32> to vector<1x4xf32>
    %506 = arith.ori %398, %36 : i1
    %cst_117 = arith.constant 0.000000e+00 : f32
    %507 = vector.broadcast %cst_117 : f32 to vector<1x4xf32>
    %508 = arith.select %506, %507, %505 : vector<1x4xf32>
    %509 = tpu.concatenate %424, %438, %452, %466, %480, %494, %508 in 0 : vector<1x4xf32>, vector<1x4xf32>, vector<1x4xf32>, vector<1x4xf32>, vector<1x4xf32>, vector<1x4xf32>, vector<1x4xf32> -> vector<7x4xf32>
    %c0_118 = arith.constant 0 : index
    %c3_119 = arith.constant 3 : index
    %c0_120 = arith.constant 0 : index
    %c0_121 = arith.constant 0 : index
    %510 = vector.load %arg3[%c0_118, %c3_119, %c0_120, %c0_121] : memref<1x7x7x4xf32, #tpu.memory_space<vmem>>, vector<1x1x7x4xf32>
    %511 = vector.shape_cast %510 : vector<1x1x7x4xf32> to vector<7x4xf32>
    %512 = vector.shape_cast %509 : vector<7x4xf32> to vector<1x1x7x4xf32>
    tpu.vector_store %arg3[%c0_118, %c3_119, %c0_120, %c0_121], %512 {strides = array<i32>} : memref<1x7x7x4xf32, #tpu.memory_space<vmem>>, vector<1x1x7x4xf32>,
    %c5 = arith.constant 5 : index
    %513 = arith.index_cast %arg0 : i32 to index
    %514 = memref.load %arg1[%c5, %513] : memref<29x4xi32, #tpu.memory_space<smem>>
    %c12 = arith.constant 12 : index
    %515 = arith.index_cast %arg0 : i32 to index
    %516 = memref.load %arg1[%c12, %515] : memref<29x4xi32, #tpu.memory_space<smem>>
    %517 = arith.cmpi sle, %516, %514 : i32
    %518 = vector.broadcast %514 : i32 to vector<16x1xi32>
    %519 = arith.cmpi sge, %0, %518 : vector<16x1xi32>
    %520 = vector.broadcast %516 : i32 to vector<16x1xi32>
    %521 = arith.cmpi slt, %0, %520 : vector<16x1xi32>
    %522 = arith.andi %519, %521 : vector<16x1xi1>
    %c0_122 = arith.constant 0 : index
    %c0_123 = arith.constant 0 : index
    %c0_124 = arith.constant 0 : index
    %c0_125 = arith.constant 0 : index
    %523 = vector.load %arg2[%c0_122, %c0_123, %c0_124, %c0_125] : memref<1x16x16x4xf32, #tpu.memory_space<vmem>>, vector<1x16x16x4xf32>
    %524 = vector.shape_cast %523 : vector<1x16x16x4xf32> to vector<16x16x4xf32>
    %cst_126 = arith.constant 0xFF800000 : f32
    %525 = vector.shape_cast %522 : vector<16x1xi1> to vector<1x16x1xi1>
    %526 = vector.broadcast %525 : vector<1x16x1xi1> to vector<16x16x4xi1>
    %527 = vector.broadcast %cst_126 : f32 to vector<16x16x4xf32>
    %528 = arith.select %526, %524, %527 : vector<16x16x4xi1>, vector<16x16x4xf32>
    %cst_127 = arith.constant dense<0xFF800000> : vector<16x4xf32>
    %529 = vector.multi_reduction <maximumf>, %528, %cst_127 [1] : vector<16x16x4xf32> to vector<16x4xf32>
    %530 = vector.broadcast %3 : i32 to vector<16x1xi32>
    %531 = arith.cmpi sge, %1, %530 : vector<16x1xi32>
    %532 = vector.broadcast %5 : i32 to vector<16x1xi32>
    %533 = arith.cmpi slt, %1, %532 : vector<16x1xi32>
    %534 = arith.andi %531, %533 : vector<16x1xi1>
    %cst_128 = arith.constant 0xFF800000 : f32
    %535 = vector.shape_cast %534 : vector<16x1xi1> to vector<16x1xi1>
    %536 = vector.broadcast %535 : vector<16x1xi1> to vector<16x4xi1>
    %537 = vector.broadcast %cst_128 : f32 to vector<16x4xf32>
    %538 = arith.select %536, %529, %537 : vector<16x4xi1>, vector<16x4xf32>
    %cst_129 = arith.constant dense<0xFF800000> : vector<4xf32>
    %539 = vector.multi_reduction <maximumf>, %538, %cst_129 [0] : vector<16x4xf32> to vector<4xf32>
    %540 = vector.shape_cast %539 : vector<4xf32> to vector<1x4xf32>
    %541 = arith.ori %517, %6 : i1
    %cst_130 = arith.constant 0.000000e+00 : f32
    %542 = vector.broadcast %cst_130 : f32 to vector<1x4xf32>
    %543 = arith.select %541, %542, %540 : vector<1x4xf32>
    %544 = vector.broadcast %8 : i32 to vector<16x1xi32>
    %545 = arith.cmpi sge, %1, %544 : vector<16x1xi32>
    %546 = vector.broadcast %10 : i32 to vector<16x1xi32>
    %547 = arith.cmpi slt, %1, %546 : vector<16x1xi32>
    %548 = arith.andi %545, %547 : vector<16x1xi1>
    %cst_131 = arith.constant 0xFF800000 : f32
    %549 = vector.shape_cast %548 : vector<16x1xi1> to vector<16x1xi1>
    %550 = vector.broadcast %549 : vector<16x1xi1> to vector<16x4xi1>
    %551 = vector.broadcast %cst_131 : f32 to vector<16x4xf32>
    %552 = arith.select %550, %529, %551 : vector<16x4xi1>, vector<16x4xf32>
    %cst_132 = arith.constant dense<0xFF800000> : vector<4xf32>
    %553 = vector.multi_reduction <maximumf>, %552, %cst_132 [0] : vector<16x4xf32> to vector<4xf32>
    %554 = vector.shape_cast %553 : vector<4xf32> to vector<1x4xf32>
    %555 = arith.ori %517, %11 : i1
    %cst_133 = arith.constant 0.000000e+00 : f32
    %556 = vector.broadcast %cst_133 : f32 to vector<1x4xf32>
    %557 = arith.select %555, %556, %554 : vector<1x4xf32>
    %558 = vector.broadcast %13 : i32 to vector<16x1xi32>
    %559 = arith.cmpi sge, %1, %558 : vector<16x1xi32>
    %560 = vector.broadcast %15 : i32 to vector<16x1xi32>
    %561 = arith.cmpi slt, %1, %560 : vector<16x1xi32>
    %562 = arith.andi %559, %561 : vector<16x1xi1>
    %cst_134 = arith.constant 0xFF800000 : f32
    %563 = vector.shape_cast %562 : vector<16x1xi1> to vector<16x1xi1>
    %564 = vector.broadcast %563 : vector<16x1xi1> to vector<16x4xi1>
    %565 = vector.broadcast %cst_134 : f32 to vector<16x4xf32>
    %566 = arith.select %564, %529, %565 : vector<16x4xi1>, vector<16x4xf32>
    %cst_135 = arith.constant dense<0xFF800000> : vector<4xf32>
    %567 = vector.multi_reduction <maximumf>, %566, %cst_135 [0] : vector<16x4xf32> to vector<4xf32>
    %568 = vector.shape_cast %567 : vector<4xf32> to vector<1x4xf32>
    %569 = arith.ori %517, %16 : i1
    %cst_136 = arith.constant 0.000000e+00 : f32
    %570 = vector.broadcast %cst_136 : f32 to vector<1x4xf32>
    %571 = arith.select %569, %570, %568 : vector<1x4xf32>
    %572 = vector.broadcast %18 : i32 to vector<16x1xi32>
    %573 = arith.cmpi sge, %1, %572 : vector<16x1xi32>
    %574 = vector.broadcast %20 : i32 to vector<16x1xi32>
    %575 = arith.cmpi slt, %1, %574 : vector<16x1xi32>
    %576 = arith.andi %573, %575 : vector<16x1xi1>
    %cst_137 = arith.constant 0xFF800000 : f32
    %577 = vector.shape_cast %576 : vector<16x1xi1> to vector<16x1xi1>
    %578 = vector.broadcast %577 : vector<16x1xi1> to vector<16x4xi1>
    %579 = vector.broadcast %cst_137 : f32 to vector<16x4xf32>
    %580 = arith.select %578, %529, %579 : vector<16x4xi1>, vector<16x4xf32>
    %cst_138 = arith.constant dense<0xFF800000> : vector<4xf32>
    %581 = vector.multi_reduction <maximumf>, %580, %cst_138 [0] : vector<16x4xf32> to vector<4xf32>
    %582 = vector.shape_cast %581 : vector<4xf32> to vector<1x4xf32>
    %583 = arith.ori %517, %21 : i1
    %cst_139 = arith.constant 0.000000e+00 : f32
    %584 = vector.broadcast %cst_139 : f32 to vector<1x4xf32>
    %585 = arith.select %583, %584, %582 : vector<1x4xf32>
    %586 = vector.broadcast %23 : i32 to vector<16x1xi32>
    %587 = arith.cmpi sge, %1, %586 : vector<16x1xi32>
    %588 = vector.broadcast %25 : i32 to vector<16x1xi32>
    %589 = arith.cmpi slt, %1, %588 : vector<16x1xi32>
    %590 = arith.andi %587, %589 : vector<16x1xi1>
    %cst_140 = arith.constant 0xFF800000 : f32
    %591 = vector.shape_cast %590 : vector<16x1xi1> to vector<16x1xi1>
    %592 = vector.broadcast %591 : vector<16x1xi1> to vector<16x4xi1>
    %593 = vector.broadcast %cst_140 : f32 to vector<16x4xf32>
    %594 = arith.select %592, %529, %593 : vector<16x4xi1>, vector<16x4xf32>
    %cst_141 = arith.constant dense<0xFF800000> : vector<4xf32>
    %595 = vector.multi_reduction <maximumf>, %594, %cst_141 [0] : vector<16x4xf32> to vector<4xf32>
    %596 = vector.shape_cast %595 : vector<4xf32> to vector<1x4xf32>
    %597 = arith.ori %517, %26 : i1
    %cst_142 = arith.constant 0.000000e+00 : f32
    %598 = vector.broadcast %cst_142 : f32 to vector<1x4xf32>
    %599 = arith.select %597, %598, %596 : vector<1x4xf32>
    %600 = vector.broadcast %28 : i32 to vector<16x1xi32>
    %601 = arith.cmpi sge, %1, %600 : vector<16x1xi32>
    %602 = vector.broadcast %30 : i32 to vector<16x1xi32>
    %603 = arith.cmpi slt, %1, %602 : vector<16x1xi32>
    %604 = arith.andi %601, %603 : vector<16x1xi1>
    %cst_143 = arith.constant 0xFF800000 : f32
    %605 = vector.shape_cast %604 : vector<16x1xi1> to vector<16x1xi1>
    %606 = vector.broadcast %605 : vector<16x1xi1> to vector<16x4xi1>
    %607 = vector.broadcast %cst_143 : f32 to vector<16x4xf32>
    %608 = arith.select %606, %529, %607 : vector<16x4xi1>, vector<16x4xf32>
    %cst_144 = arith.constant dense<0xFF800000> : vector<4xf32>
    %609 = vector.multi_reduction <maximumf>, %608, %cst_144 [0] : vector<16x4xf32> to vector<4xf32>
    %610 = vector.shape_cast %609 : vector<4xf32> to vector<1x4xf32>
    %611 = arith.ori %517, %31 : i1
    %cst_145 = arith.constant 0.000000e+00 : f32
    %612 = vector.broadcast %cst_145 : f32 to vector<1x4xf32>
    %613 = arith.select %611, %612, %610 : vector<1x4xf32>
    %614 = vector.broadcast %33 : i32 to vector<16x1xi32>
    %615 = arith.cmpi sge, %1, %614 : vector<16x1xi32>
    %616 = vector.broadcast %35 : i32 to vector<16x1xi32>
    %617 = arith.cmpi slt, %1, %616 : vector<16x1xi32>
    %618 = arith.andi %615, %617 : vector<16x1xi1>
    %cst_146 = arith.constant 0xFF800000 : f32
    %619 = vector.shape_cast %618 : vector<16x1xi1> to vector<16x1xi1>
    %620 = vector.broadcast %619 : vector<16x1xi1> to vector<16x4xi1>
    %621 = vector.broadcast %cst_146 : f32 to vector<16x4xf32>
    %622 = arith.select %620, %529, %621 : vector<16x4xi1>, vector<16x4xf32>
    %cst_147 = arith.constant dense<0xFF800000> : vector<4xf32>
    %623 = vector.multi_reduction <maximumf>, %622, %cst_147 [0] : vector<16x4xf32> to vector<4xf32>
    %624 = vector.shape_cast %623 : vector<4xf32> to vector<1x4xf32>
    %625 = arith.ori %517, %36 : i1
    %cst_148 = arith.constant 0.000000e+00 : f32
    %626 = vector.broadcast %cst_148 : f32 to vector<1x4xf32>
    %627 = arith.select %625, %626, %624 : vector<1x4xf32>
    %628 = tpu.concatenate %543, %557, %571, %585, %599, %613, %627 in 0 : vector<1x4xf32>, vector<1x4xf32>, vector<1x4xf32>, vector<1x4xf32>, vector<1x4xf32>, vector<1x4xf32>, vector<1x4xf32> -> vector<7x4xf32>
    %c0_149 = arith.constant 0 : index
    %c4_150 = arith.constant 4 : index
    %c0_151 = arith.constant 0 : index
    %c0_152 = arith.constant 0 : index
    %629 = vector.load %arg3[%c0_149, %c4_150, %c0_151, %c0_152] : memref<1x7x7x4xf32, #tpu.memory_space<vmem>>, vector<1x1x7x4xf32>
    %630 = vector.shape_cast %629 : vector<1x1x7x4xf32> to vector<7x4xf32>
    %631 = vector.shape_cast %628 : vector<7x4xf32> to vector<1x1x7x4xf32>
    tpu.vector_store %arg3[%c0_149, %c4_150, %c0_151, %c0_152], %631 {strides = array<i32>} : memref<1x7x7x4xf32, #tpu.memory_space<vmem>>, vector<1x1x7x4xf32>,
    %c6 = arith.constant 6 : index
    %632 = arith.index_cast %arg0 : i32 to index
    %633 = memref.load %arg1[%c6, %632] : memref<29x4xi32, #tpu.memory_space<smem>>
    %c13 = arith.constant 13 : index
    %634 = arith.index_cast %arg0 : i32 to index
    %635 = memref.load %arg1[%c13, %634] : memref<29x4xi32, #tpu.memory_space<smem>>
    %636 = arith.cmpi sle, %635, %633 : i32
    %637 = vector.broadcast %633 : i32 to vector<16x1xi32>
    %638 = arith.cmpi sge, %0, %637 : vector<16x1xi32>
    %639 = vector.broadcast %635 : i32 to vector<16x1xi32>
    %640 = arith.cmpi slt, %0, %639 : vector<16x1xi32>
    %641 = arith.andi %638, %640 : vector<16x1xi1>
    %c0_153 = arith.constant 0 : index
    %c0_154 = arith.constant 0 : index
    %c0_155 = arith.constant 0 : index
    %c0_156 = arith.constant 0 : index
    %642 = vector.load %arg2[%c0_153, %c0_154, %c0_155, %c0_156] : memref<1x16x16x4xf32, #tpu.memory_space<vmem>>, vector<1x16x16x4xf32>
    %643 = vector.shape_cast %642 : vector<1x16x16x4xf32> to vector<16x16x4xf32>
    %cst_157 = arith.constant 0xFF800000 : f32
    %644 = vector.shape_cast %641 : vector<16x1xi1> to vector<1x16x1xi1>
    %645 = vector.broadcast %644 : vector<1x16x1xi1> to vector<16x16x4xi1>
    %646 = vector.broadcast %cst_157 : f32 to vector<16x16x4xf32>
    %647 = arith.select %645, %643, %646 : vector<16x16x4xi1>, vector<16x16x4xf32>
    %cst_158 = arith.constant dense<0xFF800000> : vector<16x4xf32>
    %648 = vector.multi_reduction <maximumf>, %647, %cst_158 [1] : vector<16x16x4xf32> to vector<16x4xf32>
    %649 = vector.broadcast %3 : i32 to vector<16x1xi32>
    %650 = arith.cmpi sge, %1, %649 : vector<16x1xi32>
    %651 = vector.broadcast %5 : i32 to vector<16x1xi32>
    %652 = arith.cmpi slt, %1, %651 : vector<16x1xi32>
    %653 = arith.andi %650, %652 : vector<16x1xi1>
    %cst_159 = arith.constant 0xFF800000 : f32
    %654 = vector.shape_cast %653 : vector<16x1xi1> to vector<16x1xi1>
    %655 = vector.broadcast %654 : vector<16x1xi1> to vector<16x4xi1>
    %656 = vector.broadcast %cst_159 : f32 to vector<16x4xf32>
    %657 = arith.select %655, %648, %656 : vector<16x4xi1>, vector<16x4xf32>
    %cst_160 = arith.constant dense<0xFF800000> : vector<4xf32>
    %658 = vector.multi_reduction <maximumf>, %657, %cst_160 [0] : vector<16x4xf32> to vector<4xf32>
    %659 = vector.shape_cast %658 : vector<4xf32> to vector<1x4xf32>
    %660 = arith.ori %636, %6 : i1
    %cst_161 = arith.constant 0.000000e+00 : f32
    %661 = vector.broadcast %cst_161 : f32 to vector<1x4xf32>
    %662 = arith.select %660, %661, %659 : vector<1x4xf32>
    %663 = vector.broadcast %8 : i32 to vector<16x1xi32>
    %664 = arith.cmpi sge, %1, %663 : vector<16x1xi32>
    %665 = vector.broadcast %10 : i32 to vector<16x1xi32>
    %666 = arith.cmpi slt, %1, %665 : vector<16x1xi32>
    %667 = arith.andi %664, %666 : vector<16x1xi1>
    %cst_162 = arith.constant 0xFF800000 : f32
    %668 = vector.shape_cast %667 : vector<16x1xi1> to vector<16x1xi1>
    %669 = vector.broadcast %668 : vector<16x1xi1> to vector<16x4xi1>
    %670 = vector.broadcast %cst_162 : f32 to vector<16x4xf32>
    %671 = arith.select %669, %648, %670 : vector<16x4xi1>, vector<16x4xf32>
    %cst_163 = arith.constant dense<0xFF800000> : vector<4xf32>
    %672 = vector.multi_reduction <maximumf>, %671, %cst_163 [0] : vector<16x4xf32> to vector<4xf32>
    %673 = vector.shape_cast %672 : vector<4xf32> to vector<1x4xf32>
    %674 = arith.ori %636, %11 : i1
    %cst_164 = arith.constant 0.000000e+00 : f32
    %675 = vector.broadcast %cst_164 : f32 to vector<1x4xf32>
    %676 = arith.select %674, %675, %673 : vector<1x4xf32>
    %677 = vector.broadcast %13 : i32 to vector<16x1xi32>
    %678 = arith.cmpi sge, %1, %677 : vector<16x1xi32>
    %679 = vector.broadcast %15 : i32 to vector<16x1xi32>
    %680 = arith.cmpi slt, %1, %679 : vector<16x1xi32>
    %681 = arith.andi %678, %680 : vector<16x1xi1>
    %cst_165 = arith.constant 0xFF800000 : f32
    %682 = vector.shape_cast %681 : vector<16x1xi1> to vector<16x1xi1>
    %683 = vector.broadcast %682 : vector<16x1xi1> to vector<16x4xi1>
    %684 = vector.broadcast %cst_165 : f32 to vector<16x4xf32>
    %685 = arith.select %683, %648, %684 : vector<16x4xi1>, vector<16x4xf32>
    %cst_166 = arith.constant dense<0xFF800000> : vector<4xf32>
    %686 = vector.multi_reduction <maximumf>, %685, %cst_166 [0] : vector<16x4xf32> to vector<4xf32>
    %687 = vector.shape_cast %686 : vector<4xf32> to vector<1x4xf32>
    %688 = arith.ori %636, %16 : i1
    %cst_167 = arith.constant 0.000000e+00 : f32
    %689 = vector.broadcast %cst_167 : f32 to vector<1x4xf32>
    %690 = arith.select %688, %689, %687 : vector<1x4xf32>
    %691 = vector.broadcast %18 : i32 to vector<16x1xi32>
    %692 = arith.cmpi sge, %1, %691 : vector<16x1xi32>
    %693 = vector.broadcast %20 : i32 to vector<16x1xi32>
    %694 = arith.cmpi slt, %1, %693 : vector<16x1xi32>
    %695 = arith.andi %692, %694 : vector<16x1xi1>
    %cst_168 = arith.constant 0xFF800000 : f32
    %696 = vector.shape_cast %695 : vector<16x1xi1> to vector<16x1xi1>
    %697 = vector.broadcast %696 : vector<16x1xi1> to vector<16x4xi1>
    %698 = vector.broadcast %cst_168 : f32 to vector<16x4xf32>
    %699 = arith.select %697, %648, %698 : vector<16x4xi1>, vector<16x4xf32>
    %cst_169 = arith.constant dense<0xFF800000> : vector<4xf32>
    %700 = vector.multi_reduction <maximumf>, %699, %cst_169 [0] : vector<16x4xf32> to vector<4xf32>
    %701 = vector.shape_cast %700 : vector<4xf32> to vector<1x4xf32>
    %702 = arith.ori %636, %21 : i1
    %cst_170 = arith.constant 0.000000e+00 : f32
    %703 = vector.broadcast %cst_170 : f32 to vector<1x4xf32>
    %704 = arith.select %702, %703, %701 : vector<1x4xf32>
    %705 = vector.broadcast %23 : i32 to vector<16x1xi32>
    %706 = arith.cmpi sge, %1, %705 : vector<16x1xi32>
    %707 = vector.broadcast %25 : i32 to vector<16x1xi32>
    %708 = arith.cmpi slt, %1, %707 : vector<16x1xi32>
    %709 = arith.andi %706, %708 : vector<16x1xi1>
    %cst_171 = arith.constant 0xFF800000 : f32
    %710 = vector.shape_cast %709 : vector<16x1xi1> to vector<16x1xi1>
    %711 = vector.broadcast %710 : vector<16x1xi1> to vector<16x4xi1>
    %712 = vector.broadcast %cst_171 : f32 to vector<16x4xf32>
    %713 = arith.select %711, %648, %712 : vector<16x4xi1>, vector<16x4xf32>
    %cst_172 = arith.constant dense<0xFF800000> : vector<4xf32>
    %714 = vector.multi_reduction <maximumf>, %713, %cst_172 [0] : vector<16x4xf32> to vector<4xf32>
    %715 = vector.shape_cast %714 : vector<4xf32> to vector<1x4xf32>
    %716 = arith.ori %636, %26 : i1
    %cst_173 = arith.constant 0.000000e+00 : f32
    %717 = vector.broadcast %cst_173 : f32 to vector<1x4xf32>
    %718 = arith.select %716, %717, %715 : vector<1x4xf32>
    %719 = vector.broadcast %28 : i32 to vector<16x1xi32>
    %720 = arith.cmpi sge, %1, %719 : vector<16x1xi32>
    %721 = vector.broadcast %30 : i32 to vector<16x1xi32>
    %722 = arith.cmpi slt, %1, %721 : vector<16x1xi32>
    %723 = arith.andi %720, %722 : vector<16x1xi1>
    %cst_174 = arith.constant 0xFF800000 : f32
    %724 = vector.shape_cast %723 : vector<16x1xi1> to vector<16x1xi1>
    %725 = vector.broadcast %724 : vector<16x1xi1> to vector<16x4xi1>
    %726 = vector.broadcast %cst_174 : f32 to vector<16x4xf32>
    %727 = arith.select %725, %648, %726 : vector<16x4xi1>, vector<16x4xf32>
    %cst_175 = arith.constant dense<0xFF800000> : vector<4xf32>
    %728 = vector.multi_reduction <maximumf>, %727, %cst_175 [0] : vector<16x4xf32> to vector<4xf32>
    %729 = vector.shape_cast %728 : vector<4xf32> to vector<1x4xf32>
    %730 = arith.ori %636, %31 : i1
    %cst_176 = arith.constant 0.000000e+00 : f32
    %731 = vector.broadcast %cst_176 : f32 to vector<1x4xf32>
    %732 = arith.select %730, %731, %729 : vector<1x4xf32>
    %733 = vector.broadcast %33 : i32 to vector<16x1xi32>
    %734 = arith.cmpi sge, %1, %733 : vector<16x1xi32>
    %735 = vector.broadcast %35 : i32 to vector<16x1xi32>
    %736 = arith.cmpi slt, %1, %735 : vector<16x1xi32>
    %737 = arith.andi %734, %736 : vector<16x1xi1>
    %cst_177 = arith.constant 0xFF800000 : f32
    %738 = vector.shape_cast %737 : vector<16x1xi1> to vector<16x1xi1>
    %739 = vector.broadcast %738 : vector<16x1xi1> to vector<16x4xi1>
    %740 = vector.broadcast %cst_177 : f32 to vector<16x4xf32>
    %741 = arith.select %739, %648, %740 : vector<16x4xi1>, vector<16x4xf32>
    %cst_178 = arith.constant dense<0xFF800000> : vector<4xf32>
    %742 = vector.multi_reduction <maximumf>, %741, %cst_178 [0] : vector<16x4xf32> to vector<4xf32>
    %743 = vector.shape_cast %742 : vector<4xf32> to vector<1x4xf32>
    %744 = arith.ori %636, %36 : i1
    %cst_179 = arith.constant 0.000000e+00 : f32
    %745 = vector.broadcast %cst_179 : f32 to vector<1x4xf32>
    %746 = arith.select %744, %745, %743 : vector<1x4xf32>
    %747 = tpu.concatenate %662, %676, %690, %704, %718, %732, %746 in 0 : vector<1x4xf32>, vector<1x4xf32>, vector<1x4xf32>, vector<1x4xf32>, vector<1x4xf32>, vector<1x4xf32>, vector<1x4xf32> -> vector<7x4xf32>
    %c0_180 = arith.constant 0 : index
    %c5_181 = arith.constant 5 : index
    %c0_182 = arith.constant 0 : index
    %c0_183 = arith.constant 0 : index
    %748 = vector.load %arg3[%c0_180, %c5_181, %c0_182, %c0_183] : memref<1x7x7x4xf32, #tpu.memory_space<vmem>>, vector<1x1x7x4xf32>
    %749 = vector.shape_cast %748 : vector<1x1x7x4xf32> to vector<7x4xf32>
    %750 = vector.shape_cast %747 : vector<7x4xf32> to vector<1x1x7x4xf32>
    tpu.vector_store %arg3[%c0_180, %c5_181, %c0_182, %c0_183], %750 {strides = array<i32>} : memref<1x7x7x4xf32, #tpu.memory_space<vmem>>, vector<1x1x7x4xf32>,
    %c7 = arith.constant 7 : index
    %751 = arith.index_cast %arg0 : i32 to index
    %752 = memref.load %arg1[%c7, %751] : memref<29x4xi32, #tpu.memory_space<smem>>
    %c14 = arith.constant 14 : index
    %753 = arith.index_cast %arg0 : i32 to index
    %754 = memref.load %arg1[%c14, %753] : memref<29x4xi32, #tpu.memory_space<smem>>
    %755 = arith.cmpi sle, %754, %752 : i32
    %756 = vector.broadcast %752 : i32 to vector<16x1xi32>
    %757 = arith.cmpi sge, %0, %756 : vector<16x1xi32>
    %758 = vector.broadcast %754 : i32 to vector<16x1xi32>
    %759 = arith.cmpi slt, %0, %758 : vector<16x1xi32>
    %760 = arith.andi %757, %759 : vector<16x1xi1>
    %c0_184 = arith.constant 0 : index
    %c0_185 = arith.constant 0 : index
    %c0_186 = arith.constant 0 : index
    %c0_187 = arith.constant 0 : index
    %761 = vector.load %arg2[%c0_184, %c0_185, %c0_186, %c0_187] : memref<1x16x16x4xf32, #tpu.memory_space<vmem>>, vector<1x16x16x4xf32>
    %762 = vector.shape_cast %761 : vector<1x16x16x4xf32> to vector<16x16x4xf32>
    %cst_188 = arith.constant 0xFF800000 : f32
    %763 = vector.shape_cast %760 : vector<16x1xi1> to vector<1x16x1xi1>
    %764 = vector.broadcast %763 : vector<1x16x1xi1> to vector<16x16x4xi1>
    %765 = vector.broadcast %cst_188 : f32 to vector<16x16x4xf32>
    %766 = arith.select %764, %762, %765 : vector<16x16x4xi1>, vector<16x16x4xf32>
    %cst_189 = arith.constant dense<0xFF800000> : vector<16x4xf32>
    %767 = vector.multi_reduction <maximumf>, %766, %cst_189 [1] : vector<16x16x4xf32> to vector<16x4xf32>
    %768 = vector.broadcast %3 : i32 to vector<16x1xi32>
    %769 = arith.cmpi sge, %1, %768 : vector<16x1xi32>
    %770 = vector.broadcast %5 : i32 to vector<16x1xi32>
    %771 = arith.cmpi slt, %1, %770 : vector<16x1xi32>
    %772 = arith.andi %769, %771 : vector<16x1xi1>
    %cst_190 = arith.constant 0xFF800000 : f32
    %773 = vector.shape_cast %772 : vector<16x1xi1> to vector<16x1xi1>
    %774 = vector.broadcast %773 : vector<16x1xi1> to vector<16x4xi1>
    %775 = vector.broadcast %cst_190 : f32 to vector<16x4xf32>
    %776 = arith.select %774, %767, %775 : vector<16x4xi1>, vector<16x4xf32>
    %cst_191 = arith.constant dense<0xFF800000> : vector<4xf32>
    %777 = vector.multi_reduction <maximumf>, %776, %cst_191 [0] : vector<16x4xf32> to vector<4xf32>
    %778 = vector.shape_cast %777 : vector<4xf32> to vector<1x4xf32>
    %779 = arith.ori %755, %6 : i1
    %cst_192 = arith.constant 0.000000e+00 : f32
    %780 = vector.broadcast %cst_192 : f32 to vector<1x4xf32>
    %781 = arith.select %779, %780, %778 : vector<1x4xf32>
    %782 = vector.broadcast %8 : i32 to vector<16x1xi32>
    %783 = arith.cmpi sge, %1, %782 : vector<16x1xi32>
    %784 = vector.broadcast %10 : i32 to vector<16x1xi32>
    %785 = arith.cmpi slt, %1, %784 : vector<16x1xi32>
    %786 = arith.andi %783, %785 : vector<16x1xi1>
    %cst_193 = arith.constant 0xFF800000 : f32
    %787 = vector.shape_cast %786 : vector<16x1xi1> to vector<16x1xi1>
    %788 = vector.broadcast %787 : vector<16x1xi1> to vector<16x4xi1>
    %789 = vector.broadcast %cst_193 : f32 to vector<16x4xf32>
    %790 = arith.select %788, %767, %789 : vector<16x4xi1>, vector<16x4xf32>
    %cst_194 = arith.constant dense<0xFF800000> : vector<4xf32>
    %791 = vector.multi_reduction <maximumf>, %790, %cst_194 [0] : vector<16x4xf32> to vector<4xf32>
    %792 = vector.shape_cast %791 : vector<4xf32> to vector<1x4xf32>
    %793 = arith.ori %755, %11 : i1
    %cst_195 = arith.constant 0.000000e+00 : f32
    %794 = vector.broadcast %cst_195 : f32 to vector<1x4xf32>
    %795 = arith.select %793, %794, %792 : vector<1x4xf32>
    %796 = vector.broadcast %13 : i32 to vector<16x1xi32>
    %797 = arith.cmpi sge, %1, %796 : vector<16x1xi32>
    %798 = vector.broadcast %15 : i32 to vector<16x1xi32>
    %799 = arith.cmpi slt, %1, %798 : vector<16x1xi32>
    %800 = arith.andi %797, %799 : vector<16x1xi1>
    %cst_196 = arith.constant 0xFF800000 : f32
    %801 = vector.shape_cast %800 : vector<16x1xi1> to vector<16x1xi1>
    %802 = vector.broadcast %801 : vector<16x1xi1> to vector<16x4xi1>
    %803 = vector.broadcast %cst_196 : f32 to vector<16x4xf32>
    %804 = arith.select %802, %767, %803 : vector<16x4xi1>, vector<16x4xf32>
    %cst_197 = arith.constant dense<0xFF800000> : vector<4xf32>
    %805 = vector.multi_reduction <maximumf>, %804, %cst_197 [0] : vector<16x4xf32> to vector<4xf32>
    %806 = vector.shape_cast %805 : vector<4xf32> to vector<1x4xf32>
    %807 = arith.ori %755, %16 : i1
    %cst_198 = arith.constant 0.000000e+00 : f32
    %808 = vector.broadcast %cst_198 : f32 to vector<1x4xf32>
    %809 = arith.select %807, %808, %806 : vector<1x4xf32>
    %810 = vector.broadcast %18 : i32 to vector<16x1xi32>
    %811 = arith.cmpi sge, %1, %810 : vector<16x1xi32>
    %812 = vector.broadcast %20 : i32 to vector<16x1xi32>
    %813 = arith.cmpi slt, %1, %812 : vector<16x1xi32>
    %814 = arith.andi %811, %813 : vector<16x1xi1>
    %cst_199 = arith.constant 0xFF800000 : f32
    %815 = vector.shape_cast %814 : vector<16x1xi1> to vector<16x1xi1>
    %816 = vector.broadcast %815 : vector<16x1xi1> to vector<16x4xi1>
    %817 = vector.broadcast %cst_199 : f32 to vector<16x4xf32>
    %818 = arith.select %816, %767, %817 : vector<16x4xi1>, vector<16x4xf32>
    %cst_200 = arith.constant dense<0xFF800000> : vector<4xf32>
    %819 = vector.multi_reduction <maximumf>, %818, %cst_200 [0] : vector<16x4xf32> to vector<4xf32>
    %820 = vector.shape_cast %819 : vector<4xf32> to vector<1x4xf32>
    %821 = arith.ori %755, %21 : i1
    %cst_201 = arith.constant 0.000000e+00 : f32
    %822 = vector.broadcast %cst_201 : f32 to vector<1x4xf32>
    %823 = arith.select %821, %822, %820 : vector<1x4xf32>
    %824 = vector.broadcast %23 : i32 to vector<16x1xi32>
    %825 = arith.cmpi sge, %1, %824 : vector<16x1xi32>
    %826 = vector.broadcast %25 : i32 to vector<16x1xi32>
    %827 = arith.cmpi slt, %1, %826 : vector<16x1xi32>
    %828 = arith.andi %825, %827 : vector<16x1xi1>
    %cst_202 = arith.constant 0xFF800000 : f32
    %829 = vector.shape_cast %828 : vector<16x1xi1> to vector<16x1xi1>
    %830 = vector.broadcast %829 : vector<16x1xi1> to vector<16x4xi1>
    %831 = vector.broadcast %cst_202 : f32 to vector<16x4xf32>
    %832 = arith.select %830, %767, %831 : vector<16x4xi1>, vector<16x4xf32>
    %cst_203 = arith.constant dense<0xFF800000> : vector<4xf32>
    %833 = vector.multi_reduction <maximumf>, %832, %cst_203 [0] : vector<16x4xf32> to vector<4xf32>
    %834 = vector.shape_cast %833 : vector<4xf32> to vector<1x4xf32>
    %835 = arith.ori %755, %26 : i1
    %cst_204 = arith.constant 0.000000e+00 : f32
    %836 = vector.broadcast %cst_204 : f32 to vector<1x4xf32>
    %837 = arith.select %835, %836, %834 : vector<1x4xf32>
    %838 = vector.broadcast %28 : i32 to vector<16x1xi32>
    %839 = arith.cmpi sge, %1, %838 : vector<16x1xi32>
    %840 = vector.broadcast %30 : i32 to vector<16x1xi32>
    %841 = arith.cmpi slt, %1, %840 : vector<16x1xi32>
    %842 = arith.andi %839, %841 : vector<16x1xi1>
    %cst_205 = arith.constant 0xFF800000 : f32
    %843 = vector.shape_cast %842 : vector<16x1xi1> to vector<16x1xi1>
    %844 = vector.broadcast %843 : vector<16x1xi1> to vector<16x4xi1>
    %845 = vector.broadcast %cst_205 : f32 to vector<16x4xf32>
    %846 = arith.select %844, %767, %845 : vector<16x4xi1>, vector<16x4xf32>
    %cst_206 = arith.constant dense<0xFF800000> : vector<4xf32>
    %847 = vector.multi_reduction <maximumf>, %846, %cst_206 [0] : vector<16x4xf32> to vector<4xf32>
    %848 = vector.shape_cast %847 : vector<4xf32> to vector<1x4xf32>
    %849 = arith.ori %755, %31 : i1
    %cst_207 = arith.constant 0.000000e+00 : f32
    %850 = vector.broadcast %cst_207 : f32 to vector<1x4xf32>
    %851 = arith.select %849, %850, %848 : vector<1x4xf32>
    %852 = vector.broadcast %33 : i32 to vector<16x1xi32>
    %853 = arith.cmpi sge, %1, %852 : vector<16x1xi32>
    %854 = vector.broadcast %35 : i32 to vector<16x1xi32>
    %855 = arith.cmpi slt, %1, %854 : vector<16x1xi32>
    %856 = arith.andi %853, %855 : vector<16x1xi1>
    %cst_208 = arith.constant 0xFF800000 : f32
    %857 = vector.shape_cast %856 : vector<16x1xi1> to vector<16x1xi1>
    %858 = vector.broadcast %857 : vector<16x1xi1> to vector<16x4xi1>
    %859 = vector.broadcast %cst_208 : f32 to vector<16x4xf32>
    %860 = arith.select %858, %767, %859 : vector<16x4xi1>, vector<16x4xf32>
    %cst_209 = arith.constant dense<0xFF800000> : vector<4xf32>
    %861 = vector.multi_reduction <maximumf>, %860, %cst_209 [0] : vector<16x4xf32> to vector<4xf32>
    %862 = vector.shape_cast %861 : vector<4xf32> to vector<1x4xf32>
    %863 = arith.ori %755, %36 : i1
    %cst_210 = arith.constant 0.000000e+00 : f32
    %864 = vector.broadcast %cst_210 : f32 to vector<1x4xf32>
    %865 = arith.select %863, %864, %862 : vector<1x4xf32>
    %866 = tpu.concatenate %781, %795, %809, %823, %837, %851, %865 in 0 : vector<1x4xf32>, vector<1x4xf32>, vector<1x4xf32>, vector<1x4xf32>, vector<1x4xf32>, vector<1x4xf32>, vector<1x4xf32> -> vector<7x4xf32>
    %c0_211 = arith.constant 0 : index
    %c6_212 = arith.constant 6 : index
    %c0_213 = arith.constant 0 : index
    %c0_214 = arith.constant 0 : index
    %867 = vector.load %arg3[%c0_211, %c6_212, %c0_213, %c0_214] : memref<1x7x7x4xf32, #tpu.memory_space<vmem>>, vector<1x1x7x4xf32>
    %868 = vector.shape_cast %867 : vector<1x1x7x4xf32> to vector<7x4xf32>
    %869 = vector.shape_cast %866 : vector<7x4xf32> to vector<1x1x7x4xf32>
    tpu.vector_store %arg3[%c0_211, %c6_212, %c0_213, %c0_214], %869 {strides = array<i32>} : memref<1x7x7x4xf32, #tpu.memory_space<vmem>>, vector<1x1x7x4xf32>,
    return
  }
  func.func @transform_0(%arg0: i32, %arg1: memref<29x4xi32, #tpu.memory_space<smem>>) -> (i32, i32, i32, i32) {
    %c0 = arith.constant 0 : index
    %0 = arith.index_cast %arg0 : i32 to index
    %1 = memref.load %arg1[%c0, %0] : memref<29x4xi32, #tpu.memory_space<smem>>
    %c0_i32 = arith.constant 0 : i32
    %c0_i32_0 = arith.constant 0 : i32
    %c0_i32_1 = arith.constant 0 : i32
    %c0_i32_2 = arith.constant 0 : i32
    return %1, %c0_i32, %c0_i32_0, %c0_i32_1 : i32, i32, i32, i32
  }
  func.func @transform_1(%arg0: i32, %arg1: memref<29x4xi32, #tpu.memory_space<smem>>) -> (i32, i32, i32, i32) {
    %c0_i32 = arith.constant 0 : i32
    %c0_i32_0 = arith.constant 0 : i32
    %c0_i32_1 = arith.constant 0 : i32
    %c0_i32_2 = arith.constant 0 : i32
    return %arg0, %c0_i32, %c0_i32_0, %c0_i32_1 : i32, i32, i32, i32
  }
}

</mosaic_0001>

<bundles_post_ra>
// kernel: tpu_custom_call.1
= control target key start
LH: loop header
LB: loop body
LE: loop exit
PB: predicated region body
PF: predicated region fallthrough
CT: control target
= control target key end

     0   :  { %s7118_s0 = inlined_call_operand.vmem [shape: s32[29,4], index: 0, kind: input, shape index: {}]   ;;  %s7119_s1 = inlined_call_operand.vmem [shape: f32[2,16,16,4], index: 1, kind: input, shape index: {}]   ;;  %s7120_s2 = inlined_call_operand.vmem [shape: f32[4,7,7,4], index: 2, kind: output, shape index: {}]  }
   0x1   :  { %s7_s11 = sshll.u32 %s7118_s0, 4  ;;  %s8_s11 = int_to_ptr.vmem [resolvable:$true] %s7_s11 }
   0x2   :  { %s3132_s12 = scalar_lea.vmem %s8_s11, 512  ;;  %p3137_p1 = scmp.lt.s32.totalorder %s8_s11, %s8_s11 }
   0x3   :  { %p3133_p0 = scmp.ne.s32.totalorder %s8_s11, %s3132_s12  ;;  %p3138_p2 = scmp.lt.s32.totalorder %s3132_s12, %s3132_s12 }
   0x5   :  { %p3139_p3 = por %p3138_p2, %p3137_p1 }
   0x7   :  { %p3140_p4 = pnand %p3139_p3, %p3133_p0 }
   0x9   :  { %3143 = shalt.err (!%p3140_p4)  }
   0xa   :  { %s3154_s13 = smov [#allocation3]  }
   0xb   :  { %10 = dma.vmem_to_smem %s8_s11, 512, %s3154_s13, [#allocation2] }
   0xc   :  { %3148 = dma.done.wait [#allocation2], 512 }
   0xd   :  { %3149 = vsyncadd [#allocation2], 4294966784 }
   0xe   :  { %12 = sfence }
   0xf   :  { %s3173_s14 = smov 0  }
  0x10 LB: > { %s3179_s0 = sadd.s32 4294967295, %s3152_s14   ;;  %p3025_p5 = scmp.ge.s32.totalorder %s3152_s14, 1  ;;  %s3152_s14 = sphi %s3173_s14, %s18_s14  }
  0x11   : > { %p98_p6 = scmp.lt.s32.totalorder %s3152_s14, 5 }
  0x13   : > { %p99_p7 = pnand %p3025_p5, %p98_p6 }
  0x15   : > { %102 = sbr.rel (%p99_p7) target bundleno = 695 (0x2b7), region = 24 }
  0x1c   : > { %s119_s15 = sld [smem:[#allocation3 + %s3179_s0]]  ;;  %s134_s16 = sshra.s32 %s3179_s0, 7  ;;  %v131_v0 = vlaneseq  ;;  %vm7146_vm2 = vcmask 31744  }
  0x1d   : > { %s3185_s17 = sshll.u32 %s134_s16, 7  ;;  %s3189_s19 = sand.u32 127, %s3179_s0 }
  0x1e   : > { %s3067_s18 = sadd.s32 1920, %s3185_s17  ;;  %s3069_s21 = sadd.s32 2816, %s3185_s17  ;;  %v3239_v1 = vshrl.u32 %v131_v0, 7 }
  0x1f   : > { %s140_s20 = sadd.s32 %s3067_s18, %s3189_s19  ;;  %s3071_s22 = sadd.s32 2048, %s3185_s17 }
  0x20   : > { %s144_s23 = sadd.s32 %s3069_s21, %s3189_s19  ;;  %s3073_s24 = sadd.s32 2944, %s3185_s17  ;;  %7245 = vst [vmem:[#allocation5_spill] sm:$0xff] %v3239_v1  ;;  %v3259_v2 = vadd.s32 8, %v3239_v1 }
  0x21   : > { %s3198_s25 = sld [smem:[#allocation3 + %s140_s20]]  ;;  %s149_s26 = sadd.s32 %s3071_s22, %s3189_s19 }
  0x22   : > { %p120_p8 = scmp.lt.s32.totalorder %s119_s15, 1  ;;  %s3075_s27 = sadd.s32 2176, %s3185_s17  ;;  %7246 = vst [vmem:[#allocation6_spill] sm:$0xff] %v3259_v2 }
  0x23   : > { %s3202_s28 = sld [smem:[#allocation3 + %s144_s23]]  ;;  %s153_s29 = sadd.s32 %s3073_s24, %s3189_s19 }
  0x24   : > { %s8225_s15 = smov (!%p120_p8, %s119_s15), 1  ;;  %s3077_s3 = sadd.s32 3072, %s3185_s17 }
  0x25   : > { %s3065_s30 = sshll.u32 %s8225_s15, 8  ;;  %s3207_s4 = sld [smem:[#allocation3 + %s149_s26]] }
  0x26   : > { %s158_s5 = sadd.s32 %s3075_s27, %s3189_s19  ;;  %s3210_s6 = sld [smem:[#allocation3 + %s153_s29]] }
  0x27   : > { %s3079_s7 = sadd.s32 2304, %s3185_s17  ;;  %s162_s8 = sadd.s32 %s3077_s3, %s3189_s19 }
  0x28   : > { %s3081_s9 = sadd.s32 3200, %s3185_s17  ;;  %s3083_s10 = sadd.s32 2432, %s3185_s17 }
  0x29   : > { %s3085_s11 = sadd.s32 3328, %s3185_s17  ;;  %s3217_s12 = sld [smem:[#allocation3 + %s158_s5]] }
  0x2a   : > { %s167_s13 = sadd.s32 %s3079_s7, %s3189_s19  ;;  %s3220_s16 = sld [smem:[#allocation3 + %s162_s8]] }
  0x2b   : > { %s171_s18 = sadd.s32 %s3081_s9, %s3189_s19  ;;  %s176_s20 = sadd.s32 %s3083_s10, %s3189_s19 }
  0x2c   : > { %s180_s21 = sadd.s32 %s3085_s11, %s3189_s19  ;;  %s3225_s22 = sld [smem:[#allocation3 + %s167_s13]] }
  0x2d   : > { %s3087_s23 = sadd.s32 2560, %s3185_s17  ;;  %s3228_s24 = sld [smem:[#allocation3 + %s171_s18]] }
  0x2e   : > { %s3089_s26 = sadd.s32 3456, %s3185_s17  ;;  %s3231_s27 = sld [smem:[#allocation3 + %s176_s20]] }
  0x2f   : > { %s3233_s29 = sld [smem:[#allocation3 + %s180_s21]]  ;;  %s185_s3 = sadd.s32 %s3087_s23, %s3189_s19 }
  0x30   : > { %s3095_s5 = sadd.s32 128, %s3185_s17  ;;  %s189_s7 = sadd.s32 %s3089_s26, %s3189_s19 }
  0x31   : > { %s203_s8 = sadd.s32 %s3095_s5, %s3189_s19  ;;  %s3097_s10 = sadd.s32 1024, %s3185_s17 }
  0x32   : > { %s3241_s9 = sld [smem:[#allocation3 + %s203_s8]]  ;;  %s207_s13 = sadd.s32 %s3097_s10, %s3189_s19 }
  0x33   : > { %s3244_s11 = sld [smem:[#allocation3 + %s185_s3]]  ;;  %s3256_s26 = scalar_lea.vmem %s7119_s1, %s3065_s30 }
  0x34   : > { %s3247_s18 = sld [smem:[#allocation3 + %s189_s7]]  ;;  %v3263_v4 = vld [vmem:[%s3256_s26] sm:$0xff]  ;;  %v3266_v5 = vld [vmem:[%s3256_s26 + $0x10] sm:$0xff]  ;;  %v3281_v10 = vld [vmem:[%s3256_s26 + $0x8] sm:$0xff]  ;;  %s3091_s15 = sadd.s32 2688, %s3185_s17 }
  0x35   : > { %s3249_s20 = sld [smem:[#allocation3 + %s207_s13]]  ;;  %v3269_v6 = vld [vmem:[%s3256_s26 + $0x20] sm:$0xff]  ;;  %v3272_v7 = vld [vmem:[%s3256_s26 + $0x30] sm:$0xff]  ;;  %v3284_v11 = vld [vmem:[%s3256_s26 + $0x18] sm:$0xff]  ;;  %s3093_s30 = sadd.s32 3584, %s3185_s17 }
  0x36   : > { %v3287_v12 = vld [vmem:[%s3256_s26 + $0x28] sm:$0xff]  ;;  %v3290_v13 = vld [vmem:[%s3256_s26 + $0x38] sm:$0xff]  ;;  %v3302_v19 = vld [vmem:[%s3256_s26 + $0x40] sm:$0xff]  ;;  %s194_s3 = sadd.s32 %s3091_s15, %s3189_s19  ;;  %s198_s5 = sadd.s32 %s3093_s30, %s3189_s19 }
  0x37   : > { %v3305_v20 = vld [vmem:[%s3256_s26 + $0x48] sm:$0xff]  ;;  %v3308_v21 = vld [vmem:[%s3256_s26 + $0x50] sm:$0xff]  ;;  %v3311_v22 = vld [vmem:[%s3256_s26 + $0x58] sm:$0xff]  ;;  %s3099_s7 = sadd.s32 256, %s3185_s17  ;;  %p3676_p9 = scmp.le.s32.totalorder %s3202_s28, %s3198_s25 }
  0x38   : > { %v210_v3 = vstv %s3241_s9  ;;  %7251 = vst [vmem:[#allocation7_spill] sm:$0xff] %v3311_v22  ;;  %v3322_v26 = vld [vmem:[%s3256_s26 + $0x60] sm:$0xff]  ;;  %v3325_v27 = vld [vmem:[%s3256_s26 + $0x68] sm:$0xff]  ;;  %v3328_v28 = vld [vmem:[%s3256_s26 + $0x70] sm:$0xff]  ;;  %s3680_s10 = sld [smem:[#allocation3 + %s194_s3]]  ;;  %p3703_p10 = scmp.le.s32.totalorder %s3210_s6, %s3207_s4 }
  0x39   : > { %vm3276_vm0 = vcmp.ge.s32.totalorder %v3239_v1, %v210_v3  ;;  %vm3296_vm1 = vcmp.ge.s32.totalorder %v3259_v2, %v210_v3  ;;  %7254 = vst [vmem:[#allocation8_spill] sm:$0xff] %v3322_v26  ;;  %7255 = vst [vmem:[#allocation9_spill] sm:$0xff] %v3325_v27  ;;  %v3331_v29 = vld [vmem:[%s3256_s26 + $0x78] sm:$0xff]  ;;  %v3342_v33 = vld [vmem:[%s3256_s26 + $0x80] sm:$0xff]  ;;  %p3751_p12 = scmp.le.s32.totalorder %s3220_s16, %s3217_s12  ;;  %p3771_p13 = scmp.le.s32.totalorder %s3228_s24, %s3225_s22 }
  0x3a   : > { %7256 = vst [vmem:[#allocation10_spill] sm:$0xff] %v3328_v28  ;;  %7257 = vst [vmem:[#allocation11_spill] sm:$0xff] %v3331_v29  ;;  %v3345_v34 = vld [vmem:[%s3256_s26 + $0x88] sm:$0xff]  ;;  %v3348_v35 = vld [vmem:[%s3256_s26 + $0x90] sm:$0xff]  ;;  %p3858_p3 = scmp.le.s32.totalorder %s3233_s29, %s3231_s27  ;;  %p3986_p5 = scmp.le.s32.totalorder %s3247_s18, %s3244_s11 }
  0x3b   : > { %v213_v18 = vstv %s3249_s20  ;;  %v3351_v36 = vld [vmem:[%s3256_s26 + $0x98] sm:$0xff]  ;;  %v3366_v42 = vld [vmem:[%s3256_s26 + $0xa0] sm:$0xff]  ;;  %v3369_v43 = vld [vmem:[%s3256_s26 + $0xa8] sm:$0xff]  ;;  %p3709_p11 = scmp.le.s32.totalorder %s3249_s20, %s3241_s9  ;;  %s3101_s21 = sadd.s32 1152, %s3185_s17 }
  0x3c   : > { %vm214_vm3 = vcmp.lt.s32.totalorder %v3239_v1, %v213_v18  ;;  %vm3317_vm4 = vcmp.lt.s32.totalorder %v3259_v2, %v213_v18  ;;  %7262 = vst [vmem:[#allocation12_spill] sm:$0xff] %v3366_v42  ;;  %7263 = vst [vmem:[#allocation13_spill] sm:$0xff] %v3369_v43  ;;  %v3372_v44 = vld [vmem:[%s3256_s26 + $0xb0] sm:$0xff]  ;;  %v3375_v45 = vld [vmem:[%s3256_s26 + $0xb8] sm:$0xff]  ;;  %s686_s15 = sadd.s32 %s3101_s21, %s3189_s19 }
  0x3d   : > { %vm3337_vm5 = vmand %vm3276_vm0, %vm214_vm3  ;;  %7264 = vst [vmem:[#allocation14_spill] sm:$0xff] %v3372_v44  ;;  %v3390_v50 = vld [vmem:[%s3256_s26 + $0xc0] sm:$0xff]  ;;  %v3393_v51 = vld [vmem:[%s3256_s26 + $0xc8] sm:$0xff]  ;;  %p493_p0 = por %p3709_p11, %p3676_p9  ;;  %p521_p1 = por %p3709_p11, %p3703_p10 }
  0x3e   : > { %vm3361_vm6 = vmand %vm3296_vm1, %vm3317_vm4  ;;  %7265 = vst [vmem:[#allocation15_spill] sm:$0xff] %v3375_v45  ;;  %v254_v46 = vsel %vm3337_vm5, %v3263_v4, -inf  ;;  %v256_v47 = vsel %vm3337_vm5, %v3266_v5, -inf  ;;  %v258_v48 = vsel %vm3337_vm5, %v3269_v6, -inf  ;;  %v260_v49 = vsel %vm3337_vm5, %v3272_v7, -inf  ;;  %v3408_v56 = vld [vmem:[%s3256_s26 + $0xd0] sm:$0xff]  ;;  %p549_p2 = por %p3709_p11, %p3751_p12  ;;  %p577_p4 = por %p3709_p11, %p3771_p13 }
  0x3f   : > { %7266 = vst [vmem:[#allocation16_spill] sm:$0xff] %v3390_v50  ;;  %7267 = vst [vmem:[#allocation17_spill] sm:$0xff] %v3393_v51  ;;  %v255_v52 = vsel %vm3361_vm6, %v3281_v10, -inf  ;;  %v257_v53 = vsel %vm3361_vm6, %v3284_v11, -inf  ;;  %v259_v54 = vsel %vm3361_vm6, %v3287_v12, -inf  ;;  %v261_v55 = vsel %vm3361_vm6, %v3290_v13, -inf  ;;  %p605_p6 = por %p3709_p11, %p3858_p3  ;;  %p633_p7 = por %p3709_p11, %p3986_p5 }
  0x40   : > { %7268 = vst [vmem:[#allocation18_spill] sm:$0xff] %v3408_v56  ;;  %v3411_v57 = vld [vmem:[%s3256_s26 + $0xd8] sm:$0xff]  ;;  %v262_v58 = vsel %vm3337_vm5, %v3302_v19, -inf  ;;  %v263_v59 = vsel %vm3361_vm6, %v3305_v20, -inf  ;;  %v264_v60 = vsel %vm3337_vm5, %v3308_v21, -inf  ;;  %v265_v61 = vsel %vm3361_vm6, %v3311_v22, -inf }
  0x41   : > { %7269 = vst [vmem:[#allocation19_spill] sm:$0xff] %v3411_v57  ;;  %v3426_v62 = vld [vmem:[%s3256_s26 + $0xe0] sm:$0xff]  ;;  %v3429_v63 = vld [vmem:[%s3256_s26 + $0xe8] sm:$0xff]  ;;  %v266_v0 = vsel %vm3337_vm5, %v3322_v26, -inf  ;;  %v267_v3 = vsel %vm3361_vm6, %v3325_v27, -inf  ;;  %v268_v9 = vsel %vm3337_vm5, %v3328_v28, -inf }
  0x42   : > { %7270 = vst [vmem:[#allocation20_spill] sm:$0xff] %v3426_v62  ;;  %7271 = vst [vmem:[#allocation21_spill] sm:$0xff] %v3429_v63  ;;  %v269_v17 = vsel %vm3361_vm6, %v3331_v29, -inf  ;;  %v3444_v18 = vld [vmem:[%s3256_s26 + $0xf0] sm:$0xff]  ;;  %v3447_v25 = vld [vmem:[%s3256_s26 + $0xf8] sm:$0xff]  ;;  %v287_v24 = vsel %vm7146_vm2, %v254_v46, -inf }
  0x43   : > { %7272 = vst [vmem:[#allocation22_spill] sm:$0xff] %v3444_v18  ;;  %7273 = vst [vmem:[#allocation23_spill] sm:$0xff] %v3447_v25  ;;  %v288_v8 = vsel %vm7146_vm2, %v255_v52, -inf  ;;  %v296_v30 = vsel %vm7146_vm2, %v256_v47, -inf  ;;  %v297_v23 = vsel %vm7146_vm2, %v257_v53, -inf  ;;  %v305_v16 = vsel %vm7146_vm2, %v258_v48, -inf }
  0x44   : > { %v289_v31 = vmax.f32 %v287_v24, %v288_v8  ;;  %v298_v37 = vmax.f32 %v296_v30, %v297_v23  ;;  %v306_v38 = vsel %vm7146_vm2, %v259_v54, -inf  ;;  %v314_v15 = vsel %vm7146_vm2, %v260_v49, -inf  ;;  %s3958_s13 = scalar_select %p577_p4, 1, 0 }
  0x45   : > { %v307_v39 = vmax.f32 %v305_v16, %v306_v38  ;;  %v315_v40 = vsel %vm7146_vm2, %v261_v55, -inf  ;;  %v323_v14 = vsel %vm7146_vm2, %v262_v58, -inf  ;;  %v324_v47 = vsel %vm7146_vm2, %v263_v59, -inf  ;;  %s4127_s23 = scalar_select %p633_p7, 1, 0 }
  0x46   : > { %v290_v46 = vrot.slane %v289_v31, 4  ;;  %v299_v29 = vrot.slane %v298_v37, 4  ;;  %v316_v52 = vmax.f32 %v314_v15, %v315_v40  ;;  %v325_v53 = vmax.f32 %v323_v14, %v324_v47  ;;  %s4140_s30 = sld [smem:[#allocation3 + %s686_s15]]  ;;  %s3105_s15 = sadd.s32 1280, %s3185_s17 }
  0x47   : > { %v308_v28 = vrot.slane %v307_v39, 4  ;;  %v332_v8 = vsel %vm7146_vm2, %v264_v60, -inf  ;;  %v333_v23 = vsel %vm7146_vm2, %v265_v61, -inf  ;;  %v341_v54 = vsel %vm7146_vm2, %v266_v0, -inf }
  0x48   : > { %v291_v24 = vmax.f32 %v289_v31, %v290_v46  ;;  %v300_v30 = vmax.f32 %v298_v37, %v299_v29  ;;  %v317_v16 = vrot.slane %v316_v52, 4  ;;  %v334_v38 = vmax.f32 %v332_v8, %v333_v23 }
  0x49   : > { %v309_v48 = vmax.f32 %v307_v39, %v308_v28  ;;  %v326_v49 = vrot.slane %v325_v53, 4  ;;  %v342_v55 = vsel %vm7146_vm2, %v267_v3, -inf  ;;  %v350_v60 = vsel %vm7146_vm2, %v268_v9, -inf }
  0x4a   : > { %v292_v58 = vrot.slane %v291_v24, 2  ;;  %v301_v15 = vrot.slane %v300_v30, 2  ;;  %v318_v40 = vmax.f32 %v316_v52, %v317_v16  ;;  %v335_v59 = vrot.slane %v334_v38, 4 }
  0x4b   : > { %v310_v27 = vrot.slane %v309_v48, 2  ;;  %v327_v14 = vmax.f32 %v325_v53, %v326_v49  ;;  %v343_v47 = vmax.f32 %v341_v54, %v342_v55  ;;  %v351_v0 = vsel %vm7146_vm2, %v269_v17, -inf }
  0x4c   : > { %v293_v61 = vmax.f32 %v291_v24, %v292_v58  ;;  %v302_v31 = vmax.f32 %v300_v30, %v301_v15  ;;  %v319_v29 = vrot.slane %v318_v40, 2  ;;  %v336_v37 = vmax.f32 %v334_v38, %v335_v59 }
  0x4d   : > { %v311_v46 = vmax.f32 %v309_v48, %v310_v27  ;;  %v328_v28 = vrot.slane %v327_v14, 2  ;;  %v344_v39 = vrot.slane %v343_v47, 4  ;;  %v352_v53 = vmax.f32 %v350_v60, %v351_v0 }
  0x4e   : > { %v294_v8 = vrot.slane %v293_v61, 1  ;;  %v303_v3 = vrot.slane %v302_v31, 1  ;;  %v320_v23 = vmax.f32 %v318_v40, %v319_v29  ;;  %v337_v26 = vrot.slane %v336_v37, 2 }
  0x4f   : > { %v312_v52 = vrot.slane %v311_v46, 1  ;;  %v329_v16 = vmax.f32 %v327_v14, %v328_v28  ;;  %v345_v22 = vmax.f32 %v343_v47, %v344_v39  ;;  %v353_v54 = vrot.slane %v352_v53, 4 }
  0x50   : > { %v3513_v49 = vmax.f32 %v293_v61, %v294_v8  ;;  %v3515_v9 = vmax.f32 %v302_v31, %v303_v3  ;;  %v321_v24 = vrot.slane %v320_v23, 1  ;;  %v338_v30 = vmax.f32 %v336_v37, %v337_v26 }
  0x51   : > { %v3517_v38 = vmax.f32 %v311_v46, %v312_v52  ;;  %v330_v27 = vrot.slane %v329_v16, 1  ;;  %v346_v48 = vrot.slane %v345_v22, 2  ;;  %v7274_v58 = vsel %vm3337_vm5, %v3342_v33, -inf }
  0x52   : > { %v3519_v17 = vmax.f32 %v320_v23, %v321_v24  ;;  %v339_v55 = vrot.slane %v338_v30, 1  ;;  %v359_v15 = vsel %vm7146_vm2, %v7274_v58, -inf  ;;  %v7275_v40 = vsel %vm3361_vm6, %v3345_v34, -inf }
  0x53   : > { %v360_v26 = vsel %vm7146_vm2, %v7275_v40, -inf  ;;  %v3531_v59 = vmax.f32 %v329_v16, %v330_v27  ;;  %v347_v14 = vmax.f32 %v345_v22, %v346_v48  ;;  %v354_v47 = vmax.f32 %v352_v53, %v353_v54 }
  0x54   : > { %v361_v60 = vmax.f32 %v359_v15, %v360_v26  ;;  %v3533_v61 = vmax.f32 %v338_v30, %v339_v55  ;;  %v7276_v31 = vsel %vm3337_vm5, %v3348_v35, -inf  ;;  %v7277_v37 = vsel %vm3361_vm6, %v3351_v36, -inf }
  0x55   : > { %v368_v29 = vsel %vm7146_vm2, %v7276_v31, -inf  ;;  %v369_v46 = vsel %vm7146_vm2, %v7277_v37, -inf  ;;  %v7278_v22 = vsel %vm3337_vm5, %v3366_v42, -inf  ;;  %v348_v39 = vrot.slane %v347_v14, 1 }
  0x56   : > { %v377_v28 = vsel %vm7146_vm2, %v7278_v22, -inf  ;;  %v355_v0 = vrot.slane %v354_v47, 2  ;;  %v362_v8 = vrot.slane %v361_v60, 4  ;;  %v370_v3 = vmax.f32 %v368_v29, %v369_v46 }
  0x57   : > { %v7279_v23 = vsel %vm3361_vm6, %v3369_v43, -inf  ;;  %v7280_v16 = vsel %vm3337_vm5, %v3372_v44, -inf  ;;  %v7281_v24 = vsel %vm3361_vm6, %v3375_v45, -inf  ;;  %v7282_v27 = vsel %vm3337_vm5, %v3390_v50, -inf }
  0x58   : > { %v378_v52 = vsel %vm7146_vm2, %v7279_v23, -inf  ;;  %v386_v53 = vsel %vm7146_vm2, %v7280_v16, -inf  ;;  %v387_v30 = vsel %vm7146_vm2, %v7281_v24, -inf  ;;  %v395_v48 = vsel %vm7146_vm2, %v7282_v27, -inf }
  0x59   : > { %v3570_v54 = vmax.f32 %v347_v14, %v348_v39  ;;  %v356_v55 = vmax.f32 %v354_v47, %v355_v0  ;;  %v363_v58 = vmax.f32 %v361_v60, %v362_v8  ;;  %v371_v15 = vrot.slane %v370_v3, 4 }
  0x5a   : > { %v379_v40 = vmax.f32 %v377_v28, %v378_v52  ;;  %v388_v26 = vmax.f32 %v386_v53, %v387_v30  ;;  %v7283_v31 = vsel %vm3361_vm6, %v3393_v51, -inf  ;;  %v7284_v14 = vsel %vm3337_vm5, %v3408_v56, -inf }
  0x5b   : > { %v396_v29 = vsel %vm7146_vm2, %v7283_v31, -inf  ;;  %v404_v47 = vsel %vm7146_vm2, %v7284_v14, -inf  ;;  %v357_v60 = vrot.slane %v356_v55, 1  ;;  %v364_v37 = vrot.slane %v363_v58, 2 }
  0x5c   : > { %v372_v46 = vmax.f32 %v370_v3, %v371_v15  ;;  %v397_v22 = vmax.f32 %v395_v48, %v396_v29  ;;  %v7285_v28 = vstv %s3198_s25  ;;  %v7288_v0 = vstv %s3202_s28 }
  0x5d   : > { %vm3586_vm9 = vcmp.ge.s32.totalorder %v3239_v1, %v7285_v28  ;;  %vm3593_vm10 = vcmp.lt.s32.totalorder %v3239_v1, %v7288_v0  ;;  %v380_v23 = vrot.slane %v379_v40, 4  ;;  %v389_v52 = vrot.slane %v388_v26, 4 }
  0x5e   : > { %v7291_v3 = vsel %vm3361_vm6, %v3411_v57, -inf  ;;  %v7292_v53 = vsel %vm3337_vm5, %v3426_v62, -inf  ;;  %v7293_v30 = vmov %v7285_v28  ;;  %v7296_v48 = vmov %v7288_v0 }
  0x5f   : > { %v405_v16 = vsel %vm7146_vm2, %v7291_v3, -inf  ;;  %v413_v24 = vsel %vm7146_vm2, %v7292_v53, -inf  ;;  %vm3611_vm12 = vcmp.ge.s32.totalorder %v3259_v2, %v7293_v30  ;;  %vm3618_vm13 = vcmp.lt.s32.totalorder %v3259_v2, %v7296_v48 }
  0x60   : > { %v3623_v31 = vmax.f32 %v356_v55, %v357_v60  ;;  %v365_v29 = vmax.f32 %v363_v58, %v364_v37  ;;  %v373_v14 = vrot.slane %v372_v46, 2  ;;  %v398_v28 = vrot.slane %v397_v22, 4 }
  0x61   : > { %v7299_v0 = vstv %s3207_s4  ;;  %v7302_v53 = vstv %s3210_s6  ;;  %v381_v55 = vmax.f32 %v379_v40, %v380_v23  ;;  %v390_v58 = vmax.f32 %v388_v26, %v389_v52  ;;  %s3727_s4 = sld [smem:[#allocation3 + %s198_s5]] }
  0x62   : > { %vm3628_vm0 = vcmp.ge.s32.totalorder %v3239_v1, %v7299_v0  ;;  %vm3635_vm1 = vcmp.lt.s32.totalorder %v3239_v1, %v7302_v53  ;;  %v406_v60 = vmax.f32 %v404_v47, %v405_v16  ;;  %v7305_v37 = vsel %vm3361_vm6, %v3429_v63, -inf }
  0x63   : > { %v414_v48 = vsel %vm7146_vm2, %v7305_v37, -inf  ;;  %vm3647_vm4 = vcmp.ge.s32.totalorder %v3259_v2, %v7299_v0  ;;  %v7308_v62 = vstv %s3210_s6  ;;  %v366_v26 = vrot.slane %v365_v29, 1  ;;  %s682_s6 = sadd.s32 %s3099_s7, %s3189_s19 }
  0x64   : > { %vm3654_vm15 = vcmp.lt.s32.totalorder %v3259_v2, %v7308_v62  ;;  %v374_v47 = vmax.f32 %v372_v46, %v373_v14  ;;  %v399_v23 = vmax.f32 %v397_v22, %v398_v28  ;;  %v415_v52 = vmax.f32 %v413_v24, %v414_v48 }
  0x65   : > { %v7311_v16 = vstv %s3217_s12  ;;  %v7314_v62 = vstv %s3220_s16  ;;  %v382_v46 = vrot.slane %v381_v55, 2  ;;  %v391_v22 = vrot.slane %v390_v58, 2 }
  0x66   : > { %vm3662_vm14 = vcmp.ge.s32.totalorder %v3239_v1, %v7311_v16  ;;  %vm3669_vm11 = vcmp.lt.s32.totalorder %v3239_v1, %v7314_v62  ;;  %v407_v24 = vrot.slane %v406_v60, 4  ;;  %v7318_v14 = vsel %vm3337_vm5, %v3444_v18, -inf }
  0x67   : > { %v422_v28 = vsel %vm7146_vm2, %v7318_v14, -inf  ;;  %v7319_v48 = vstv %s3225_s22  ;;  %v7322_v62 = vstv %s3228_s24  ;;  %v367_v32 = vmax.f32 %v365_v29, %v366_v26  ;;  %p4090_p8 = scmp.le.s32.totalorder %s3727_s4, %s3680_s10 }
  0x68   : > { %vm3690_vm3 = vcmp.ge.s32.totalorder %v3239_v1, %v7319_v48  ;;  %vm3697_vm8 = vcmp.lt.s32.totalorder %v3239_v1, %v7322_v62  ;;  %v375_v14 = vrot.slane %v374_v47, 1  ;;  %v400_v48 = vrot.slane %v399_v23, 2 }
  0x69   : > { %v416_v18 = vrot.slane %v415_v52, 4  ;;  %v7327_v57 = vstv %s3217_s12  ;;  %v7328_v62 = vmov 0  ;;  %v7330_v56 = vstv %s3220_s16  ;;  %s3812_s16 = sld [smem:[#allocation3 + %s682_s6]]  ;;  %s3103_s6 = sadd.s32 384, %s3185_s17 }
  0x6a   : > { %vm3716_vm5 = vcmp.ge.s32.totalorder %v3259_v2, %v7327_v57  ;;  %vm3723_vm7 = vcmp.lt.s32.totalorder %v3259_v2, %v7330_v56  ;;  %v7331_v51 = vmov 0  ;;  %v383_v29 = vmax.f32 %v381_v55, %v382_v46 }
  0x6b   : > { %v7329_v62 = vsel %vm3716_vm5, 4294967295, %v7328_v62  ;;  %v7332_v51 = vsel %vm3723_vm7, 4294967295, %v7331_v51  ;;  %v392_v26 = vmax.f32 %v390_v58, %v391_v22  ;;  %v408_v50 = vmax.f32 %v406_v60, %v407_v24 }
  0x6c   : > { %v7333_v57 = vsel %vm3361_vm6, %v3447_v25, -inf  ;;  %v7334_v44 = vstv %s3231_s27  ;;  %v7335_v56 = vmov 0  ;;  %v7337_v43 = vstv %s3233_s29 }
  0x6d   : > { %v423_v45 = vsel %vm7146_vm2, %v7333_v57, -inf  ;;  %vm3737_vm5 = vcmp.ge.s32.totalorder %v3239_v1, %v7334_v44  ;;  %vm3744_vm7 = vcmp.lt.s32.totalorder %v3239_v1, %v7337_v43  ;;  %v376_v41 = vmax.f32 %v374_v47, %v375_v14 }
  0x6e   : > { %v7336_v56 = vsel %vm3737_vm5, 4294967295, %v7335_v56  ;;  %v401_v58 = vmax.f32 %v399_v23, %v400_v48  ;;  %v417_v44 = vmax.f32 %v415_v52, %v416_v18  ;;  %v424_v60 = vmax.f32 %v422_v28, %v423_v45 }
  0x6f   : > { %v7341_v46 = vstv %s3244_s11  ;;  %v7342_v43 = vmov 0  ;;  %v7344_v22 = vstv %s3247_s18  ;;  %v7345_v24 = vmov 0 }
  0x70   : > { %vm3758_vm6 = vcmp.ge.s32.totalorder %v3239_v1, %v7341_v46  ;;  %vm3765_vm2 = vcmp.lt.s32.totalorder %v3239_v1, %v7344_v22  ;;  %v384_v18 = vrot.slane %v383_v29, 1  ;;  %v393_v47 = vrot.slane %v392_v26, 1 }
  0x71   : > { %v7343_v43 = vsel %vm3758_vm6, 4294967295, %v7342_v43  ;;  %v7346_v24 = vsel %vm3765_vm2, 4294967295, %v7345_v24  ;;  %v409_v45 = vrot.slane %v408_v50, 2  ;;  %vm7348_vm5 = vcmask 1041409  }
  0x72   : > { %v460_v23 = vsel %vm7348_vm5, %v3515_v9, %v3513_v49  ;;  %v7349_v52 = vstv %s3225_s22  ;;  %v7350_v28 = vmov 0  ;;  %v7352_v14 = vstv %s3228_s24  ;;  %s3886_s24 = scalar_select %p493_p0, 1, 0 }
  0x73   : > { %vm3781_vm6 = vcmp.ge.s32.totalorder %v3259_v2, %v7349_v52  ;;  %vm3788_vm2 = vcmp.lt.s32.totalorder %v3259_v2, %v7352_v14  ;;  %v7353_v48 = vmov 0  ;;  %v402_v57 = vrot.slane %v401_v58, 1  ;;  %p661_p0 = por %p3709_p11, %p4090_p8  ;;  %p4407_p11 = scmp.le.s32.totalorder %s4140_s30, %s3812_s16 }
  0x74   : > { %v7351_v28 = vsel %vm3781_vm6, 4294967295, %v7350_v28  ;;  %v7354_v48 = vsel %vm3788_vm2, 4294967295, %v7353_v48  ;;  %v418_v46 = vrot.slane %v417_v44, 2  ;;  %v425_v22 = vrot.slane %v424_v60, 4 }
  0x75   : > { %vm7355_vm5 = vcmask 1042434   ;;  %v7356_v9 = vstv %s3231_s27  ;;  %v7357_v52 = vmov 0  ;;  %v7359_v14 = vstv %s3233_s29  ;;  %s3906_s27 = scalar_select %p521_p1, 1, 0 }
  0x76   : > { %v462_v49 = vsel %vm7355_vm5, %v3517_v38, %v460_v23  ;;  %vm3801_vm6 = vcmp.ge.s32.totalorder %v3259_v2, %v7356_v9  ;;  %vm3808_vm2 = vcmp.lt.s32.totalorder %v3259_v2, %v7359_v14  ;;  %v7360_v25 = vmov 0  ;;  %vm3818_vm5 = vmand %vm3586_vm9, %vm3593_vm10  ;;  %s3923_s29 = scalar_select %p549_p2, 1, 0 }
  0x77   : > { %v7358_v52 = vsel %vm3801_vm6, 4294967295, %v7357_v52  ;;  %v7361_v25 = vsel %vm3808_vm2, 4294967295, %v7360_v25  ;;  %v385_v38 = vmax.f32 %v383_v29, %v384_v18  ;;  %v394_v23 = vmax.f32 %v392_v26, %v393_v47  ;;  %vm3846_vm10 = vmand %vm3611_vm12, %vm3618_vm13  ;;  %p126_p1 = scmp.lt.s32.totalorder %s3179_s0, 3  ;;  %p952_p2 = por %p4407_p11, %p3676_p9 }
  0x78   : > { %v410_v42 = vmax.f32 %v408_v50, %v409_v45  ;;  %v7362_v9 = vmov 0  ;;  %vm7364_vm6 = vcmask 1043459   ;;  %v7365_v29 = vstv %s3244_s11  ;;  %vm3869_vm13 = vmand %vm3628_vm0, %vm3635_vm1  ;;  %s4078_s11 = scalar_select %p605_p6, 1, 0 }
  0x79   : > { %v7363_v9 = vsel %vm3818_vm5, 4294967295, %v7362_v9  ;;  %v464_v14 = vsel %vm7364_vm6, %v3519_v17, %v462_v49  ;;  %vm3831_vm2 = vcmp.ge.s32.totalorder %v3259_v2, %v7365_v29  ;;  %v7366_v50 = vmov 0  ;;  %vm3892_vm0 = vmand %vm3647_vm4, %vm3654_vm15  ;;  %s4151_s3 = scalar_select %p661_p0, 1, 0 }
  0x7a   : > { %v7367_v50 = vsel %vm3831_vm2, 4294967295, %v7366_v50  ;;  %v7368_v39 = vstv %s3247_s18  ;;  %v403_v26 = vmax.f32 %v401_v58, %v402_v57  ;;  %v419_v18 = vmax.f32 %v417_v44, %v418_v46  ;;  %vm3912_vm15 = vmand %vm3662_vm14, %vm3669_vm11  ;;  %s8227_s0 = smov (!%p126_p1, %s3179_s0), 3  ;;  %p968_p4 = por %p4407_p11, %p3703_p10 }
  0x7b   : > { %vm3838_vm9 = vcmp.lt.s32.totalorder %v3259_v2, %v7368_v39  ;;  %v426_v17 = vmax.f32 %v424_v60, %v425_v22  ;;  %v7371_v47 = vmov 0  ;;  %vm7373_vm6 = vcmask 1044484   ;;  %vm3929_vm11 = vmand %vm3690_vm3, %vm3697_vm8  ;;  %s3122_s5 = smul.u32 56, %s8227_s0  ;;  %p984_p6 = por %p4407_p11, %p3751_p12 }
  0x7c   : > { %v7372_v47 = vsel %vm3846_vm10, 4294967295, %v7371_v47  ;;  %v466_v45 = vsel %vm7373_vm6, %v3531_v59, %v464_v14  ;;  %v411_v58 = vrot.slane %v410_v42, 1  ;;  %vm7375_vm2 = vcmask 1045509   ;;  %p1000_p7 = por %p4407_p11, %p3771_p13  ;;  %p1016_p0 = por %p4407_p11, %p3858_p3 }
  0x7d   : > { %v468_v27 = vsel %vm7375_vm2, %v3533_v61, %v466_v45  ;;  %vm7376_vm12 = vcmask 1041409   ;;  %v7377_v59 = vmov 0  ;;  %v638_v44 = vstv %s3680_s10  ;;  %s4209_s10 = scalar_lea.vmem %s7120_s2, %s3122_s5  ;;  %p1032_p1 = por %p4407_p11, %p3986_p5 }
  0x7e   : > { %v473_v15 = vsel %vm7376_vm12, %v376_v41, %v367_v32  ;;  %v7378_v59 = vsel %vm3869_vm13, 4294967295, %v7377_v59  ;;  %v420_v60 = vrot.slane %v419_v18, 1  ;;  %v427_v57 = vrot.slane %v426_v17, 2 }
  0x7f   : > { %vm7379_vm2 = vcmask 1046534   ;;  %vm7380_vm6 = vcmask 1042434   ;;  %v7381_v3 = vmov 0  ;;  %v412_v30 = vmax.f32 %v410_v42, %v411_v58 }
  0x80   : > { %v470_v61 = vsel %vm7379_vm2, %v3570_v54, %v468_v27  ;;  %v474_v32 = vsel %vm7380_vm6, %v385_v38, %v473_v15  ;;  %v7382_v3 = vsel %vm3892_vm0, 4294967295, %v7381_v3  ;;  %vm7383_vm1 = vcmask 1047559  }
  0x81   : > { %v3898_v54 = vsel %vm7383_vm1, %v3623_v31, %v470_v61  ;;  %vm7384_vm12 = vcmask 1043459   ;;  %v7385_v53 = vmov 0  ;;  %v641_v42 = vstv %s3727_s4  ;;  %s4455_s4 = scalar_select %p952_p2, 1, 0 }
  0x82   : > { %v475_v41 = vsel %vm7384_vm12, %v394_v23, %v474_v32  ;;  %v7386_v53 = vsel %vm3912_vm15, 4294967295, %v7385_v53  ;;  %v421_v40 = vmax.f32 %v419_v18, %v420_v60  ;;  %v428_v31 = vmax.f32 %v426_v17, %v427_v57  ;;  %p1048_p2 = por %p4407_p11, %p4090_p8 }
  0x83   : > { %vm7387_vm4 = vcmask 1044484   ;;  %v7388_v37 = vmov 0  ;;  %vm3934_vm14 = vcmp.ge.s32.totalorder %v3239_v1, %v638_v44  ;;  %vm7392_vm2 = vcmask 1045509  }
  0x84   : > { %v476_v46 = vsel %vm7387_vm4, %v403_v26, %v475_v41  ;;  %v7389_v37 = vsel %vm3929_vm11, 4294967295, %v7388_v37  ;;  %v482_v49 = vsel %vm3818_vm5, %v3898_v54, -inf  ;;  %v510_v63 = vsel %vm3869_vm13, %v3898_v54, -inf  ;;  %s4547_s21 = scalar_select %p1048_p2, 1, 0 }
  0x85   : > { %v477_v22 = vsel %vm7392_vm2, %v412_v30, %v476_v46  ;;  %vm7393_vm8 = vnez %v7332_v51  ;;  %vm7394_vm3 = vnez %v7329_v62  ;;  %v7395_v16 = vmov 0 }
  0x86   : > { %vm3949_vm6 = vmand %vm7394_vm3, %vm7393_vm8  ;;  %vm3961_vm1 = vcmp.ge.s32.totalorder %v3259_v2, %v638_v44  ;;  %v7397_v38 = vmov 0  ;;  %v429_v23 = vrot.slane %v428_v31, 1  ;;  %vm7399_vm12 = vnez %v7336_v56 }
  0x87   : > { %v7396_v16 = vsel %vm3949_vm6, 4294967295, %v7395_v16  ;;  %v7398_v38 = vsel %vm3961_vm1, 4294967295, %v7397_v38  ;;  %vm3969_vm4 = vmand %vm7399_vm12, %vm3744_vm7  ;;  %vm3974_vm2 = vcmp.lt.s32.totalorder %v3239_v1, %v641_v42  ;;  %vm3979_vm8 = vcmp.lt.s32.totalorder %v3259_v2, %v641_v42 }
  0x88   : > { %v7404_v14 = vmov 0  ;;  %v689_v55 = vstv %s3812_s16  ;;  %vm7407_vm7 = vcmask 1046534   ;;  %v495_v29 = vstv %s3886_s24  ;;  %s4472_s16 = scalar_select %p968_p4, 1, 0 }
  0x89   : > { %v7405_v14 = vsel %vm3979_vm8, 4294967295, %v7404_v14  ;;  %v478_v56 = vsel %vm7407_vm7, %v421_v40, %v477_v22  ;;  %v538_v39 = vsel %vm3912_vm15, %v3898_v54, -inf  ;;  %v566_v26 = vsel %vm3929_vm11, %v3898_v54, -inf  ;;  %s4481_s24 = scalar_select %p984_p6, 1, 0 }
  0x8a   : > { %vm7408_vm3 = vnez %v7346_v24  ;;  %vm7409_vm12 = vnez %v7343_v43  ;;  %v7410_v18 = vmov 0  ;;  %v430_v17 = vmax.f32 %v428_v31, %v429_v23 }
  0x8b   : > { %vm4002_vm13 = vmand %vm7409_vm12, %vm7408_vm3  ;;  %vm7412_vm5 = vcmask 31744   ;;  %v523_v27 = vstv %s3906_s27  ;;  %vm7414_vm15 = vnez %v7354_v48  ;;  %vm7415_vm1 = vnez %v7351_v28  ;;  %s4501_s27 = scalar_select %p1000_p7, 1, 0 }
  0x8c   : > { %v7411_v18 = vsel %vm4002_vm13, 4294967295, %v7410_v18  ;;  %v484_v45 = vsel %vm7412_vm5, %v482_v49, -inf  ;;  %vm7413_vm7 = vmmov %vm7412_vm5  ;;  %v7416_v15 = vmov 0  ;;  %v551_v24 = vstv %s3923_s29  ;;  %s1063_s29 = sadd.s32 %s3103_s6, %s3189_s19 }
  0x8d   : > { %v512_v58 = vsel %vm7413_vm7, %v510_v63, -inf  ;;  %vm4013_vm8 = vmand %vm7415_vm1, %vm7414_vm15  ;;  %v579_v44 = vstv %s3958_s13  ;;  %vm7420_vm12 = vnez %v7358_v52  ;;  %v7421_v48 = vmov 0  ;;  %s4524_s13 = scalar_select %p1016_p0, 1, 0 }
  0x8e   : > { %v7417_v15 = vsel %vm4013_vm8, 4294967295, %v7416_v15  ;;  %vm7418_vm3 = vmmov %vm7412_vm5  ;;  %vm7419_vm5 = vnez %v7361_v25  ;;  %v594_v28 = vsel %vm3969_vm4, %v3898_v54, -inf  ;;  %vm7423_vm15 = vcmask 1047559  }
  0x8f   : > { %v540_v43 = vsel %vm7418_vm3, %v538_v39, -inf  ;;  %vm4028_vm7 = vmand %vm7420_vm12, %vm7419_vm5  ;;  %v479_v60 = vsel %vm7423_vm15, %v430_v17, %v478_v56  ;;  %vm7426_vm11 = vnez %v7367_v50  ;;  %v7427_v25 = vmov 0 }
  0x90   : > { %v7422_v48 = vsel %vm4028_vm7, 4294967295, %v7421_v48  ;;  %vm7424_vm1 = vmmov %vm7418_vm3  ;;  %v622_v52 = vsel %vm4002_vm13, %v3898_v54, -inf  ;;  %v483_v32 = vsel %vm3846_vm10, %v479_v60, -inf  ;;  %v511_v30 = vsel %vm3892_vm0, %v479_v60, -inf }
  0x91   : > { %v568_v57 = vsel %vm7424_vm1, %v566_v26, -inf  ;;  %vm7425_vm3 = vmmov %vm7424_vm1  ;;  %v539_v8 = vsel %vm3949_vm6, %v479_v60, -inf  ;;  %v567_v50 = vsel %vm4013_vm8, %v479_v60, -inf  ;;  %v7429_v41 = vmov 0 }
  0x92   : > { %v596_v61 = vsel %vm7425_vm3, %v594_v28, -inf  ;;  %vm4042_vm5 = vmand %vm7426_vm11, %vm3838_vm9  ;;  %v569_v46 = vsel %vm7424_vm1, %v567_v50, -inf  ;;  %v7436_v23 = vmov 0  ;;  %v595_v62 = vsel %vm4028_vm7, %v479_v60, -inf }
  0x93   : > { %v7428_v25 = vsel %vm4042_vm5, 4294967295, %v7427_v25  ;;  %vm4065_vm9 = vmand %vm3934_vm14, %vm3974_vm2  ;;  %v570_v63 = vmax.f32 %v568_v57, %v569_v46  ;;  %vm7434_vm14 = vnez %v7405_v14  ;;  %vm7435_vm2 = vnez %v7398_v38 }
  0x94   : > { %v7430_v41 = vsel %vm4065_vm9, 4294967295, %v7429_v41  ;;  %vm7431_vm11 = vmmov %vm7424_vm1  ;;  %v623_v56 = vsel %vm4042_vm5, %v479_v60, -inf  ;;  %v650_v38 = vsel %vm4065_vm9, %v3898_v54, -inf  ;;  %vm7165_vm5 = vcmask 1040384  }
  0x95   : > { %v485_v42 = vsel %vm7431_vm11, %v483_v32, -inf  ;;  %vm7432_vm12 = vmmov %vm7424_vm1  ;;  %v692_v28 = vstv %s4140_s30  ;;  %vm7168_vm8 = vcmask 30720   ;;  %s1067_s30 = sadd.s32 %s3105_s15, %s3189_s19 }
  0x96   : > { %v513_v40 = vsel %vm7432_vm12, %v511_v30, -inf  ;;  %vm7433_vm15 = vmmov %vm7424_vm1  ;;  %v486_v22 = vmax.f32 %v484_v45, %v485_v42  ;;  %v571_v45 = vrot.slane %v570_v63, 4  ;;  %vm4103_vm12 = vcmp.eq.s32.totalorder %v495_v29, 1 }
  0x97   : > { %v541_v31 = vsel %vm7433_vm15, %v539_v8, -inf  ;;  %v514_v0 = vmax.f32 %v512_v58, %v513_v40  ;;  %vm4084_vm3 = vmand %vm7435_vm2, %vm7434_vm14  ;;  %vm4107_vm15 = vcmp.eq.s32.totalorder %v523_v27, 1  ;;  %vm4115_vm14 = vcmp.eq.s32.totalorder %v579_v44, 1  ;;  %v7477_v58 = vld [vmem:[#allocation13_spill] sm:$0xff] }
  0x98   : > { %v542_v49 = vmax.f32 %v540_v43, %v541_v31  ;;  %v7437_v23 = vsel %vm4084_vm3, 4294967295, %v7436_v23  ;;  %vm7440_vm11 = vmmov %vm7424_vm1  ;;  %v487_v39 = vrot.slane %v486_v22, 4  ;;  %vm4111_vm1 = vcmp.eq.s32.totalorder %v551_v24, 1 }
  0x99   : > { %7438 = vst [vmem:[#allocation24_spill] sm:$0xff] %v7437_v23  ;;  %v624_v14 = vsel %vm7440_vm11, %v622_v52, -inf  ;;  %v515_v26 = vrot.slane %v514_v0, 4  ;;  %vm7449_vm2 = vmmov %vm7440_vm11  ;;  %v607_v29 = vstv %s4078_s11  ;;  %v651_v27 = vsel %vm4084_vm3, %v479_v60, -inf  ;;  %s4537_s11 = scalar_select %p1032_p1, 1, 0 }
  0x9a   : > { %v543_v17 = vrot.slane %v542_v49, 4  ;;  %v597_v57 = vsel %vm7449_vm2, %v595_v62, -inf  ;;  %vm7450_vm11 = vmmov %vm7449_vm2  ;;  %v488_v24 = vmax.f32 %v486_v22, %v487_v39  ;;  %v572_v30 = vmax.f32 %v570_v63, %v571_v45 }
  0x9b   : > { %v625_v52 = vsel %vm7450_vm11, %v623_v56, -inf  ;;  %v516_v32 = vmax.f32 %v514_v0, %v515_v26  ;;  %v598_v8 = vmax.f32 %v596_v61, %v597_v57  ;;  %v652_v42 = vsel %vm7449_vm2, %v650_v38, -inf  ;;  %vm7451_vm11 = vmmov %vm7449_vm2 }
  0x9c   : > { %v544_v44 = vmax.f32 %v542_v49, %v543_v17  ;;  %v626_v50 = vmax.f32 %v624_v14, %v625_v52  ;;  %v653_v40 = vsel %vm7451_vm11, %v651_v27, -inf  ;;  %v489_v31 = vrot.slane %v488_v24, 2 }
  0x9d   : > { %v517_v60 = vrot.slane %v516_v32, 2  ;;  %v573_v22 = vrot.slane %v572_v30, 2  ;;  %v599_v0 = vrot.slane %v598_v8, 4  ;;  %v635_v49 = vstv %s4127_s23  ;;  %s4558_s23 = sld [smem:[#allocation3 + %s1063_s29]]  ;;  %s3109_s29 = sadd.s32 1408, %s3185_s17 }
  0x9e   : > { %v545_v46 = vrot.slane %v544_v44, 2  ;;  %v627_v61 = vrot.slane %v626_v50, 4  ;;  %v654_v63 = vmax.f32 %v652_v42, %v653_v40  ;;  %v490_v62 = vmax.f32 %v488_v24, %v489_v31 }
  0x9f   : > { %v518_v56 = vmax.f32 %v516_v32, %v517_v60  ;;  %v574_v38 = vmax.f32 %v572_v30, %v573_v22  ;;  %v600_v39 = vmax.f32 %v598_v8, %v599_v0  ;;  %vm4142_vm2 = vcmp.eq.s32.totalorder %v607_v29, 1 }
  0xa0   : > { %v546_v14 = vmax.f32 %v544_v44, %v545_v46  ;;  %v628_v17 = vmax.f32 %v626_v50, %v627_v61  ;;  %v655_v45 = vrot.slane %v654_v63, 4  ;;  %v491_v57 = vrot.slane %v490_v62, 1 }
  0xa1   : > { %v519_v52 = vrot.slane %v518_v56, 1  ;;  %v575_v24 = vrot.slane %v574_v38, 1  ;;  %v601_v32 = vrot.slane %v600_v39, 2  ;;  %vm4153_vm7 = vcmp.eq.s32.totalorder %v635_v49, 1 }
  0xa2   : > { %v547_v27 = vrot.slane %v546_v14, 1  ;;  %v629_v44 = vrot.slane %v628_v17, 2  ;;  %v656_v30 = vmax.f32 %v654_v63, %v655_v45  ;;  %v492_v8 = vmax.f32 %v490_v62, %v491_v57 }
  0xa3   : > { %v520_v50 = vmax.f32 %v518_v56, %v519_v52  ;;  %v576_v40 = vmax.f32 %v574_v38, %v575_v24  ;;  %v602_v31 = vmax.f32 %v600_v39, %v601_v32  ;;  %v663_v22 = vstv %s4151_s3  ;;  %s4591_s3 = sld [smem:[#allocation3 + %s1067_s30]] }
  0xa4   : > { %v548_v42 = vmax.f32 %v546_v14, %v547_v27  ;;  %v630_v60 = vmax.f32 %v628_v17, %v629_v44  ;;  %v657_v46 = vrot.slane %v656_v30, 2  ;;  %v497_v0 = vsel %vm4103_vm12, 0.0, %v492_v8 }
  0xa5   : > { %v525_v61 = vsel %vm4107_vm15, 0.0, %v520_v50  ;;  %v581_v63 = vsel %vm4115_vm14, 0.0, %v576_v40  ;;  %v603_v62 = vrot.slane %v602_v31, 1  ;;  %vm7456_vm3 = vcmask 1041408  }
  0xa6   : > { %v553_v49 = vsel %vm4111_vm1, 0.0, %v548_v42  ;;  %v631_v56 = vrot.slane %v630_v60, 1  ;;  %v658_v14 = vmax.f32 %v656_v30, %v657_v46  ;;  %v667_v38 = vsel %vm7165_vm5, %v497_v0, %v525_v61  ;;  %v7471_v46 = vld [vmem:[#allocation7_spill] sm:$0xff]  ;;  %v7473_v0 = vld [vmem:[#allocation9_spill] sm:$0xff]  ;;  %v7474_v61 = vld [vmem:[#allocation10_spill] sm:$0xff] }
  0xa7   : > { %v669_v39 = vsel %vm7456_vm3, %v667_v38, %v553_v49  ;;  %vm4177_vm12 = vcmp.ge.s32.totalorder %v3239_v1, %v689_v55  ;;  %vm4184_vm15 = vcmp.ge.s32.totalorder %v3259_v2, %v689_v55  ;;  %v604_v54 = vmax.f32 %v602_v31, %v603_v62  ;;  %v7475_v49 = vld [vmem:[#allocation11_spill] sm:$0xff]  ;;  %v7476_v38 = vld [vmem:[#allocation12_spill] sm:$0xff] }
  0xa8   : > { %v632_v17 = vmax.f32 %v630_v60, %v631_v56  ;;  %v659_v45 = vrot.slane %v658_v14, 1  ;;  %vm7461_vm1 = vcmask 1042432   ;;  %vm4190_vm14 = vcmp.eq.s32.totalorder %v663_v22, 1  ;;  %v7472_v22 = vld [vmem:[#allocation8_spill] sm:$0xff] }
  0xa9   : > { %v671_v57 = vsel %vm7461_vm1, %v669_v39, %v581_v63  ;;  %vm693_vm5 = vcmp.lt.s32.totalorder %v3239_v1, %v692_v28  ;;  %vm694_vm11 = vcmp.lt.s32.totalorder %v3259_v2, %v692_v28  ;;  %v609_v55 = vsel %vm4142_vm2, 0.0, %v604_v54  ;;  %v7478_v28 = vld [vmem:[#allocation14_spill] sm:$0xff]  ;;  %p4968_p11 = scmp.le.s32.totalorder %s4591_s3, %s4558_s23 }
  0xaa   : > { %v637_v27 = vsel %vm4153_vm7, 0.0, %v632_v17  ;;  %v660_v24 = vmax.f32 %v658_v14, %v659_v45  ;;  %vm4202_vm1 = vmand %vm4177_vm12, %vm693_vm5  ;;  %vm7466_vm3 = vcmask 1043456   ;;  %vm7469_vm7 = vcmask 1044480   ;;  %v7479_v17 = vld [vmem:[#allocation15_spill] sm:$0xff] }
  0xab   : > { %v673_v26 = vsel %vm7466_vm3, %v671_v57, %v609_v55  ;;  %vm4214_vm2 = vmand %vm4184_vm15, %vm694_vm11  ;;  %v733_v29 = vsel %vm4202_vm1, %v3263_v4, -inf  ;;  %v735_v30 = vsel %vm4202_vm1, %v3266_v5, -inf  ;;  %v737_v8 = vsel %vm4202_vm1, %v3269_v6, -inf  ;;  %v7480_v57 = vld [vmem:[#allocation16_spill] sm:$0xff]  ;;  %v7481_v55 = vld [vmem:[#allocation17_spill] sm:$0xff]  ;;  %p1333_p4 = por %p4968_p11, %p3676_p9  ;;  %p1349_p6 = por %p4968_p11, %p3703_p10 }
  0xac   : > { %v665_v50 = vsel %vm4190_vm14, 0.0, %v660_v24  ;;  %v675_v42 = vsel %vm7469_vm7, %v673_v26, %v637_v27  ;;  %v734_v40 = vsel %vm4214_vm2, %v3281_v10, -inf  ;;  %v736_v4 = vsel %vm4214_vm2, %v3284_v11, -inf  ;;  %v7482_v24 = vld [vmem:[#allocation18_spill] sm:$0xff]  ;;  %v7487_v27 = vld [vmem:[#allocation23_spill] sm:$0xff]  ;;  %p1365_p7 = por %p4968_p11, %p3751_p12  ;;  %p1381_p0 = por %p4968_p11, %p3771_p13 }
  0xad   : > { %vm7470_vm5 = vcmask 1045504   ;;  %v738_v5 = vsel %vm4214_vm2, %v3287_v12, -inf  ;;  %v739_v6 = vsel %vm4202_vm1, %v3272_v7, -inf  ;;  %v740_v60 = vsel %vm4214_vm2, %v3290_v13, -inf  ;;  %s5007_s0 = scalar_select %p1333_p4, 1, 0 }
  0xae   : > { %v677_v31 = vsel %vm7470_vm5, %v675_v42, %v665_v50  ;;  %v741_v10 = vsel %vm4202_vm1, %v3302_v19, -inf  ;;  %v742_v11 = vsel %vm4214_vm2, %v3305_v20, -inf  ;;  %v743_v12 = vsel %vm4202_vm1, %v3308_v21, -inf  ;;  %v7483_v50 = vld [vmem:[#allocation19_spill] sm:$0xff]  ;;  %p1397_p1 = por %p4968_p11, %p3858_p3  ;;  %p1413_p2 = por %p4968_p11, %p3986_p5 }
  0xaf   : > { %679 = vst.msk [vmem:[%s4209_s10] sm:$0x7f] %vm7168_vm8, %v677_v31  ;;  %v744_v7 = vsel %vm4214_vm2, %v7471_v46, -inf  ;;  %v745_v13 = vsel %vm4202_vm1, %v7472_v22, -inf  ;;  %v746_v19 = vsel %vm4214_vm2, %v7473_v0, -inf  ;;  %v747_v20 = vsel %vm4202_vm1, %v7474_v61, -inf  ;;  %p1429_p4 = por %p4968_p11, %p4090_p8 }
  0xb0   : > { %v748_v21 = vsel %vm4214_vm2, %v7475_v49, -inf  ;;  %v7484_v31 = vld [vmem:[#allocation20_spill] sm:$0xff]  ;;  %v7485_v22 = vld [vmem:[#allocation21_spill] sm:$0xff]  ;;  %v7486_v61 = vld [vmem:[#allocation22_spill] sm:$0xff]  ;;  %vm7488_vm11 = vcmask 31744   ;;  %v7533_v32 = vsel %vm4214_vm2, %v7487_v27, -inf }
  0xb1   : > { %v765_v52 = vsel %vm7488_vm11, %v733_v29, -inf  ;;  %vm7489_vm12 = vmmov %vm7488_vm11  ;;  %s5031_s7 = scalar_select %p1349_p6, 1, 0 }
  0xb2   : > { %v766_v42 = vsel %vm7489_vm12, %v734_v40, -inf  ;;  %vm7490_vm15 = vmmov %vm7488_vm11  ;;  %s5040_s28 = scalar_select %p1365_p7, 1, 0 }
  0xb3   : > { %v774_v45 = vsel %vm7490_vm15, %v735_v30, -inf  ;;  %vm7491_vm14 = vmmov %vm7488_vm11  ;;  %v767_v54 = vmax.f32 %v765_v52, %v766_v42  ;;  %s5060_s6 = scalar_select %p1397_p1, 1, 0 }
  0xb4   : > { %v775_v46 = vsel %vm7491_vm14, %v736_v4, -inf  ;;  %vm7492_vm3 = vmmov %vm7488_vm11 }
  0xb5   : > { %v776_v43 = vmax.f32 %v774_v45, %v775_v46  ;;  %v783_v0 = vsel %vm7492_vm3, %v737_v8, -inf  ;;  %vm7493_vm7 = vmmov %vm7492_vm3  ;;  %v768_v29 = vrot.slane %v767_v54, 4 }
  0xb6   : > { %v784_v39 = vsel %vm7493_vm7, %v738_v5, -inf  ;;  %vm7494_vm5 = vmmov %vm7492_vm3 }
  0xb7   : > { %v785_v14 = vmax.f32 %v783_v0, %v784_v39  ;;  %v792_v49 = vsel %vm7494_vm5, %v739_v6, -inf  ;;  %vm7495_vm8 = vmmov %vm7492_vm3  ;;  %v777_v62 = vrot.slane %v776_v43, 4  ;;  %v769_v52 = vmax.f32 %v767_v54, %v768_v29 }
  0xb8   : > { %v793_v56 = vsel %vm7495_vm8, %v740_v60, -inf  ;;  %vm7496_vm6 = vmmov %vm7492_vm3 }
  0xb9   : > { %v801_v26 = vsel %vm7496_vm6, %v741_v10, -inf  ;;  %v794_v40 = vmax.f32 %v792_v49, %v793_v56  ;;  %vm7497_vm11 = vmmov %vm7492_vm3  ;;  %v786_v63 = vrot.slane %v785_v14, 4  ;;  %v778_v5 = vmax.f32 %v776_v43, %v777_v62 }
  0xba   : > { %v802_v30 = vsel %vm7497_vm11, %v742_v11, -inf  ;;  %vm7498_vm12 = vmmov %vm7492_vm3  ;;  %v770_v0 = vrot.slane %v769_v52, 2 }
  0xbb   : > { %v803_v4 = vmax.f32 %v801_v26, %v802_v30  ;;  %v810_v45 = vsel %vm7498_vm12, %v743_v12, -inf  ;;  %vm7499_vm15 = vmmov %vm7492_vm3  ;;  %v795_v39 = vrot.slane %v794_v40, 4  ;;  %v787_v6 = vmax.f32 %v785_v14, %v786_v63 }
  0xbc   : > { %v811_v8 = vsel %vm7499_vm15, %v744_v7, -inf  ;;  %vm7500_vm8 = vmmov %vm7492_vm3  ;;  %v779_v56 = vrot.slane %v778_v5, 2  ;;  %v771_v7 = vmax.f32 %v769_v52, %v770_v0  ;;  %v7503_v0 = vsel %vm4202_vm1, %v3342_v33, -inf }
  0xbd   : > { %v812_v42 = vmax.f32 %v810_v45, %v811_v8  ;;  %v804_v46 = vrot.slane %v803_v4, 4  ;;  %v819_v60 = vsel %vm7500_vm8, %v745_v13, -inf  ;;  %vm7501_vm6 = vmmov %vm7492_vm3  ;;  %v796_v49 = vmax.f32 %v794_v40, %v795_v39 }
  0xbe   : > { %v820_v10 = vsel %vm7501_vm6, %v746_v19, -inf  ;;  %v788_v2 = vrot.slane %v787_v6, 2  ;;  %vm7502_vm14 = vmmov %vm7492_vm3  ;;  %v780_v54 = vmax.f32 %v778_v5, %v779_v56  ;;  %v829_v13 = vsel %vm7492_vm3, %v748_v21, -inf }
  0xbf   : > { %v813_v11 = vrot.slane %v812_v42, 4  ;;  %v805_v26 = vmax.f32 %v803_v4, %v804_v46  ;;  %v821_v30 = vmax.f32 %v819_v60, %v820_v10  ;;  %v828_v12 = vsel %vm7502_vm14, %v747_v20, -inf  ;;  %vm7504_vm7 = vmmov %vm7492_vm3 }
  0xc0   : > { %v797_v62 = vrot.slane %v796_v49, 2  ;;  %v789_v29 = vmax.f32 %v787_v6, %v788_v2  ;;  %v772_v45 = vrot.slane %v771_v7, 1  ;;  %v781_v19 = vrot.slane %v780_v54, 1  ;;  %vm7506_vm5 = vmmov %vm7492_vm3 }
  0xc1   : > { %v814_v43 = vmax.f32 %v812_v42, %v813_v11  ;;  %v806_v63 = vrot.slane %v805_v26, 2  ;;  %v822_v14 = vrot.slane %v821_v30, 4  ;;  %v830_v4 = vmax.f32 %v828_v12, %v829_v13  ;;  %vm7508_vm11 = vmmov %vm7492_vm3 }
  0xc2   : > { %v798_v8 = vmax.f32 %v796_v49, %v797_v62  ;;  %v790_v40 = vrot.slane %v789_v29, 1  ;;  %v4336_v46 = vmax.f32 %v771_v7, %v772_v45  ;;  %v4338_v20 = vmax.f32 %v780_v54, %v781_v19  ;;  %vm7510_vm12 = vmmov %vm7492_vm3 }
  0xc3   : > { %v815_v1 = vrot.slane %v814_v43, 2  ;;  %v807_v39 = vmax.f32 %v805_v26, %v806_v63  ;;  %v823_v23 = vmax.f32 %v821_v30, %v822_v14  ;;  %v831_v60 = vrot.slane %v830_v4, 4  ;;  %vm7512_vm15 = vmmov %vm7492_vm3 }
  0xc4   : > { %v799_v52 = vrot.slane %v798_v8, 1  ;;  %v4340_v42 = vmax.f32 %v789_v29, %v790_v40  ;;  %v837_v56 = vsel %vm7504_vm7, %v7503_v0, -inf  ;;  %v7505_v49 = vsel %vm4214_vm2, %v3345_v34, -inf  ;;  %vm7514_vm8 = vmmov %vm7492_vm3 }
  0xc5   : > { %v816_v5 = vmax.f32 %v814_v43, %v815_v1  ;;  %v808_v2 = vrot.slane %v807_v39, 1  ;;  %v824_v6 = vrot.slane %v823_v23, 2  ;;  %v838_v1 = vsel %vm7506_vm5, %v7505_v49, -inf  ;;  %vm7516_vm6 = vmmov %vm7492_vm3 }
  0xc6   : > { %v4342_v21 = vmax.f32 %v798_v8, %v799_v52  ;;  %v832_v30 = vmax.f32 %v830_v4, %v831_v60  ;;  %v839_v12 = vmax.f32 %v837_v56, %v838_v1  ;;  %v7507_v54 = vsel %vm4202_vm1, %v3348_v35, -inf  ;;  %vm7518_vm14 = vmmov %vm7492_vm3 }
  0xc7   : > { %v817_v10 = vrot.slane %v816_v5, 1  ;;  %v4354_v11 = vmax.f32 %v807_v39, %v808_v2  ;;  %v825_v26 = vmax.f32 %v823_v23, %v824_v6  ;;  %v846_v33 = vsel %vm7508_vm11, %v7507_v54, -inf  ;;  %vm7521_vm7 = vmmov %vm7492_vm3 }
  0xc8   : > { %v7509_v62 = vsel %vm4214_vm2, %v3351_v36, -inf  ;;  %v7511_v23 = vsel %vm4202_vm1, %v7476_v38, -inf  ;;  %v833_v63 = vrot.slane %v832_v30, 2  ;;  %v840_v14 = vrot.slane %v839_v12, 4  ;;  %vm7523_vm5 = vmmov %vm7492_vm3 }
  0xc9   : > { %v4356_v7 = vmax.f32 %v816_v5, %v817_v10  ;;  %v847_v34 = vsel %vm7510_vm12, %v7509_v62, -inf  ;;  %v855_v43 = vsel %vm7512_vm15, %v7511_v23, -inf  ;;  %v826_v29 = vrot.slane %v825_v26, 1  ;;  %vm7526_vm11 = vmmov %vm7492_vm3 }
  0xca   : > { %v848_v35 = vmax.f32 %v846_v33, %v847_v34  ;;  %v7513_v13 = vsel %vm4214_vm2, %v7477_v58, -inf  ;;  %v7515_v45 = vsel %vm4202_vm1, %v7478_v28, -inf  ;;  %v7517_v19 = vsel %vm4214_vm2, %v7479_v17, -inf  ;;  %vm7528_vm12 = vmmov %vm7492_vm3 }
  0xcb   : > { %v856_v36 = vsel %vm7514_vm8, %v7513_v13, -inf  ;;  %v864_v38 = vsel %vm7516_vm6, %v7515_v45, -inf  ;;  %v865_v8 = vsel %vm7518_vm14, %v7517_v19, -inf  ;;  %v7519_v40 = vsel %vm4202_vm1, %v7480_v57, -inf  ;;  %vm7530_vm15 = vmmov %vm7492_vm3 }
  0xcc   : > { %v873_v58 = vsel %vm7492_vm3, %v7519_v40, -inf  ;;  %v4393_v39 = vmax.f32 %v825_v26, %v826_v29  ;;  %v834_v4 = vmax.f32 %v832_v30, %v833_v63  ;;  %v841_v52 = vmax.f32 %v839_v12, %v840_v14  ;;  %vm7532_vm8 = vmmov %vm7492_vm3 }
  0xcd   : > { %v849_v5 = vrot.slane %v848_v35, 4  ;;  %v857_v28 = vmax.f32 %v855_v43, %v856_v36  ;;  %v866_v2 = vmax.f32 %v864_v38, %v865_v8  ;;  %v7520_v6 = vsel %vm4214_vm2, %v7481_v55, -inf }
  0xce   : > { %v874_v17 = vsel %vm7521_vm7, %v7520_v6, -inf  ;;  %v7522_v60 = vsel %vm4202_vm1, %v7482_v24, -inf  ;;  %v835_v10 = vrot.slane %v834_v4, 1  ;;  %v842_v0 = vrot.slane %v841_v52, 2 }
  0xcf   : > { %v882_v57 = vsel %vm7523_vm5, %v7522_v60, -inf  ;;  %v850_v56 = vmax.f32 %v848_v35, %v849_v5  ;;  %v875_v49 = vmax.f32 %v873_v58, %v874_v17  ;;  %v858_v1 = vrot.slane %v857_v28, 4 }
  0xd0   : > { %v867_v55 = vrot.slane %v866_v2, 4  ;;  %v7525_v26 = vsel %vm4214_vm2, %v7483_v50, -inf  ;;  %v7527_v30 = vsel %vm4202_vm1, %v7484_v31, -inf  ;;  %v4421_v54 = vmax.f32 %v834_v4, %v835_v10 }
  0xd1   : > { %v883_v24 = vsel %vm7526_vm11, %v7525_v26, -inf  ;;  %v891_v12 = vsel %vm7528_vm12, %v7527_v30, -inf  ;;  %v843_v33 = vmax.f32 %v841_v52, %v842_v0  ;;  %v851_v62 = vrot.slane %v850_v56, 2 }
  0xd2   : > { %v876_v34 = vrot.slane %v875_v49, 4  ;;  %v859_v23 = vmax.f32 %v857_v28, %v858_v1  ;;  %v868_v43 = vmax.f32 %v866_v2, %v867_v55  ;;  %v884_v29 = vmax.f32 %v882_v57, %v883_v24 }
  0xd3   : > { %v7529_v50 = vsel %vm4214_vm2, %v7485_v22, -inf  ;;  %v844_v14 = vrot.slane %v843_v33, 1  ;;  %v852_v31 = vmax.f32 %v850_v56, %v851_v62  ;;  %v7531_v19 = vsel %vm4202_vm1, %v7486_v61, -inf  ;;  %vm7534_vm1 = vmmov %vm7492_vm3 }
  0xd4   : > { %v892_v63 = vsel %vm7530_vm15, %v7529_v50, -inf  ;;  %v877_v35 = vmax.f32 %v875_v49, %v876_v34  ;;  %v860_v36 = vrot.slane %v859_v23, 2  ;;  %v869_v45 = vrot.slane %v868_v43, 2 }
  0xd5   : > { %v893_v13 = vmax.f32 %v891_v12, %v892_v63  ;;  %v885_v38 = vrot.slane %v884_v29, 4  ;;  %v900_v22 = vsel %vm7532_vm8, %v7531_v19, -inf  ;;  %v845_v8 = vmax.f32 %v843_v33, %v844_v14 }
  0xd6   : > { %v853_v40 = vrot.slane %v852_v31, 1  ;;  %v878_v58 = vrot.slane %v877_v35, 2  ;;  %v861_v52 = vmax.f32 %v859_v23, %v860_v36  ;;  %v870_v5 = vmax.f32 %v868_v43, %v869_v45 }
  0xd7   : > { %v894_v4 = vrot.slane %v893_v13, 4  ;;  %v886_v28 = vmax.f32 %v884_v29, %v885_v38  ;;  %v901_v61 = vsel %vm7534_vm1, %v7533_v32, -inf  ;;  %vm7535_vm2 = vcmask 1041409  }
  0xd8   : > { %v854_v2 = vmax.f32 %v852_v31, %v853_v40  ;;  %v879_v6 = vmax.f32 %v877_v35, %v878_v58  ;;  %v902_v60 = vmax.f32 %v900_v22, %v901_v61  ;;  %v862_v44 = vrot.slane %v861_v52, 1  ;;  %vm7540_vm5 = vmmov %vm7535_vm2 }
  0xd9   : > { %v895_v17 = vmax.f32 %v893_v13, %v894_v4  ;;  %v871_v27 = vrot.slane %v870_v5, 1  ;;  %v887_v57 = vrot.slane %v886_v28, 2  ;;  %v925_v10 = vsel %vm7535_vm2, %v4338_v20, %v4336_v46 }
  0xda   : > { %v880_v0 = vrot.slane %v879_v6, 1  ;;  %v903_v49 = vrot.slane %v902_v60, 4  ;;  %vm7536_vm6 = vcmask 1042434   ;;  %v863_v46 = vmax.f32 %v861_v52, %v862_v44 }
  0xdb   : > { %v896_v56 = vrot.slane %v895_v17, 2  ;;  %v926_v1 = vsel %vm7536_vm6, %v4340_v42, %v925_v10  ;;  %v872_v20 = vmax.f32 %v870_v5, %v871_v27  ;;  %v888_v55 = vmax.f32 %v886_v28, %v887_v57  ;;  %vm7542_vm12 = vmmov %vm7536_vm6 }
  0xdc   : > { %vm7537_vm14 = vcmask 1043459   ;;  %v881_v42 = vmax.f32 %v879_v6, %v880_v0  ;;  %v904_v30 = vmax.f32 %v902_v60, %v903_v49  ;;  %vm7538_vm3 = vcmask 1044484  }
  0xdd   : > { %v927_v26 = vsel %vm7537_vm14, %v4342_v21, %v926_v1  ;;  %v897_v24 = vmax.f32 %v895_v17, %v896_v56  ;;  %v889_v21 = vrot.slane %v888_v55, 1  ;;  %vm7539_vm7 = vcmask 1045509   ;;  %vm7544_vm8 = vmmov %vm7537_vm14 }
  0xde   : > { %v928_v12 = vsel %vm7538_vm3, %v4354_v11, %v927_v26  ;;  %v932_v62 = vsel %vm7540_vm5, %v854_v2, %v845_v8  ;;  %v905_v34 = vrot.slane %v904_v30, 2  ;;  %vm7541_vm11 = vcmask 1046534   ;;  %vm7545_vm1 = vmmov %vm7538_vm3 }
  0xdf   : > { %v929_v33 = vsel %vm7539_vm7, %v4356_v7, %v928_v12  ;;  %v898_v11 = vrot.slane %v897_v24, 1  ;;  %v933_v43 = vsel %vm7542_vm12, %v863_v46, %v932_v62  ;;  %v890_v7 = vmax.f32 %v888_v55, %v889_v21  ;;  %vm7547_vm6 = vmmov %vm7539_vm7 }
  0xe0   : > { %v930_v23 = vsel %vm7541_vm11, %v4393_v39, %v929_v33  ;;  %vm7543_vm15 = vcmask 1047559   ;;  %v934_v50 = vsel %vm7544_vm8, %v872_v20, %v933_v43  ;;  %v906_v63 = vmax.f32 %v904_v30, %v905_v34  ;;  %vm7550_vm7 = vmmov %vm7541_vm11  ;;  %v7566_v33 = vld [vmem:[#allocation24_spill] sm:$0xff] }
  0xe1   : > { %v931_v29 = vsel %vm7543_vm15, %v4421_v54, %v930_v23  ;;  %v899_v39 = vmax.f32 %v897_v24, %v898_v11  ;;  %v935_v14 = vsel %vm7545_vm1, %v881_v42, %v934_v50  ;;  %vm7546_vm2 = vnez %v7363_v9 }
  0xe2   : > { %v941_v31 = vsel %vm7546_vm2, %v931_v29, -inf  ;;  %v936_v54 = vsel %vm7547_vm6, %v890_v7, %v935_v14  ;;  %v954_v35 = vstv %s4455_s4  ;;  %vm7548_vm14 = vnez %v7378_v59  ;;  %s5053_s4 = scalar_select %p1381_p0, 1, 0 }
  0xe3   : > { %v957_v13 = vsel %vm7548_vm14, %v931_v29, -inf  ;;  %vm7549_vm3 = vnez %v7386_v53  ;;  %v907_v45 = vrot.slane %v906_v63, 1  ;;  %v970_v38 = vstv %s4472_s16  ;;  %s3107_s16 = sadd.s32 512, %s3185_s17 }
  0xe4   : > { %v973_v36 = vsel %vm7549_vm3, %v931_v29, -inf  ;;  %v986_v19 = vstv %s4481_s24  ;;  %v1002_v22 = vstv %s4501_s27  ;;  %v937_v8 = vsel %vm7550_vm7, %v899_v39, %v936_v54  ;;  %s5107_s24 = scalar_select %p1413_p2, 1, 0 }
  0xe5   : > { %vm7551_vm5 = vcmask 31744   ;;  %vm7552_vm11 = vnez %v7389_v37  ;;  %v1005_v4 = vsel %vm3969_vm4, %v931_v29, -inf  ;;  %v908_v52 = vmax.f32 %v906_v63, %v907_v45  ;;  %v4677_v63 = vld [vmem:[%s3256_s26 + $0x38] sm:$0xff]  ;;  %s1444_s27 = sadd.s32 %s3107_s16, %s3189_s19 }
  0xe6   : > { %v943_v40 = vsel %vm7551_vm5, %v941_v31, -inf  ;;  %v989_v58 = vsel %vm7552_vm11, %v931_v29, -inf  ;;  %vm7553_vm12 = vmmov %vm7551_vm5  ;;  %v1018_v32 = vstv %s4524_s13  ;;  %v1021_v6 = vsel %vm4002_vm13, %v931_v29, -inf  ;;  %7601 = vst [vmem:[#allocation14_spill] sm:$0xff] %v4677_v63  ;;  %s5136_s13 = sld [smem:[#allocation3 + %s1444_s27]]  ;;  %s3113_s27 = sadd.s32 1536, %s3185_s17 }
  0xe7   : > { %v959_v5 = vsel %vm7553_vm12, %v957_v13, -inf  ;;  %vm7554_vm15 = vmmov %vm7551_vm5  ;;  %v1034_v17 = vstv %s4537_s11  ;;  %vm7557_vm6 = vcmask 1047559   ;;  %v1037_v27 = vsel %vm4065_vm9, %v931_v29, -inf  ;;  %v4670_v29 = vld [vmem:[%s3256_s26 + $0x28] sm:$0xff]  ;;  %s1448_s11 = sadd.s32 %s3109_s29, %s3189_s19  ;;  %s1829_s29 = sadd.s32 %s3113_s27, %s3189_s19 }
  0xe8   : > { %v975_v28 = vsel %vm7554_vm15, %v973_v36, -inf  ;;  %vm7555_vm8 = vmmov %vm7551_vm5  ;;  %v938_v60 = vsel %vm7557_vm6, %v908_v52, %v937_v8  ;;  %v1050_v57 = vstv %s4547_s21  ;;  %vm7560_vm12 = vnez %v7417_v15  ;;  %7598 = vst [vmem:[#allocation12_spill] sm:$0xff] %v4670_v29  ;;  %s5148_s21 = scalar_select %p1429_p4, 1, 0 }
  0xe9   : > { %v991_v61 = vsel %vm7555_vm8, %v989_v58, -inf  ;;  %vm7556_vm1 = vmmov %vm7551_vm5  ;;  %v942_v10 = vsel %vm3846_vm10, %v938_v60, -inf  ;;  %v958_v0 = vsel %vm3892_vm0, %v938_v60, -inf  ;;  %vm7559_vm5 = vnez %v7396_v16  ;;  %v7579_v58 = vld [vmem:[#allocation5_spill] sm:$0xff] }
  0xea   : > { %v1007_v2 = vsel %vm7556_vm1, %v1005_v4, -inf  ;;  %vm7558_vm7 = vmmov %vm7556_vm1  ;;  %v974_v56 = vsel %vm7559_vm5, %v938_v60, -inf  ;;  %v990_v49 = vsel %vm7560_vm12, %v938_v60, -inf  ;;  %vm7565_vm9 = vnez %v7428_v25 }
  0xeb   : > { %v1023_v44 = vsel %vm7558_vm7, %v1021_v6, -inf  ;;  %vm7561_vm15 = vmmov %vm7556_vm1  ;;  %v976_v20 = vsel %vm7556_vm1, %v974_v56, -inf  ;;  %vm7564_vm7 = vnez %v7422_v48  ;;  %v1022_v21 = vsel %vm7565_vm9, %v938_v60, -inf }
  0xec   : > { %v944_v1 = vsel %vm7561_vm15, %v942_v10, -inf  ;;  %vm7562_vm8 = vmmov %vm7556_vm1  ;;  %v977_v24 = vmax.f32 %v975_v28, %v976_v20  ;;  %v1006_v12 = vsel %vm7564_vm7, %v938_v60, -inf  ;;  %vm7567_vm12 = vnez %v7566_v33  ;;  %v4693_v10 = vld [vmem:[%s3256_s26 + $0x50] sm:$0xff] }
  0xed   : > { %v960_v46 = vsel %vm7562_vm8, %v958_v0, -inf  ;;  %vm7563_vm6 = vmmov %vm7556_vm1  ;;  %v945_v26 = vmax.f32 %v943_v40, %v944_v1  ;;  %v1038_v62 = vsel %vm7567_vm12, %v938_v60, -inf  ;;  %vm4593_vm8 = vcmp.eq.s32.totalorder %v954_v35, 1  ;;  %7607 = vst [vmem:[#allocation17_spill] sm:$0xff] %v4693_v10  ;;  %v4755_v1 = vld [vmem:[%s3256_s26 + $0xa8] sm:$0xff] }
  0xee   : > { %v992_v55 = vsel %vm7563_vm6, %v990_v49, -inf  ;;  %v961_v42 = vmax.f32 %v959_v5, %v960_v46  ;;  %vm7568_vm15 = vmmov %vm7556_vm1  ;;  %v978_v43 = vrot.slane %v977_v24, 4  ;;  %vm4597_vm1 = vcmp.eq.s32.totalorder %v970_v38, 1 }
  0xef   : > { %v993_v30 = vmax.f32 %v991_v61, %v992_v55  ;;  %v1039_v11 = vsel %vm7568_vm15, %v1037_v27, -inf  ;;  %v946_v34 = vrot.slane %v945_v26, 4  ;;  %vm4601_vm6 = vcmp.eq.s32.totalorder %v986_v19, 1  ;;  %vm7577_vm9 = vmmov %vm7568_vm15  ;;  %v7582_v27 = vld [vmem:[#allocation6_spill] sm:$0xff] }
  0xf0   : > { %v962_v23 = vrot.slane %v961_v42, 4  ;;  %vm4605_vm12 = vcmp.eq.s32.totalorder %v1002_v22, 1  ;;  %v1008_v14 = vsel %vm7568_vm15, %v1006_v12, -inf  ;;  %v1024_v31 = vsel %vm7577_vm9, %v1022_v21, -inf  ;;  %vm7578_vm7 = vmmov %vm7577_vm9 }
  0xf1   : > { %v994_v7 = vrot.slane %v993_v30, 4  ;;  %v1040_v54 = vsel %vm7578_vm7, %v1038_v62, -inf  ;;  %v1070_v35 = vstv %s4558_s23  ;;  %v947_v13 = vmax.f32 %v945_v26, %v946_v34  ;;  %s5154_s23 = sld [smem:[#allocation3 + %s1448_s11]] }
  0xf2   : > { %v963_v36 = vmax.f32 %v961_v42, %v962_v23  ;;  %v979_v45 = vmax.f32 %v977_v24, %v978_v43  ;;  %v1009_v8 = vmax.f32 %v1007_v2, %v1008_v14  ;;  %v1025_v19 = vmax.f32 %v1023_v44, %v1024_v31  ;;  %v4634_v43 = vld [vmem:[%s3256_s26] sm:$0xff] }
  0xf3   : > { %v995_v38 = vmax.f32 %v993_v30, %v994_v7  ;;  %v1041_v40 = vmax.f32 %v1039_v11, %v1040_v54  ;;  %vm4614_vm5 = vcmp.ge.s32.totalorder %v7579_v58, %v1070_v35  ;;  %v948_v4 = vrot.slane %v947_v13, 2  ;;  %7589 = vst [vmem:[#allocation7_spill] sm:$0xff] %v4634_v43  ;;  %v4637_v7 = vld [vmem:[%s3256_s26 + $0x8] sm:$0xff] }
  0xf4   : > { %v964_v52 = vrot.slane %v963_v36, 2  ;;  %v980_v5 = vrot.slane %v979_v45, 2  ;;  %v1010_v61 = vrot.slane %v1009_v8, 4  ;;  %v1026_v6 = vrot.slane %v1025_v19, 4  ;;  %7590 = vst [vmem:[#allocation8_spill] sm:$0xff] %v4637_v7 }
  0xf5   : > { %v996_v28 = vrot.slane %v995_v38, 2  ;;  %v1042_v60 = vrot.slane %v1041_v40, 4  ;;  %vm4619_vm9 = vcmp.ge.s32.totalorder %v7582_v27, %v1070_v35  ;;  %v949_v2 = vmax.f32 %v947_v13, %v948_v4  ;;  %v4647_v13 = vld [vmem:[%s3256_s26 + $0x10] sm:$0xff] }
  0xf6   : > { %v965_v44 = vmax.f32 %v963_v36, %v964_v52  ;;  %v981_v0 = vmax.f32 %v979_v45, %v980_v5  ;;  %vm4623_vm7 = vcmp.eq.s32.totalorder %v1018_v32, 1  ;;  %vm4627_vm15 = vcmp.eq.s32.totalorder %v1034_v17, 1  ;;  %7593 = vst [vmem:[#allocation9_spill] sm:$0xff] %v4647_v13  ;;  %v4650_v36 = vld [vmem:[%s3256_s26 + $0x18] sm:$0xff]  ;;  %v4653_v45 = vld [vmem:[%s3256_s26 + $0x20] sm:$0xff]  ;;  %v4673_v4 = vld [vmem:[%s3256_s26 + $0x30] sm:$0xff] }
  0xf7   : > { %v997_v56 = vmax.f32 %v995_v38, %v996_v28  ;;  %v1011_v46 = vmax.f32 %v1009_v8, %v1010_v61  ;;  %v1027_v20 = vmax.f32 %v1025_v19, %v1026_v6  ;;  %v1043_v55 = vmax.f32 %v1041_v40, %v1042_v60  ;;  %7594 = vst [vmem:[#allocation10_spill] sm:$0xff] %v4650_v36  ;;  %v4680_v28 = vld [vmem:[%s3256_s26 + $0x40] sm:$0xff]  ;;  %v4683_v61 = vld [vmem:[%s3256_s26 + $0x48] sm:$0xff]  ;;  %p5384_p11 = scmp.le.s32.totalorder %s5154_s23, %s5136_s13 }
  0xf8   : > { %v1073_v26 = vstv %s4591_s3  ;;  %v950_v42 = vrot.slane %v949_v2, 1  ;;  %v966_v24 = vrot.slane %v965_v44, 1  ;;  %v982_v30 = vrot.slane %v981_v0, 1  ;;  %7595 = vst [vmem:[#allocation11_spill] sm:$0xff] %v4653_v45  ;;  %7599 = vst [vmem:[#allocation13_spill] sm:$0xff] %v4673_v4  ;;  %v4777_v6 = vld [vmem:[%s3256_s26 + $0xc8] sm:$0xff] }
  0xf9   : > { %v998_v12 = vrot.slane %v997_v56, 1  ;;  %v1012_v21 = vrot.slane %v1011_v46, 2  ;;  %v1028_v32 = vrot.slane %v1027_v20, 2  ;;  %v1044_v62 = vrot.slane %v1043_v55, 2  ;;  %7602 = vst [vmem:[#allocation15_spill] sm:$0xff] %v4680_v28  ;;  %7603 = vst [vmem:[#allocation16_spill] sm:$0xff] %v4683_v61  ;;  %p1714_p6 = por %p5384_p11, %p3676_p9  ;;  %p1730_p7 = por %p5384_p11, %p3703_p10 }
  0xfa   : > { %vm1074_vm0 = vcmp.lt.s32.totalorder %v7579_v58, %v1073_v26  ;;  %v951_v17 = vmax.f32 %v949_v2, %v950_v42  ;;  %v967_v11 = vmax.f32 %v965_v44, %v966_v24  ;;  %v983_v34 = vmax.f32 %v981_v0, %v982_v30  ;;  %v4696_v2 = vld [vmem:[%s3256_s26 + $0x58] sm:$0xff]  ;;  %v4699_v44 = vld [vmem:[%s3256_s26 + $0x60] sm:$0xff]  ;;  %v4712_v42 = vld [vmem:[%s3256_s26 + $0x70] sm:$0xff]  ;;  %7616 = vst [vmem:[#allocation23_spill] sm:$0xff] %v4777_v6  ;;  %p1746_p0 = por %p5384_p11, %p3751_p12  ;;  %p1762_p1 = por %p5384_p11, %p3771_p13 }
  0xfb   : > { %v999_v23 = vmax.f32 %v997_v56, %v998_v12  ;;  %v1013_v14 = vmax.f32 %v1011_v46, %v1012_v21  ;;  %v1029_v31 = vmax.f32 %v1027_v20, %v1028_v32  ;;  %v1045_v54 = vmax.f32 %v1043_v55, %v1044_v62  ;;  %vm4642_vm13 = vmand %vm4614_vm5, %vm1074_vm0  ;;  %7608 = vst [vmem:[#allocation18_spill] sm:$0xff] %v4696_v2  ;;  %v4715_v24 = vld [vmem:[%s3256_s26 + $0x78] sm:$0xff]  ;;  %v4718_v30 = vld [vmem:[%s3256_s26 + $0x80] sm:$0xff]  ;;  %s5432_s30 = scalar_select %p1714_p6, 1, 0 }
  0xfc   : > { %vm1075_vm10 = vcmp.lt.s32.totalorder %v7582_v27, %v1073_v26  ;;  %v956_v38 = vsel %vm4593_vm8, 0.0, %v951_v17  ;;  %v972_v8 = vsel %vm4597_vm1, 0.0, %v967_v11  ;;  %v988_v19 = vsel %vm4601_vm6, 0.0, %v983_v34  ;;  %7609 = vst [vmem:[#allocation19_spill] sm:$0xff] %v4699_v44  ;;  %v4709_v26 = vld [vmem:[%s3256_s26 + $0x68] sm:$0xff]  ;;  %7612 = vst [vmem:[#allocation21_spill] sm:$0xff] %v4712_v42  ;;  %p1778_p2 = por %p5384_p11, %p3858_p3  ;;  %p1794_p4 = por %p5384_p11, %p3986_p5 }
  0xfd   : > { %v1004_v40 = vsel %vm4605_vm12, 0.0, %v999_v23  ;;  %vm4665_vm0 = vmand %vm4619_vm9, %vm1075_vm10  ;;  %v1014_v50 = vrot.slane %v1013_v14, 1  ;;  %v1030_v52 = vrot.slane %v1029_v31, 1  ;;  %v1046_v5 = vrot.slane %v1045_v54, 1  ;;  %7611 = vst [vmem:[#allocation20_spill] sm:$0xff] %v4709_v26  ;;  %v4721_v12 = vld [vmem:[%s3256_s26 + $0x88] sm:$0xff]  ;;  %p1810_p6 = por %p5384_p11, %p4090_p8 }
  0xfe   : > { %vm7600_vm5 = vcmask 1040384   ;;  %vm4687_vm10 = vcmp.eq.s32.totalorder %v1050_v57, 1  ;;  %vm7606_vm12 = vcmask 1041408   ;;  %v1114_v0 = vsel %vm4642_vm13, %v4634_v43, -inf  ;;  %7613 = vst [vmem:[#allocation22_spill] sm:$0xff] %v4715_v24  ;;  %s3111_s3 = sadd.s32 640, %s3185_s17 }
  0xff   : > { %v1053_v39 = vsel %vm7600_vm5, %v956_v38, %v972_v8  ;;  %v1115_v56 = vsel %vm4665_vm0, %v4637_v7, -inf  ;;  %v1015_v57 = vmax.f32 %v1013_v14, %v1014_v50  ;;  %v1031_v46 = vmax.f32 %v1029_v31, %v1030_v52  ;;  %v4742_v14 = vld [vmem:[%s3256_s26 + $0x90] sm:$0xff]  ;;  %v4745_v31 = vld [vmem:[%s3256_s26 + $0x98] sm:$0xff]  ;;  %v4752_v38 = vld [vmem:[%s3256_s26 + $0xa0] sm:$0xff]  ;;  %s5449_s5 = scalar_select %p1730_p7, 1, 0 }
 0x100   : > { %v1054_v60 = vsel %vm7606_vm12, %v1053_v39, %v988_v19  ;;  %v1047_v20 = vmax.f32 %v1045_v54, %v1046_v5  ;;  %vm7610_vm8 = vcmask 1042432   ;;  %v1116_v21 = vsel %vm4642_vm13, %v4647_v13, -inf  ;;  %v4758_v8 = vld [vmem:[%s3256_s26 + $0xb0] sm:$0xff]  ;;  %v4771_v5 = vld [vmem:[%s3256_s26 + $0xb8] sm:$0xff]  ;;  %v4774_v39 = vld [vmem:[%s3256_s26 + $0xc0] sm:$0xff] }
 0x101   : > { %v1055_v55 = vsel %vm7610_vm8, %v1054_v60, %v1004_v40  ;;  %v1117_v32 = vsel %vm4665_vm0, %v4650_v36, -inf  ;;  %v1118_v62 = vsel %vm4642_vm13, %v4653_v45, -inf  ;;  %v1119_v17 = vsel %vm4665_vm0, %v4670_v29, -inf  ;;  %s5524_s16 = scalar_select %p1810_p6, 1, 0 }
 0x102   : > { %v1020_v11 = vsel %vm4623_vm7, 0.0, %v1015_v57  ;;  %v1036_v34 = vsel %vm4627_vm15, 0.0, %v1031_v46  ;;  %v1052_v23 = vsel %vm4687_vm10, 0.0, %v1047_v20  ;;  %v1120_v54 = vsel %vm4642_vm13, %v4673_v4, -inf }
 0x103   : > { %vm7614_vm1 = vcmask 1043456   ;;  %v1121_v19 = vsel %vm4665_vm0, %v4677_v63, -inf  ;;  %v1122_v40 = vsel %vm4642_vm13, %v4680_v28, -inf  ;;  %v1123_v50 = vsel %vm4665_vm0, %v4683_v61, -inf }
 0x104   : > { %v1056_v49 = vsel %vm7614_vm1, %v1055_v55, %v1020_v11  ;;  %vm7615_vm6 = vcmask 1044480   ;;  %v1124_v60 = vsel %vm4642_vm13, %v4693_v10, -inf  ;;  %v1125_v57 = vsel %vm4665_vm0, %v4696_v2, -inf  ;;  %v4790_v55 = vld [vmem:[%s3256_s26 + $0xd0] sm:$0xff]  ;;  %v4793_v11 = vld [vmem:[%s3256_s26 + $0xd8] sm:$0xff] }
 0x105   : > { %v1057_v52 = vsel %vm7615_vm6, %v1056_v49, %v1036_v34  ;;  %v1126_v46 = vsel %vm4642_vm13, %v4699_v44, -inf  ;;  %vm7617_vm9 = vcmask 1045504   ;;  %7618 = vst [vmem:[#allocation25_spill] sm:$0xff] %v4790_v55  ;;  %7619 = vst [vmem:[#allocation26_spill] sm:$0xff] %v4793_v11  ;;  %v4796_v34 = vld [vmem:[%s3256_s26 + $0xe0] sm:$0xff]  ;;  %v1127_v49 = vsel %vm4665_vm0, %v4709_v26, -inf }
 0x106   : > { %v1058_v20 = vsel %vm7617_vm9, %v1057_v52, %v1052_v23  ;;  %7620 = vst [vmem:[#allocation27_spill] sm:$0xff] %v4796_v34  ;;  %v1128_v2 = vsel %vm4642_vm13, %v4712_v42, -inf  ;;  %v1129_v44 = vsel %vm4665_vm0, %v4715_v24, -inf  ;;  %vm7621_vm7 = vcmask 30720   ;;  %v4810_v23 = vld [vmem:[%s3256_s26 + $0xe8] sm:$0xff]  ;;  %v4813_v52 = vld [vmem:[%s3256_s26 + $0xf0] sm:$0xff] }
 0x107   : > { %3047 = vst.msk [vmem:[%s4209_s10 + $0x8] sm:$0x7f] %vm7621_vm7, %v1058_v20  ;;  %7622 = vst [vmem:[#allocation28_spill] sm:$0xff] %v4810_v23  ;;  %vm7623_vm15 = vcmask 31744  }
 0x108   : > { %v1146_v61 = vsel %vm7623_vm15, %v1114_v0, -inf  ;;  %vm7624_vm5 = vmmov %vm7623_vm15 }
 0x109   : > { %v1147_v10 = vsel %vm7624_vm5, %v1115_v56, -inf  ;;  %vm7625_vm10 = vmmov %vm7624_vm5 }
 0x10a   : > { %v1155_v28 = vsel %vm7625_vm10, %v1116_v21, -inf  ;;  %vm7626_vm12 = vmmov %vm7624_vm5  ;;  %v1148_v4 = vmax.f32 %v1146_v61, %v1147_v10 }
 0x10b   : > { %v1156_v26 = vsel %vm7626_vm12, %v1117_v32, -inf  ;;  %vm7627_vm8 = vmmov %vm7624_vm5 }
 0x10c   : > { %v1164_v63 = vsel %vm7627_vm8, %v1118_v62, -inf  ;;  %v1157_v42 = vmax.f32 %v1155_v28, %v1156_v26  ;;  %vm7628_vm1 = vmmov %vm7624_vm5  ;;  %v1149_v56 = vrot.slane %v1148_v4, 4 }
 0x10d   : > { %v1165_v29 = vsel %vm7628_vm1, %v1119_v17, -inf  ;;  %vm7629_vm6 = vmmov %vm7628_vm1 }
 0x10e   : > { %v1173_v20 = vsel %vm7629_vm6, %v1120_v54, -inf  ;;  %v1166_v36 = vmax.f32 %v1164_v63, %v1165_v29  ;;  %vm7630_vm9 = vmmov %vm7628_vm1  ;;  %v1158_v45 = vrot.slane %v1157_v42, 4  ;;  %v1150_v10 = vmax.f32 %v1148_v4, %v1149_v56 }
 0x10f   : > { %v1174_v7 = vsel %vm7630_vm9, %v1121_v19, -inf  ;;  %vm7631_vm7 = vmmov %vm7628_vm1 }
 0x110   : > { %v1182_v24 = vsel %vm7631_vm7, %v1122_v40, -inf  ;;  %vm7632_vm15 = vmmov %vm7628_vm1  ;;  %v1175_v21 = vmax.f32 %v1173_v20, %v1174_v7  ;;  %v1167_v32 = vrot.slane %v1166_v36, 4  ;;  %v1159_v26 = vmax.f32 %v1157_v42, %v1158_v45 }
 0x111   : > { %v1183_v0 = vsel %vm7632_vm15, %v1123_v50, -inf  ;;  %vm7633_vm5 = vmmov %vm7628_vm1  ;;  %v1209_v40 = vsel %vm7628_vm1, %v1128_v2, -inf  ;;  %v1151_v7 = vrot.slane %v1150_v10, 2 }
 0x112   : > { %v1184_v13 = vmax.f32 %v1182_v24, %v1183_v0  ;;  %v1191_v62 = vsel %vm7633_vm5, %v1124_v60, -inf  ;;  %vm7634_vm10 = vmmov %vm7628_vm1  ;;  %v1176_v29 = vrot.slane %v1175_v21, 4  ;;  %v1168_v17 = vmax.f32 %v1166_v36, %v1167_v32  ;;  %v4877_v36 = vld [vmem:[%s3256_s26 + $0xf8] sm:$0xff] }
 0x113   : > { %v1192_v28 = vsel %vm7634_vm10, %v1125_v57, -inf  ;;  %vm7635_vm12 = vmmov %vm7628_vm1  ;;  %v1160_v24 = vrot.slane %v1159_v26, 2  ;;  %v1152_v4 = vmax.f32 %v1150_v10, %v1151_v7 }
 0x114   : > { %v1200_v61 = vsel %vm7635_vm12, %v1126_v46, -inf  ;;  %v1185_v63 = vrot.slane %v1184_v13, 4  ;;  %v1193_v54 = vmax.f32 %v1191_v62, %v1192_v28  ;;  %vm7636_vm8 = vmmov %vm7628_vm1  ;;  %v1177_v50 = vmax.f32 %v1175_v21, %v1176_v29 }
 0x115   : > { %v1201_v19 = vsel %vm7636_vm8, %v1127_v49, -inf  ;;  %v1169_v60 = vrot.slane %v1168_v17, 2  ;;  %vm7637_vm6 = vmmov %vm7628_vm1  ;;  %v1161_v45 = vmax.f32 %v1159_v26, %v1160_v24  ;;  %v1153_v2 = vrot.slane %v1152_v4, 1 }
 0x116   : > { %v1186_v20 = vmax.f32 %v1184_v13, %v1185_v63  ;;  %v1194_v0 = vrot.slane %v1193_v54, 4  ;;  %v1202_v57 = vmax.f32 %v1200_v61, %v1201_v19  ;;  %v1210_v46 = vsel %vm7637_vm6, %v1129_v44, -inf  ;;  %vm7639_vm9 = vmmov %vm7628_vm1 }
 0x117   : > { %v1178_v42 = vrot.slane %v1177_v50, 2  ;;  %v1170_v32 = vmax.f32 %v1168_v17, %v1169_v60  ;;  %v1211_v28 = vmax.f32 %v1209_v40, %v1210_v46  ;;  %v1162_v43 = vrot.slane %v1161_v45, 1  ;;  %vm7641_vm7 = vmmov %vm7628_vm1 }
 0x118   : > { %v1187_v56 = vrot.slane %v1186_v20, 2  ;;  %v1195_v62 = vmax.f32 %v1193_v54, %v1194_v0  ;;  %v1203_v49 = vrot.slane %v1202_v57, 4  ;;  %v4882_v10 = vmax.f32 %v1152_v4, %v1153_v2  ;;  %vm7643_vm15 = vmmov %vm7628_vm1 }
 0x119   : > { %v1179_v27 = vmax.f32 %v1177_v50, %v1178_v42  ;;  %v1171_v13 = vrot.slane %v1170_v32, 1  ;;  %v1212_v61 = vrot.slane %v1211_v28, 4  ;;  %v4884_v26 = vmax.f32 %v1161_v45, %v1162_v43  ;;  %vm7645_vm5 = vmmov %vm7628_vm1 }
 0x11a   : > { %v1188_v21 = vmax.f32 %v1186_v20, %v1187_v56  ;;  %v1196_v29 = vrot.slane %v1195_v62, 2  ;;  %v1204_v63 = vmax.f32 %v1202_v57, %v1203_v49  ;;  %v7638_v20 = vsel %vm4642_vm13, %v4718_v30, -inf  ;;  %vm7647_vm10 = vmmov %vm7628_vm1 }
 0x11b   : > { %v1180_v17 = vrot.slane %v1179_v27, 1  ;;  %v1213_v7 = vmax.f32 %v1211_v28, %v1212_v61  ;;  %v4886_v24 = vmax.f32 %v1170_v32, %v1171_v13  ;;  %v1218_v60 = vsel %vm7639_vm9, %v7638_v20, -inf  ;;  %vm7649_vm12 = vmmov %vm7628_vm1 }
 0x11c   : > { %v1189_v54 = vrot.slane %v1188_v21, 1  ;;  %v1197_v19 = vmax.f32 %v1195_v62, %v1196_v29  ;;  %v1205_v40 = vrot.slane %v1204_v63, 2  ;;  %v7640_v43 = vsel %vm4665_vm0, %v4721_v12, -inf  ;;  %vm7651_vm8 = vmmov %vm7628_vm1 }
 0x11d   : > { %v4888_v50 = vmax.f32 %v1179_v27, %v1180_v17  ;;  %v1219_v0 = vsel %vm7641_vm7, %v7640_v43, -inf  ;;  %v1214_v4 = vrot.slane %v1213_v7, 2  ;;  %v7642_v27 = vsel %vm4642_vm13, %v4742_v14, -inf  ;;  %vm7654_vm6 = vmmov %vm7628_vm1 }
 0x11e   : > { %v1198_v57 = vrot.slane %v1197_v19, 1  ;;  %v1206_v46 = vmax.f32 %v1204_v63, %v1205_v40  ;;  %v1220_v45 = vmax.f32 %v1218_v60, %v1219_v0  ;;  %v1227_v42 = vsel %vm7643_vm15, %v7642_v27, -inf  ;;  %vm7656_vm9 = vmmov %vm7628_vm1 }
 0x11f   : > { %v7644_v56 = vsel %vm4665_vm0, %v4745_v31, -inf  ;;  %v7646_v62 = vsel %vm4642_vm13, %v4752_v38, -inf  ;;  %v7648_v28 = vsel %vm4665_vm0, %v4755_v1, -inf  ;;  %v4920_v13 = vmax.f32 %v1188_v21, %v1189_v54  ;;  %vm7658_vm7 = vmmov %vm7628_vm1 }
 0x120   : > { %v1228_v32 = vsel %vm7645_vm5, %v7644_v56, -inf  ;;  %v1236_v49 = vsel %vm7647_vm10, %v7646_v62, -inf  ;;  %v1237_v2 = vsel %vm7649_vm12, %v7648_v28, -inf  ;;  %v1207_v29 = vrot.slane %v1206_v46, 1  ;;  %vm7660_vm15 = vmmov %vm7628_vm1 }
 0x121   : > { %v1215_v63 = vmax.f32 %v1213_v7, %v1214_v4  ;;  %v1221_v61 = vrot.slane %v1220_v45, 4  ;;  %v1229_v17 = vmax.f32 %v1227_v42, %v1228_v32  ;;  %v1238_v40 = vmax.f32 %v1236_v49, %v1237_v2  ;;  %vm7662_vm5 = vmmov %vm7628_vm1 }
 0x122   : > { %v7650_v20 = vsel %vm4642_vm13, %v4758_v8, -inf  ;;  %v7652_v43 = vsel %vm4665_vm0, %v4771_v5, -inf  ;;  %v4932_v27 = vmax.f32 %v1197_v19, %v1198_v57  ;;  %v4934_v21 = vmax.f32 %v1206_v46, %v1207_v29  ;;  %vm7664_vm10 = vmmov %vm7628_vm1 }
 0x123   : > { %v1245_v60 = vsel %vm7651_vm8, %v7650_v20, -inf  ;;  %v1246_v0 = vsel %vm7628_vm1, %v7652_v43, -inf  ;;  %v1222_v54 = vmax.f32 %v1220_v45, %v1221_v61  ;;  %v1230_v4 = vrot.slane %v1229_v17, 4  ;;  %vm7667_vm12 = vmmov %vm7628_vm1 }
 0x124   : > { %v1247_v7 = vmax.f32 %v1245_v60, %v1246_v0  ;;  %v1239_v42 = vrot.slane %v1238_v40, 4  ;;  %v7653_v56 = vsel %vm4642_vm13, %v4774_v39, -inf  ;;  %v7655_v62 = vsel %vm4665_vm0, %v4777_v6, -inf  ;;  %vm7669_vm8 = vmmov %vm7628_vm1 }
 0x125   : > { %v1254_v32 = vsel %vm7654_vm6, %v7653_v56, -inf  ;;  %v1255_v49 = vsel %vm7656_vm9, %v7655_v62, -inf  ;;  %v1216_v19 = vrot.slane %v1215_v63, 1  ;;  %v1223_v57 = vrot.slane %v1222_v54, 2 }
 0x126   : > { %v1248_v46 = vrot.slane %v1247_v7, 4  ;;  %v1256_v45 = vmax.f32 %v1254_v32, %v1255_v49  ;;  %v1231_v28 = vmax.f32 %v1229_v17, %v1230_v4  ;;  %v1240_v2 = vmax.f32 %v1238_v40, %v1239_v42 }
 0x127   : > { %v7657_v29 = vsel %vm4642_vm13, %v4790_v55, -inf  ;;  %v7659_v20 = vsel %vm4665_vm0, %v4793_v11, -inf  ;;  %v1224_v43 = vmax.f32 %v1222_v54, %v1223_v57  ;;  %v7661_v17 = vsel %vm4642_vm13, %v4796_v34, -inf }
 0x128   : > { %v1263_v61 = vsel %vm7658_vm7, %v7657_v29, -inf  ;;  %v1264_v60 = vsel %vm7660_vm15, %v7659_v20, -inf  ;;  %v1249_v0 = vmax.f32 %v1247_v7, %v1248_v46  ;;  %v1257_v56 = vrot.slane %v1256_v45, 4 }
 0x129   : > { %v1265_v62 = vmax.f32 %v1263_v61, %v1264_v60  ;;  %v1232_v44 = vrot.slane %v1231_v28, 2  ;;  %v1241_v32 = vrot.slane %v1240_v2, 2  ;;  %v1272_v40 = vsel %vm7662_vm5, %v7661_v17, -inf }
 0x12a   : > { %v7663_v4 = vsel %vm4665_vm0, %v4810_v23, -inf  ;;  %v1225_v54 = vrot.slane %v1224_v43, 1  ;;  %v1250_v7 = vrot.slane %v1249_v0, 2  ;;  %v1258_v49 = vmax.f32 %v1256_v45, %v1257_v56 }
 0x12b   : > { %v1273_v42 = vsel %vm7664_vm10, %v7663_v4, -inf  ;;  %v1266_v57 = vrot.slane %v1265_v62, 4  ;;  %v1233_v46 = vmax.f32 %v1231_v28, %v1232_v44  ;;  %v1242_v29 = vmax.f32 %v1240_v2, %v1241_v32 }
 0x12c   : > { %v1274_v61 = vmax.f32 %v1272_v40, %v1273_v42  ;;  %v7666_v20 = vsel %vm4642_vm13, %v4813_v52, -inf  ;;  %v1226_v17 = vmax.f32 %v1224_v43, %v1225_v54  ;;  %v1251_v4 = vmax.f32 %v1249_v0, %v1250_v7 }
 0x12d   : > { %v1281_v60 = vsel %vm7667_vm12, %v7666_v20, -inf  ;;  %v1259_v23 = vrot.slane %v1258_v49, 2  ;;  %v1267_v34 = vmax.f32 %v1265_v62, %v1266_v57  ;;  %v1234_v11 = vrot.slane %v1233_v46, 1 }
 0x12e   : > { %v1243_v55 = vrot.slane %v1242_v29, 1  ;;  %v1275_v6 = vrot.slane %v1274_v61, 4  ;;  %v7668_v44 = vsel %vm4665_vm0, %v4877_v36, -inf  ;;  %v1252_v28 = vrot.slane %v1251_v4, 1 }
 0x12f   : > { %v1282_v45 = vsel %vm7669_vm8, %v7668_v44, -inf  ;;  %v1260_v2 = vmax.f32 %v1258_v49, %v1259_v23  ;;  %v1268_v35 = vrot.slane %v1267_v34, 2  ;;  %v1235_v0 = vmax.f32 %v1233_v46, %v1234_v11 }
 0x130   : > { %v1283_v43 = vmax.f32 %v1281_v60, %v1282_v45  ;;  %v1244_v56 = vmax.f32 %v1242_v29, %v1243_v55  ;;  %v1276_v62 = vmax.f32 %v1274_v61, %v1275_v6  ;;  %vm7670_vm13 = vcmask 1041409  }
 0x131   : > { %v1306_v22 = vsel %vm7670_vm13, %v4884_v26, %v4882_v10  ;;  %v1253_v32 = vmax.f32 %v1251_v4, %v1252_v28  ;;  %v1261_v23 = vrot.slane %v1260_v2, 1  ;;  %v1269_v40 = vmax.f32 %v1267_v34, %v1268_v35  ;;  %vm7672_vm1 = vmmov %vm7670_vm13 }
 0x132   : > { %v1284_v42 = vrot.slane %v1283_v43, 4  ;;  %v1217_v54 = vmax.f32 %v1215_v63, %v1216_v19  ;;  %v1277_v7 = vrot.slane %v1276_v62, 2  ;;  %vm7671_vm0 = vcmask 1042434  }
 0x133   : > { %v1307_v49 = vsel %vm7671_vm0, %v4886_v24, %v1306_v22  ;;  %v1313_v55 = vsel %vm7672_vm1, %v1235_v0, %v1226_v17  ;;  %v1262_v6 = vmax.f32 %v1260_v2, %v1261_v23  ;;  %v1270_v11 = vrot.slane %v1269_v40, 1  ;;  %vm7675_vm7 = vmmov %vm7671_vm0 }
 0x134   : > { %v1285_v34 = vmax.f32 %v1283_v43, %v1284_v42  ;;  %vm7673_vm6 = vcmask 1043459   ;;  %v1278_v26 = vmax.f32 %v1276_v62, %v1277_v7  ;;  %vm7674_vm9 = vcmask 1044484  }
 0x135   : > { %v1308_v10 = vsel %vm7673_vm6, %v4888_v50, %v1307_v49  ;;  %v1314_v63 = vsel %vm7675_vm7, %v1244_v56, %v1313_v55  ;;  %v1271_v19 = vmax.f32 %v1269_v40, %v1270_v11  ;;  %vm7676_vm15 = vcmask 1045509   ;;  %vm7677_vm5 = vmmov %vm7673_vm6 }
 0x136   : > { %v1309_v24 = vsel %vm7674_vm9, %v4920_v13, %v1308_v10  ;;  %v1286_v57 = vrot.slane %v1285_v34, 2  ;;  %v1315_v46 = vsel %vm7677_vm5, %v1253_v32, %v1314_v63  ;;  %v1279_v13 = vrot.slane %v1278_v26, 1  ;;  %vm7679_vm12 = vmmov %vm7674_vm9 }
 0x137   : > { %v1310_v50 = vsel %vm7676_vm15, %v4932_v27, %v1309_v24  ;;  %vm7678_vm10 = vcmask 1046534   ;;  %v1316_v61 = vsel %vm7679_vm12, %v1262_v6, %v1315_v46  ;;  %vm7680_vm8 = vcmask 1047559   ;;  %vm7681_vm13 = vmmov %vm7676_vm15 }
 0x138   : > { %v1311_v29 = vsel %vm7678_vm10, %v4934_v21, %v1310_v50  ;;  %v1287_v27 = vmax.f32 %v1285_v34, %v1286_v57  ;;  %v1317_v60 = vsel %vm7681_vm13, %v1271_v19, %v1316_v61  ;;  %v1280_v21 = vmax.f32 %v1278_v26, %v1279_v13  ;;  %vm7682_vm0 = vmmov %vm7678_vm10 }
 0x139   : > { %v1312_v20 = vsel %vm7680_vm8, %v1217_v54, %v1311_v29  ;;  %v1335_v2 = vstv %s5007_s0  ;;  %v1351_v35 = vstv %s5031_s7  ;;  %vm7683_vm1 = vcmask 31744   ;;  %vm7687_vm15 = vmmov %vm7680_vm8  ;;  %s5458_s0 = scalar_select %p1746_p0, 1, 0 }
 0x13a   : > { %v1322_v17 = vsel %vm7546_vm2, %v1312_v20, -inf  ;;  %v1338_v4 = vsel %vm7548_vm14, %v1312_v20, -inf  ;;  %v1354_v44 = vsel %vm7549_vm3, %v1312_v20, -inf  ;;  %v1288_v45 = vrot.slane %v1287_v27, 1  ;;  %vm7684_vm6 = vmmov %vm7683_vm1  ;;  %s5478_s7 = scalar_select %p1762_p1, 1, 0 }
 0x13b   : > { %v1318_v28 = vsel %vm7682_vm0, %v1280_v21, %v1317_v60  ;;  %v1370_v43 = vsel %vm7552_vm11, %v1312_v20, -inf  ;;  %v1324_v56 = vsel %vm7683_vm1, %v1322_v17, -inf  ;;  %v1340_v62 = vsel %vm7684_vm6, %v1338_v4, -inf  ;;  %vm7685_vm9 = vmmov %vm7683_vm1 }
 0x13c   : > { %v1289_v0 = vmax.f32 %v1287_v27, %v1288_v45  ;;  %v1356_v22 = vsel %vm7685_vm9, %v1354_v44, -inf  ;;  %v1367_v32 = vstv %s5040_s28  ;;  %vm7686_vm7 = vmmov %vm7683_vm1  ;;  %v1383_v40 = vstv %s5053_s4  ;;  %v7718_v45 = vld [vmem:[#allocation6_spill] sm:$0xff]  ;;  %s1825_s28 = sadd.s32 %s3111_s3, %s3189_s19 }
 0x13d   : > { %v1372_v23 = vsel %vm7686_vm7, %v1370_v43, -inf  ;;  %v1386_v42 = vsel %vm3969_vm4, %v1312_v20, -inf  ;;  %vm7688_vm5 = vmmov %vm7683_vm1  ;;  %v1399_v49 = vstv %s5060_s6  ;;  %vm7689_vm10 = vnez %v7411_v18  ;;  %s5501_s4 = scalar_select %p1778_p2, 1, 0 }
 0x13e   : > { %v1319_v54 = vsel %vm7687_vm15, %v1289_v0, %v1318_v28  ;;  %v1388_v7 = vsel %vm7688_vm5, %v1386_v42, -inf  ;;  %v1402_v55 = vsel %vm7689_vm10, %v1312_v20, -inf  ;;  %vm7690_vm12 = vnez %v7372_v47  ;;  %vm7694_vm6 = vmmov %vm7683_vm1  ;;  %s5514_s6 = scalar_select %p1794_p4, 1, 0 }
 0x13f   : > { %v1323_v6 = vsel %vm7690_vm12, %v1319_v54, -inf  ;;  %vm7691_vm8 = vnez %v7382_v3  ;;  %vm7692_vm13 = vnez %v7396_v16  ;;  %vm7693_vm0 = vnez %v7417_v15  ;;  %vm7695_vm9 = vmmov %vm7683_vm1 }
 0x140   : > { %v1339_v11 = vsel %vm7691_vm8, %v1319_v54, -inf  ;;  %v1355_v34 = vsel %vm7692_vm13, %v1319_v54, -inf  ;;  %v1371_v10 = vsel %vm7693_vm0, %v1319_v54, -inf  ;;  %v1325_v26 = vsel %vm7683_vm1, %v1323_v6, -inf  ;;  %vm7696_vm7 = vmmov %vm7683_vm1 }
 0x141   : > { %v1341_v24 = vsel %vm7694_vm6, %v1339_v11, -inf  ;;  %v1357_v63 = vsel %vm7695_vm9, %v1355_v34, -inf  ;;  %v1373_v19 = vsel %vm7696_vm7, %v1371_v10, -inf  ;;  %v1326_v57 = vmax.f32 %v1324_v56, %v1325_v26 }
 0x142   : > { %v1342_v50 = vmax.f32 %v1340_v62, %v1341_v24  ;;  %v1358_v46 = vmax.f32 %v1356_v22, %v1357_v63  ;;  %v1374_v13 = vmax.f32 %v1372_v23, %v1373_v19  ;;  %vm7697_vm15 = vnez %v7422_v48 }
 0x143   : > { %v1387_v29 = vsel %vm7697_vm15, %v1319_v54, -inf  ;;  %vm7698_vm5 = vnez %v7428_v25  ;;  %v1404_v27 = vsel %vm7683_vm1, %v1402_v55, -inf  ;;  %vm7699_vm6 = vnez %v7430_v41 }
 0x144   : > { %v1403_v61 = vsel %vm7698_vm5, %v1319_v54, -inf  ;;  %v1418_v60 = vsel %vm7699_vm6, %v1312_v20, -inf  ;;  %v1327_v21 = vrot.slane %v1326_v57, 4  ;;  %v1343_v17 = vrot.slane %v1342_v50, 4 }
 0x145   : > { %v1359_v4 = vrot.slane %v1358_v46, 4  ;;  %v1375_v44 = vrot.slane %v1374_v13, 4  ;;  %vm5113_vm9 = vcmp.eq.s32.totalorder %v1335_v2, 1  ;;  %vm5117_vm7 = vcmp.eq.s32.totalorder %v1351_v35, 1 }
 0x146   : > { %vm5121_vm1 = vcmp.eq.s32.totalorder %v1367_v32, 1  ;;  %vm7706_vm5 = vcmask 31744   ;;  %vm7708_vm0 = vnez %v7566_v33  ;;  %v1328_v35 = vmax.f32 %v1326_v57, %v1327_v21 }
 0x147   : > { %v1389_v20 = vsel %vm7706_vm5, %v1387_v29, -inf  ;;  %vm7707_vm15 = vmmov %vm7706_vm5  ;;  %v1419_v56 = vsel %vm7708_vm0, %v1319_v54, -inf  ;;  %v1344_v62 = vmax.f32 %v1342_v50, %v1343_v17  ;;  %v1360_v22 = vmax.f32 %v1358_v46, %v1359_v4 }
 0x148   : > { %v1405_v0 = vsel %vm7707_vm15, %v1403_v61, -inf  ;;  %vm7709_vm13 = vmmov %vm7706_vm5  ;;  %v1376_v32 = vmax.f32 %v1374_v13, %v1375_v44  ;;  %v1390_v23 = vmax.f32 %v1388_v7, %v1389_v20  ;;  %v1415_v55 = vstv %s5107_s24  ;;  %s5535_s24 = sld [smem:[#allocation3 + %s1825_s28]]  ;;  %s3117_s28 = sadd.s32 1664, %s3185_s17 }
 0x149   : > { %v1420_v2 = vsel %vm7709_vm13, %v1418_v60, -inf  ;;  %v1406_v42 = vmax.f32 %v1404_v27, %v1405_v0  ;;  %v1421_v6 = vsel %vm7706_vm5, %v1419_v56, -inf  ;;  %v1329_v54 = vrot.slane %v1328_v35, 2 }
 0x14a   : > { %v1345_v11 = vrot.slane %v1344_v62, 2  ;;  %v1361_v34 = vrot.slane %v1360_v22, 2  ;;  %v1377_v10 = vrot.slane %v1376_v32, 2  ;;  %vm5139_vm13 = vcmp.eq.s32.totalorder %v1383_v40, 1 }
 0x14b   : > { %v1391_v24 = vrot.slane %v1390_v23, 4  ;;  %v1407_v63 = vrot.slane %v1406_v42, 4  ;;  %v1422_v19 = vmax.f32 %v1420_v2, %v1421_v6  ;;  %v1330_v7 = vmax.f32 %v1328_v35, %v1329_v54 }
 0x14c   : > { %v1346_v57 = vmax.f32 %v1344_v62, %v1345_v11  ;;  %v1362_v50 = vmax.f32 %v1360_v22, %v1361_v34  ;;  %v1378_v46 = vmax.f32 %v1376_v32, %v1377_v10  ;;  %vm5150_vm15 = vcmp.eq.s32.totalorder %v1399_v49, 1 }
 0x14d   : > { %v1392_v40 = vmax.f32 %v1390_v23, %v1391_v24  ;;  %v1408_v29 = vmax.f32 %v1406_v42, %v1407_v63  ;;  %vm5156_vm5 = vcmp.eq.s32.totalorder %v1415_v55, 1  ;;  %v1423_v27 = vrot.slane %v1422_v19, 4 }
 0x14e   : > { %v1331_v60 = vrot.slane %v1330_v7, 1  ;;  %v1347_v21 = vrot.slane %v1346_v57, 1  ;;  %v1363_v17 = vrot.slane %v1362_v50, 1  ;;  %v1379_v4 = vrot.slane %v1378_v46, 1 }
 0x14f   : > { %v1393_v44 = vrot.slane %v1392_v40, 2  ;;  %v1409_v20 = vrot.slane %v1408_v29, 2  ;;  %v1424_v49 = vmax.f32 %v1422_v19, %v1423_v27  ;;  %v1431_v0 = vstv %s5148_s21 }
 0x150   : > { %v1332_v56 = vmax.f32 %v1330_v7, %v1331_v60  ;;  %v1348_v2 = vmax.f32 %v1346_v57, %v1347_v21  ;;  %v1364_v35 = vmax.f32 %v1362_v50, %v1363_v17  ;;  %v1380_v62 = vmax.f32 %v1378_v46, %v1379_v4  ;;  %v7727_v17 = vld [vmem:[#allocation7_spill] sm:$0xff]  ;;  %v7728_v4 = vld [vmem:[#allocation9_spill] sm:$0xff] }
 0x151   : > { %v1394_v22 = vmax.f32 %v1392_v40, %v1393_v44  ;;  %v1410_v32 = vmax.f32 %v1408_v29, %v1409_v20  ;;  %v1425_v23 = vrot.slane %v1424_v49, 2  ;;  %v1451_v42 = vstv %s5136_s13  ;;  %v7729_v44 = vld [vmem:[#allocation11_spill] sm:$0xff]  ;;  %s5568_s13 = sld [smem:[#allocation3 + %s1829_s29]] }
 0x152   : > { %v1337_v55 = vsel %vm5113_vm9, 0.0, %v1332_v56  ;;  %v1353_v6 = vsel %vm5117_vm7, 0.0, %v1348_v2  ;;  %v1369_v54 = vsel %vm5121_vm1, 0.0, %v1364_v35  ;;  %v1385_v11 = vsel %vm5139_vm13, 0.0, %v1380_v62  ;;  %v7731_v56 = vld [vmem:[#allocation8_spill] sm:$0xff]  ;;  %v7732_v35 = vld [vmem:[#allocation10_spill] sm:$0xff] }
 0x153   : > { %v1395_v34 = vrot.slane %v1394_v22, 1  ;;  %v1411_v10 = vrot.slane %v1410_v32, 1  ;;  %v1426_v24 = vmax.f32 %v1424_v49, %v1425_v23  ;;  %vm7716_vm0 = vcmask 1040384  }
 0x154   : > { %v1434_v63 = vsel %vm7716_vm0, %v1337_v55, %v1353_v6  ;;  %vm7717_vm8 = vcmask 1041408   ;;  %vm1452_vm12 = vcmp.ge.s32.totalorder %v7579_v58, %v1451_v42  ;;  %vm1453_vm9 = vcmp.ge.s32.totalorder %v7718_v45, %v1451_v42  ;;  %v7735_v42 = vld [vmem:[#allocation13_spill] sm:$0xff]  ;;  %v7736_v6 = vld [vmem:[#allocation14_spill] sm:$0xff] }
 0x155   : > { %v1435_v19 = vsel %vm7717_vm8, %v1434_v63, %v1369_v54  ;;  %v1454_v7 = vstv %s5154_s23  ;;  %v1396_v28 = vmax.f32 %v1394_v22, %v1395_v34  ;;  %v1412_v57 = vmax.f32 %v1410_v32, %v1411_v10  ;;  %v7734_v32 = vld [vmem:[#allocation12_spill] sm:$0xff]  ;;  %v7740_v63 = vld [vmem:[#allocation17_spill] sm:$0xff] }
 0x156   : > { %v1427_v50 = vrot.slane %v1426_v24, 1  ;;  %vm7719_vm7 = vcmask 1042432   ;;  %vm5176_vm1 = vcmp.eq.s32.totalorder %v1431_v0, 1  ;;  %vm1455_vm13 = vcmp.lt.s32.totalorder %v7579_v58, %v1454_v7  ;;  %v7739_v10 = vld [vmem:[#allocation16_spill] sm:$0xff] }
 0x157   : > { %v1436_v43 = vsel %vm7719_vm7, %v1435_v19, %v1385_v11  ;;  %vm1456_vm0 = vcmp.lt.s32.totalorder %v7718_v45, %v1454_v7  ;;  %v1401_v46 = vsel %vm5150_vm15, 0.0, %v1396_v28  ;;  %v1417_v40 = vsel %vm5156_vm5, 0.0, %v1412_v57  ;;  %vm5186_vm8 = vmand %vm1452_vm12, %vm1455_vm13  ;;  %v7738_v11 = vld [vmem:[#allocation15_spill] sm:$0xff]  ;;  %v7741_v7 = vld [vmem:[#allocation18_spill] sm:$0xff]  ;;  %p5945_p11 = scmp.le.s32.totalorder %s5568_s13, %s5535_s24 }
 0x158   : > { %v1428_v29 = vmax.f32 %v1426_v24, %v1427_v50  ;;  %vm7724_vm7 = vcmask 1043456   ;;  %vm5191_vm6 = vmand %vm1453_vm9, %vm1456_vm0  ;;  %v1495_v13 = vsel %vm5186_vm8, %v7727_v17, -inf  ;;  %v1497_v61 = vsel %vm5186_vm8, %v7728_v4, -inf  ;;  %v7742_v57 = vld [vmem:[#allocation19_spill] sm:$0xff] }
 0x159   : > { %v1437_v60 = vsel %vm7724_vm7, %v1436_v43, %v1401_v46  ;;  %v1499_v20 = vsel %vm5186_vm8, %v7729_v44, -inf  ;;  %vm7730_vm12 = vcmask 1044480   ;;  %v1496_v2 = vsel %vm5191_vm6, %v7731_v56, -inf  ;;  %v7743_v43 = vld [vmem:[#allocation20_spill] sm:$0xff]  ;;  %v7744_v46 = vld [vmem:[#allocation21_spill] sm:$0xff]  ;;  %p2095_p7 = por %p5945_p11, %p3676_p9  ;;  %p2111_p0 = por %p5945_p11, %p3703_p10 }
 0x15a   : > { %v1433_v49 = vsel %vm5176_vm1, 0.0, %v1428_v29  ;;  %v1438_v0 = vsel %vm7730_vm12, %v1437_v60, %v1417_v40  ;;  %v1498_v62 = vsel %vm5191_vm6, %v7732_v35, -inf  ;;  %vm7733_vm15 = vcmask 1045504   ;;  %v7745_v29 = vld [vmem:[#allocation22_spill] sm:$0xff]  ;;  %p2127_p1 = por %p5945_p11, %p3751_p12  ;;  %p2143_p2 = por %p5945_p11, %p3771_p13 }
 0x15b   : > { %v1439_v22 = vsel %vm7733_vm15, %v1438_v0, %v1433_v49  ;;  %v1500_v23 = vsel %vm5191_vm6, %v7734_v32, -inf  ;;  %v1501_v55 = vsel %vm5186_vm8, %v7735_v42, -inf  ;;  %v1502_v54 = vsel %vm5191_vm6, %v7736_v6, -inf  ;;  %v7746_v42 = vld [vmem:[#allocation23_spill] sm:$0xff]  ;;  %s5984_s21 = scalar_select %p2095_p7, 1, 0 }
 0x15c   : > { %vm7737_vm5 = vcmask 30720   ;;  %v1503_v34 = vsel %vm5186_vm8, %v7738_v11, -inf  ;;  %v1504_v24 = vsel %vm5191_vm6, %v7739_v10, -inf  ;;  %v1505_v19 = vsel %vm5186_vm8, %v7740_v63, -inf  ;;  %v7747_v11 = vld [vmem:[#allocation25_spill] sm:$0xff]  ;;  %v7748_v63 = vld [vmem:[#allocation26_spill] sm:$0xff]  ;;  %p2159_p4 = por %p5945_p11, %p3858_p3  ;;  %p2175_p6 = por %p5945_p11, %p3986_p5 }
 0x15d   : > { %3050 = vst.msk [vmem:[%s4209_s10 + $0x10] sm:$0x7f] %vm7737_vm5, %v1439_v22  ;;  %v1506_v28 = vsel %vm5191_vm6, %v7741_v7, -inf  ;;  %v1507_v50 = vsel %vm5186_vm8, %v7742_v57, -inf  ;;  %v1508_v26 = vsel %vm5191_vm6, %v7743_v43, -inf  ;;  %v1509_v40 = vsel %vm5186_vm8, %v7744_v46, -inf  ;;  %p2191_p7 = por %p5945_p11, %p4090_p8 }
 0x15e   : > { %v1510_v60 = vsel %vm5191_vm6, %v7745_v29, -inf  ;;  %v7749_v57 = vld [vmem:[#allocation27_spill] sm:$0xff]  ;;  %v7750_v46 = vld [vmem:[#allocation28_spill] sm:$0xff]  ;;  %vm7751_vm9 = vcmask 31744   ;;  %s6008_s23 = scalar_select %p2111_p0, 1, 0 }
 0x15f   : > { %v1527_v32 = vsel %vm7751_vm9, %v1495_v13, -inf  ;;  %vm7752_vm1 = vmmov %vm7751_vm9  ;;  %s6017_s15 = scalar_select %p2127_p1, 1, 0 }
 0x160   : > { %v1528_v7 = vsel %vm7752_vm1, %v1496_v2, -inf  ;;  %vm7753_vm13 = vmmov %vm7752_vm1  ;;  %s6037_s3 = scalar_select %p2159_p4, 1, 0 }
 0x161   : > { %v1536_v22 = vsel %vm7753_vm13, %v1497_v61, -inf  ;;  %vm7754_vm0 = vmmov %vm7752_vm1  ;;  %v1529_v35 = vmax.f32 %v1527_v32, %v1528_v7 }
 0x162   : > { %v1537_v43 = vsel %vm7754_vm0, %v1498_v62, -inf  ;;  %vm7755_vm7 = vmmov %vm7754_vm0 }
 0x163   : > { %v1538_v56 = vmax.f32 %v1536_v22, %v1537_v43  ;;  %v1545_v29 = vsel %vm7755_vm7, %v1499_v20, -inf  ;;  %vm7756_vm12 = vmmov %vm7754_vm0  ;;  %v1530_v13 = vrot.slane %v1529_v35, 4 }
 0x164   : > { %v1546_v0 = vsel %vm7756_vm12, %v1500_v23, -inf  ;;  %vm7757_vm15 = vmmov %vm7754_vm0 }
 0x165   : > { %v1547_v49 = vmax.f32 %v1545_v29, %v1546_v0  ;;  %v1554_v6 = vsel %vm7757_vm15, %v1501_v55, -inf  ;;  %vm7758_vm5 = vmmov %vm7754_vm0  ;;  %v1539_v4 = vrot.slane %v1538_v56, 4  ;;  %v1531_v32 = vmax.f32 %v1529_v35, %v1530_v13 }
 0x166   : > { %v1555_v44 = vsel %vm7758_vm5, %v1502_v54, -inf  ;;  %vm7759_vm10 = vmmov %vm7754_vm0  ;;  %v1581_v54 = vsel %vm7754_vm0, %v1507_v50, -inf }
 0x167   : > { %v1563_v10 = vsel %vm7759_vm10, %v1503_v34, -inf  ;;  %v1556_v2 = vmax.f32 %v1554_v6, %v1555_v44  ;;  %vm7760_vm9 = vmmov %vm7754_vm0  ;;  %v1548_v17 = vrot.slane %v1547_v49, 4  ;;  %v1540_v23 = vmax.f32 %v1538_v56, %v1539_v4 }
 0x168   : > { %v1564_v61 = vsel %vm7760_vm9, %v1504_v24, -inf  ;;  %vm7761_vm1 = vmmov %vm7754_vm0  ;;  %v1532_v29 = vrot.slane %v1531_v32, 2 }
 0x169   : > { %v1565_v62 = vmax.f32 %v1563_v10, %v1564_v61  ;;  %v1572_v22 = vsel %vm7761_vm1, %v1505_v19, -inf  ;;  %vm7762_vm13 = vmmov %vm7754_vm0  ;;  %v1557_v0 = vrot.slane %v1556_v2, 4  ;;  %v1549_v55 = vmax.f32 %v1547_v49, %v1548_v17 }
 0x16a   : > { %v1573_v20 = vsel %vm7762_vm13, %v1506_v28, -inf  ;;  %vm7763_vm10 = vmmov %vm7754_vm0  ;;  %v1541_v44 = vrot.slane %v1540_v23, 2  ;;  %v1533_v28 = vmax.f32 %v1531_v32, %v1532_v29  ;;  %v7766_v29 = vsel %vm5186_vm8, %v4718_v30, -inf }
 0x16b   : > { %v1574_v7 = vmax.f32 %v1572_v22, %v1573_v20  ;;  %v1566_v43 = vrot.slane %v1565_v62, 4  ;;  %v1582_v34 = vsel %vm7763_vm10, %v1508_v26, -inf  ;;  %v1558_v6 = vmax.f32 %v1556_v2, %v1557_v0  ;;  %vm7764_vm7 = vmmov %vm7754_vm0 }
 0x16c   : > { %v1550_v45 = vrot.slane %v1549_v55, 2  ;;  %v1583_v61 = vmax.f32 %v1581_v54, %v1582_v34  ;;  %v1590_v19 = vsel %vm7764_vm7, %v1509_v40, -inf  ;;  %v1542_v35 = vmax.f32 %v1540_v23, %v1541_v44  ;;  %vm7765_vm12 = vmmov %vm7754_vm0 }
 0x16d   : > { %v1575_v24 = vrot.slane %v1574_v7, 4  ;;  %v1567_v10 = vmax.f32 %v1565_v62, %v1566_v43  ;;  %v1559_v4 = vrot.slane %v1558_v6, 2  ;;  %v1591_v50 = vsel %vm7765_vm12, %v1510_v60, -inf  ;;  %vm7767_vm15 = vmmov %vm7754_vm0 }
 0x16e   : > { %v1551_v13 = vmax.f32 %v1549_v55, %v1550_v45  ;;  %v1584_v49 = vrot.slane %v1583_v61, 4  ;;  %v1534_v22 = vrot.slane %v1533_v28, 1  ;;  %v1543_v26 = vrot.slane %v1542_v35, 1  ;;  %vm7769_vm5 = vmmov %vm7754_vm0 }
 0x16f   : > { %v1576_v56 = vmax.f32 %v1574_v7, %v1575_v24  ;;  %v1568_v17 = vrot.slane %v1567_v10, 2  ;;  %v1560_v20 = vmax.f32 %v1558_v6, %v1559_v4  ;;  %v1592_v62 = vmax.f32 %v1590_v19, %v1591_v50  ;;  %vm7771_vm9 = vmmov %vm7754_vm0 }
 0x170   : > { %v1552_v2 = vrot.slane %v1551_v13, 1  ;;  %v1585_v33 = vmax.f32 %v1583_v61, %v1584_v49  ;;  %v5313_v43 = vmax.f32 %v1533_v28, %v1534_v22  ;;  %v5315_v40 = vmax.f32 %v1542_v35, %v1543_v26  ;;  %vm7773_vm1 = vmmov %vm7754_vm0 }
 0x171   : > { %v1577_v58 = vrot.slane %v1576_v56, 2  ;;  %v1569_v0 = vmax.f32 %v1567_v10, %v1568_v17  ;;  %v1561_v32 = vrot.slane %v1560_v20, 1  ;;  %v1593_v54 = vrot.slane %v1592_v62, 4  ;;  %vm7775_vm13 = vmmov %vm7754_vm0 }
 0x172   : > { %v5317_v7 = vmax.f32 %v1551_v13, %v1552_v2  ;;  %v1586_v55 = vrot.slane %v1585_v33, 2  ;;  %v1599_v44 = vsel %vm7767_vm15, %v7766_v29, -inf  ;;  %v7768_v6 = vsel %vm5191_vm6, %v4721_v12, -inf  ;;  %vm7778_vm10 = vmmov %vm7754_vm0 }
 0x173   : > { %v1578_v23 = vmax.f32 %v1576_v56, %v1577_v58  ;;  %v1570_v45 = vrot.slane %v1569_v0, 1  ;;  %v5319_v60 = vmax.f32 %v1560_v20, %v1561_v32  ;;  %v1600_v58 = vsel %vm7769_vm5, %v7768_v6, -inf  ;;  %vm7780_vm7 = vmmov %vm7754_vm0 }
 0x174   : > { %v1587_v10 = vmax.f32 %v1585_v33, %v1586_v55  ;;  %v1594_v61 = vmax.f32 %v1592_v62, %v1593_v54  ;;  %v1601_v19 = vmax.f32 %v1599_v44, %v1600_v58  ;;  %v7770_v35 = vsel %vm5186_vm8, %v4742_v14, -inf  ;;  %vm7782_vm12 = vmmov %vm7754_vm0 }
 0x175   : > { %v1579_v34 = vrot.slane %v1578_v23, 1  ;;  %v5331_v24 = vmax.f32 %v1569_v0, %v1570_v45  ;;  %v1608_v30 = vsel %vm7771_vm9, %v7770_v35, -inf  ;;  %v7772_v4 = vsel %vm5191_vm6, %v4745_v31, -inf  ;;  %vm7784_vm15 = vmmov %vm7754_vm0 }
 0x176   : > { %v1609_v12 = vsel %vm7773_vm1, %v7772_v4, -inf  ;;  %v7774_v33 = vsel %vm5186_vm8, %v4752_v38, -inf  ;;  %v1588_v13 = vrot.slane %v1587_v10, 1  ;;  %v1595_v17 = vrot.slane %v1594_v61, 2  ;;  %vm7786_vm5 = vmmov %vm7754_vm0 }
 0x177   : > { %v5333_v28 = vmax.f32 %v1578_v23, %v1579_v34  ;;  %v1617_v56 = vsel %vm7775_vm13, %v7774_v33, -inf  ;;  %v1602_v49 = vrot.slane %v1601_v19, 4  ;;  %v1610_v14 = vmax.f32 %v1608_v30, %v1609_v12  ;;  %vm7789_vm9 = vmmov %vm7754_vm0 }
 0x178   : > { %v7776_v50 = vsel %vm5191_vm6, %v4755_v1, -inf  ;;  %v7777_v22 = vsel %vm5186_vm8, %v4758_v8, -inf  ;;  %v7779_v26 = vsel %vm5191_vm6, %v4771_v5, -inf  ;;  %v7781_v2 = vsel %vm5186_vm8, %v4774_v39, -inf  ;;  %vm7791_vm1 = vmmov %vm7754_vm0 }
 0x179   : > { %v1618_v31 = vsel %vm7754_vm0, %v7776_v50, -inf  ;;  %v1626_v38 = vsel %vm7778_vm10, %v7777_v22, -inf  ;;  %v1627_v20 = vsel %vm7780_vm7, %v7779_v26, -inf  ;;  %v1635_v1 = vsel %vm7782_vm12, %v7781_v2, -inf  ;;  %vm7793_vm13 = vmmov %vm7754_vm0 }
 0x17a   : > { %v5370_v0 = vmax.f32 %v1587_v10, %v1588_v13  ;;  %v1596_v62 = vmax.f32 %v1594_v61, %v1595_v17  ;;  %v1603_v32 = vmax.f32 %v1601_v19, %v1602_v49  ;;  %v1611_v23 = vrot.slane %v1610_v14, 4 }
 0x17b   : > { %v1619_v8 = vmax.f32 %v1617_v56, %v1618_v31  ;;  %v1628_v45 = vmax.f32 %v1626_v38, %v1627_v20  ;;  %v7783_v55 = vsel %vm5191_vm6, %v7746_v42, -inf  ;;  %v7785_v54 = vsel %vm5186_vm8, %v7747_v11, -inf }
 0x17c   : > { %v1636_v5 = vsel %vm7784_vm15, %v7783_v55, -inf  ;;  %v1644_v39 = vsel %vm7786_vm5, %v7785_v54, -inf  ;;  %v1597_v34 = vrot.slane %v1596_v62, 1  ;;  %v1604_v29 = vrot.slane %v1603_v32, 2 }
 0x17d   : > { %v1612_v44 = vmax.f32 %v1610_v14, %v1611_v23  ;;  %v1637_v6 = vmax.f32 %v1635_v1, %v1636_v5  ;;  %v1620_v58 = vrot.slane %v1619_v8, 4  ;;  %v1629_v42 = vrot.slane %v1628_v45, 4 }
 0x17e   : > { %v7788_v10 = vsel %vm5191_vm6, %v7748_v63, -inf  ;;  %v7790_v61 = vsel %vm5186_vm8, %v7749_v57, -inf  ;;  %v5398_v35 = vmax.f32 %v1596_v62, %v1597_v34  ;;  %v1605_v30 = vmax.f32 %v1603_v32, %v1604_v29 }
 0x17f   : > { %v1645_v11 = vsel %vm7789_vm9, %v7788_v10, -inf  ;;  %v1653_v19 = vsel %vm7791_vm1, %v7790_v61, -inf  ;;  %v1613_v4 = vrot.slane %v1612_v44, 2  ;;  %v1638_v12 = vrot.slane %v1637_v6, 4 }
 0x180   : > { %v1621_v33 = vmax.f32 %v1619_v8, %v1620_v58  ;;  %v1630_v56 = vmax.f32 %v1628_v45, %v1629_v42  ;;  %v1646_v13 = vmax.f32 %v1644_v39, %v1645_v11  ;;  %v7792_v63 = vsel %vm5191_vm6, %v7750_v46, -inf }
 0x181   : > { %v1654_v17 = vsel %vm7793_vm13, %v7792_v63, -inf  ;;  %v1606_v49 = vrot.slane %v1605_v30, 1  ;;  %v1614_v57 = vmax.f32 %v1612_v44, %v1613_v4  ;;  %v1639_v14 = vmax.f32 %v1637_v6, %v1638_v12 }
 0x182   : > { %v1655_v50 = vmax.f32 %v1653_v19, %v1654_v17  ;;  %v1622_v31 = vrot.slane %v1621_v33, 2  ;;  %v1631_v22 = vrot.slane %v1630_v56, 2  ;;  %v1647_v38 = vrot.slane %v1646_v13, 4 }
 0x183   : > { %v7794_v26 = vsel %vm5186_vm8, %v4813_v52, -inf  ;;  %v1607_v20 = vmax.f32 %v1605_v30, %v1606_v49  ;;  %v1615_v2 = vrot.slane %v1614_v57, 1  ;;  %v1640_v1 = vrot.slane %v1639_v14, 2  ;;  %vm7796_vm8 = vmmov %vm7754_vm0 }
 0x184   : > { %v1662_v46 = vsel %vm7754_vm0, %v7794_v26, -inf  ;;  %v1656_v62 = vrot.slane %v1655_v50, 4  ;;  %v1623_v32 = vmax.f32 %v1621_v33, %v1622_v31  ;;  %v1632_v23 = vmax.f32 %v1630_v56, %v1631_v22 }
 0x185   : > { %v1648_v8 = vmax.f32 %v1646_v13, %v1647_v38  ;;  %v7795_v52 = vsel %vm5191_vm6, %v4877_v36, -inf  ;;  %v1616_v45 = vmax.f32 %v1614_v57, %v1615_v2  ;;  %v1641_v55 = vmax.f32 %v1639_v14, %v1640_v1 }
 0x186   : > { %v1663_v27 = vsel %vm7796_vm8, %v7795_v52, -inf  ;;  %v1657_v5 = vmax.f32 %v1655_v50, %v1656_v62  ;;  %v1624_v21 = vrot.slane %v1623_v32, 1  ;;  %v1633_v36 = vrot.slane %v1632_v23, 1 }
 0x187   : > { %v1664_v54 = vmax.f32 %v1662_v46, %v1663_v27  ;;  %v1649_v39 = vrot.slane %v1648_v8, 2  ;;  %vm7797_vm6 = vcmask 1041409   ;;  %v1642_v29 = vrot.slane %v1641_v55, 1 }
 0x188   : > { %v1687_v34 = vsel %vm7797_vm6, %v5315_v40, %v5313_v43  ;;  %v1658_v44 = vrot.slane %v1657_v5, 2  ;;  %vm7798_vm10 = vcmask 1042434   ;;  %v1625_v43 = vmax.f32 %v1623_v32, %v1624_v21  ;;  %vm7802_vm5 = vmmov %vm7797_vm6 }
 0x189   : > { %v1665_v6 = vrot.slane %v1664_v54, 4  ;;  %v1688_v58 = vsel %vm7798_vm10, %v5317_v7, %v1687_v34  ;;  %v1634_v40 = vmax.f32 %v1632_v23, %v1633_v36  ;;  %v1650_v42 = vmax.f32 %v1648_v8, %v1649_v39  ;;  %vm7804_vm1 = vmmov %vm7798_vm10 }
 0x18a   : > { %vm7799_vm7 = vcmask 1043459   ;;  %v1643_v7 = vmax.f32 %v1641_v55, %v1642_v29  ;;  %v1659_v11 = vmax.f32 %v1657_v5, %v1658_v44  ;;  %vm7800_vm12 = vcmask 1044484  }
 0x18b   : > { %v1689_v10 = vsel %vm7799_vm7, %v5319_v60, %v1688_v58  ;;  %v1666_v61 = vmax.f32 %v1664_v54, %v1665_v6  ;;  %v1651_v60 = vrot.slane %v1650_v42, 1  ;;  %vm7801_vm15 = vcmask 1045509   ;;  %vm7806_vm0 = vmmov %vm7799_vm7 }
 0x18c   : > { %v1690_v19 = vsel %vm7800_vm12, %v5331_v24, %v1689_v10  ;;  %v1694_v4 = vsel %vm7802_vm5, %v1616_v45, %v1607_v20  ;;  %v1660_v24 = vrot.slane %v1659_v11, 1  ;;  %vm7803_vm9 = vcmask 1046534   ;;  %vm7807_vm8 = vmmov %vm7800_vm12 }
 0x18d   : > { %v1691_v30 = vsel %vm7801_vm15, %v5333_v28, %v1690_v19  ;;  %v1667_v12 = vrot.slane %v1666_v61, 2  ;;  %v1695_v56 = vsel %vm7804_vm1, %v1625_v43, %v1694_v4  ;;  %v1652_v28 = vmax.f32 %v1650_v42, %v1651_v60  ;;  %vm7808_vm6 = vmmov %vm7801_vm15 }
 0x18e   : > { %v1692_v33 = vsel %vm7803_vm9, %v5370_v0, %v1691_v30  ;;  %vm7805_vm13 = vcmask 1047559   ;;  %v1696_v63 = vsel %vm7806_vm0, %v1634_v40, %v1695_v56  ;;  %v1661_v0 = vmax.f32 %v1659_v11, %v1660_v24  ;;  %vm7809_vm10 = vmmov %vm7803_vm9  ;;  %v7828_v30 = vld [vmem:[#allocation24_spill] sm:$0xff] }
 0x18f   : > { %v1693_v13 = vsel %vm7805_vm13, %v5398_v35, %v1692_v33  ;;  %v1668_v17 = vmax.f32 %v1666_v61, %v1667_v12  ;;  %v1697_v49 = vsel %vm7807_vm8, %v1643_v7, %v1696_v63  ;;  %v1716_v14 = vstv %s5432_s30  ;;  %s6030_s30 = scalar_select %p2143_p2, 1, 0 }
 0x190   : > { %v1703_v57 = vsel %vm7546_vm2, %v1693_v13, -inf  ;;  %v1698_v35 = vsel %vm7808_vm6, %v1652_v28, %v1697_v49  ;;  %v1719_v50 = vsel %vm7548_vm14, %v1693_v13, -inf  ;;  %v1735_v31 = vsel %vm7549_vm3, %v1693_v13, -inf }
 0x191   : > { %v1669_v22 = vrot.slane %v1668_v17, 1  ;;  %v1732_v38 = vstv %s5449_s5  ;;  %v1748_v26 = vstv %s5458_s0  ;;  %v1764_v46 = vstv %s5478_s7  ;;  %s3115_s5 = sadd.s32 768, %s3185_s17 }
 0x192   : > { %v1699_v20 = vsel %vm7809_vm10, %v1661_v0, %v1698_v35  ;;  %vm7810_vm7 = vcmask 31744   ;;  %v1751_v1 = vsel %vm7552_vm11, %v1693_v13, -inf  ;;  %v1767_v62 = vsel %vm3969_vm4, %v1693_v13, -inf  ;;  %s6084_s0 = scalar_select %p2175_p6, 1, 0 }
 0x193   : > { %v1705_v2 = vsel %vm7810_vm7, %v1703_v57, -inf  ;;  %v1670_v32 = vmax.f32 %v1668_v17, %v1669_v22  ;;  %vm7811_vm12 = vmmov %vm7810_vm7  ;;  %v1780_v52 = vstv %s5501_s4  ;;  %vm7815_vm1 = vnez %v7411_v18  ;;  %v5651_v17 = vld [vmem:[%s3256_s26 + $0x30] sm:$0xff]  ;;  %s2206_s7 = sadd.s32 %s3115_s5, %s3189_s19 }
 0x194   : > { %v1721_v23 = vsel %vm7811_vm12, %v1719_v50, -inf  ;;  %vm7812_vm15 = vmmov %vm7810_vm7  ;;  %v1783_v55 = vsel %vm7815_vm1, %v1693_v13, -inf  ;;  %v1796_v5 = vstv %s5514_s6  ;;  %vm7817_vm8 = vnez %v7430_v41  ;;  %7862 = vst [vmem:[#allocation13_spill] sm:$0xff] %v5651_v17  ;;  %s6113_s4 = sld [smem:[#allocation3 + %s2206_s7]]  ;;  %s2210_s6 = sadd.s32 %s3117_s28, %s3189_s19 }
 0x195   : > { %v1737_v8 = vsel %vm7812_vm15, %v1735_v31, -inf  ;;  %vm7813_vm5 = vmmov %vm7810_vm7  ;;  %v1700_v54 = vsel %vm7805_vm13, %v1670_v32, %v1699_v20  ;;  %v1799_v36 = vsel %vm7817_vm8, %v1693_v13, -inf  ;;  %v1812_v39 = vstv %s5524_s16  ;;  %v5644_v13 = vld [vmem:[%s3256_s26 + $0x20] sm:$0xff]  ;;  %s6125_s16 = scalar_select %p2191_p7, 1, 0 }
 0x196   : > { %v1753_v27 = vsel %vm7813_vm5, %v1751_v1, -inf  ;;  %vm7814_vm9 = vmmov %vm7813_vm5  ;;  %vm7818_vm6 = vnez %v7372_v47  ;;  %vm7819_vm10 = vnez %v7382_v3  ;;  %vm7820_vm7 = vnez %v7396_v16  ;;  %v7841_v1 = vld [vmem:[#allocation5_spill] sm:$0xff]  ;;  %7859 = vst [vmem:[#allocation10_spill] sm:$0xff] %v5644_v13  ;;  %s3121_s7 = sadd.s32 1792, %s3185_s17 }
 0x197   : > { %v1769_v45 = vsel %vm7814_vm9, %v1767_v62, -inf  ;;  %vm7816_vm0 = vmmov %vm7813_vm5  ;;  %v1704_v34 = vsel %vm7818_vm6, %v1700_v54, -inf  ;;  %v1720_v29 = vsel %vm7819_vm10, %v1700_v54, -inf  ;;  %v1736_v44 = vsel %vm7820_vm7, %v1700_v54, -inf }
 0x198   : > { %v1785_v21 = vsel %vm7816_vm0, %v1783_v55, -inf  ;;  %vm7821_vm12 = vnez %v7417_v15  ;;  %vm7822_vm15 = vmmov %vm7816_vm0  ;;  %vm7827_vm8 = vnez %v7428_v25 }
 0x199   : > { %v1752_v6 = vsel %vm7821_vm12, %v1700_v54, -inf  ;;  %v1706_v58 = vsel %vm7822_vm15, %v1704_v34, -inf  ;;  %vm7823_vm5 = vmmov %vm7816_vm0  ;;  %v1784_v60 = vsel %vm7827_vm8, %v1700_v54, -inf  ;;  %vm7829_vm12 = vnez %v7828_v30  ;;  %v5670_v34 = vld [vmem:[%s3256_s26 + $0x50] sm:$0xff] }
 0x19a   : > { %v1722_v43 = vsel %vm7823_vm5, %v1720_v29, -inf  ;;  %vm7824_vm9 = vmmov %vm7816_vm0  ;;  %v1707_v10 = vmax.f32 %v1705_v2, %v1706_v58  ;;  %v1800_v4 = vsel %vm7829_vm12, %v1700_v54, -inf  ;;  %vm5582_vm12 = vcmp.eq.s32.totalorder %v1764_v46, 1  ;;  %v5647_v46 = vld [vmem:[%s3256_s26 + $0x28] sm:$0xff]  ;;  %7869 = vst [vmem:[#allocation17_spill] sm:$0xff] %v5670_v34 }
 0x19b   : > { %v1738_v40 = vsel %vm7824_vm9, %v1736_v44, -inf  ;;  %vm7825_vm13 = vmmov %vm7816_vm0  ;;  %v1723_v7 = vmax.f32 %v1721_v23, %v1722_v43  ;;  %vm7826_vm0 = vnez %v7422_v48  ;;  %vm5574_vm9 = vcmp.eq.s32.totalorder %v1732_v38, 1  ;;  %7860 = vst [vmem:[#allocation12_spill] sm:$0xff] %v5647_v46  ;;  %v5732_v58 = vld [vmem:[%s3256_s26 + $0xa8] sm:$0xff] }
 0x19c   : > { %v1754_v42 = vsel %vm7825_vm13, %v1752_v6, -inf  ;;  %v1739_v11 = vmax.f32 %v1737_v8, %v1738_v40  ;;  %v1768_v19 = vsel %vm7826_vm0, %v1700_v54, -inf  ;;  %vm7830_vm15 = vmmov %vm7823_vm5  ;;  %v1708_v12 = vrot.slane %v1707_v10, 4 }
 0x19d   : > { %v1755_v61 = vmax.f32 %v1753_v27, %v1754_v42  ;;  %v1801_v24 = vsel %vm7830_vm15, %v1799_v36, -inf  ;;  %v1724_v33 = vrot.slane %v1723_v7, 4  ;;  %vm5570_vm5 = vcmp.eq.s32.totalorder %v1716_v14, 1  ;;  %vm7839_vm8 = vmmov %vm7830_vm15  ;;  %v7844_v36 = vld [vmem:[#allocation6_spill] sm:$0xff] }
 0x19e   : > { %v1740_v56 = vrot.slane %v1739_v11, 4  ;;  %vm5578_vm13 = vcmp.eq.s32.totalorder %v1748_v26, 1  ;;  %v1770_v49 = vsel %vm7830_vm15, %v1768_v19, -inf  ;;  %v1786_v57 = vsel %vm7839_vm8, %v1784_v60, -inf  ;;  %vm7840_vm0 = vmmov %vm7839_vm8 }
 0x19f   : > { %v1756_v28 = vrot.slane %v1755_v61, 4  ;;  %v1802_v35 = vsel %vm7840_vm0, %v1800_v4, -inf  ;;  %v1832_v14 = vstv %s5535_s24  ;;  %v1709_v50 = vmax.f32 %v1707_v10, %v1708_v12  ;;  %s6131_s24 = sld [smem:[#allocation3 + %s2210_s6]] }
 0x1a0   : > { %v1725_v31 = vmax.f32 %v1723_v7, %v1724_v33  ;;  %v1741_v22 = vmax.f32 %v1739_v11, %v1740_v56  ;;  %v1771_v20 = vmax.f32 %v1769_v45, %v1770_v49  ;;  %v1787_v26 = vmax.f32 %v1785_v21, %v1786_v57  ;;  %v5611_v56 = vld [vmem:[%s3256_s26] sm:$0xff] }
 0x1a1   : > { %v1757_v38 = vmax.f32 %v1755_v61, %v1756_v28  ;;  %v1803_v2 = vmax.f32 %v1801_v24, %v1802_v35  ;;  %vm5591_vm7 = vcmp.ge.s32.totalorder %v7841_v1, %v1832_v14  ;;  %v1710_v62 = vrot.slane %v1709_v50, 2  ;;  %7851 = vst [vmem:[#allocation7_spill] sm:$0xff] %v5611_v56  ;;  %v5614_v28 = vld [vmem:[%s3256_s26 + $0x8] sm:$0xff] }
 0x1a2   : > { %v1726_v32 = vrot.slane %v1725_v31, 2  ;;  %v1742_v23 = vrot.slane %v1741_v22, 2  ;;  %v1772_v27 = vrot.slane %v1771_v20, 4  ;;  %v1788_v55 = vrot.slane %v1787_v26, 4  ;;  %7852 = vst [vmem:[#allocation9_spill] sm:$0xff] %v5614_v28 }
 0x1a3   : > { %v1758_v8 = vrot.slane %v1757_v38, 2  ;;  %v1804_v54 = vrot.slane %v1803_v2, 4  ;;  %vm5596_vm8 = vcmp.ge.s32.totalorder %v7844_v36, %v1832_v14  ;;  %v1711_v45 = vmax.f32 %v1709_v50, %v1710_v62  ;;  %v5624_v50 = vld [vmem:[%s3256_s26 + $0x10] sm:$0xff] }
 0x1a4   : > { %v1727_v21 = vmax.f32 %v1725_v31, %v1726_v32  ;;  %v1743_v29 = vmax.f32 %v1741_v22, %v1742_v23  ;;  %vm5600_vm0 = vcmp.eq.s32.totalorder %v1780_v52, 1  ;;  %vm5604_vm15 = vcmp.eq.s32.totalorder %v1796_v5, 1  ;;  %7855 = vst [vmem:[#allocation11_spill] sm:$0xff] %v5624_v50  ;;  %v5627_v31 = vld [vmem:[%s3256_s26 + $0x18] sm:$0xff] }
 0x1a5   : > { %v1759_v44 = vmax.f32 %v1757_v38, %v1758_v8  ;;  %v1773_v43 = vmax.f32 %v1771_v20, %v1772_v27  ;;  %v1789_v40 = vmax.f32 %v1787_v26, %v1788_v55  ;;  %v1805_v42 = vmax.f32 %v1803_v2, %v1804_v54  ;;  %7856 = vst [vmem:[#allocation8_spill] sm:$0xff] %v5627_v31  ;;  %v5654_v23 = vld [vmem:[%s3256_s26 + $0x38] sm:$0xff]  ;;  %v5657_v8 = vld [vmem:[%s3256_s26 + $0x40] sm:$0xff]  ;;  %v5667_v54 = vld [vmem:[%s3256_s26 + $0x48] sm:$0xff]  ;;  %p6361_p11 = scmp.le.s32.totalorder %s6131_s24, %s6113_s4 }
 0x1a6   : > { %v1835_v10 = vstv %s5568_s13  ;;  %v1712_v7 = vrot.slane %v1711_v45, 1  ;;  %v1728_v11 = vrot.slane %v1727_v21, 1  ;;  %v1744_v61 = vrot.slane %v1743_v29, 1  ;;  %7863 = vst [vmem:[#allocation14_spill] sm:$0xff] %v5654_v23  ;;  %7864 = vst [vmem:[#allocation15_spill] sm:$0xff] %v5657_v8  ;;  %v5754_v27 = vld [vmem:[%s3256_s26 + $0xc8] sm:$0xff] }
 0x1a7   : > { %v1760_v19 = vrot.slane %v1759_v44, 1  ;;  %v1774_v60 = vrot.slane %v1773_v43, 2  ;;  %v1790_v52 = vrot.slane %v1789_v40, 2  ;;  %v1806_v4 = vrot.slane %v1805_v42, 2  ;;  %7868 = vst [vmem:[#allocation16_spill] sm:$0xff] %v5667_v54  ;;  %7878 = vst [vmem:[#allocation23_spill] sm:$0xff] %v5754_v27  ;;  %p2476_p0 = por %p6361_p11, %p3676_p9  ;;  %p2492_p1 = por %p6361_p11, %p3703_p10 }
 0x1a8   : > { %vm1836_vm10 = vcmp.lt.s32.totalorder %v7841_v1, %v1835_v10  ;;  %v1713_v5 = vmax.f32 %v1711_v45, %v1712_v7  ;;  %v1729_v24 = vmax.f32 %v1727_v21, %v1728_v11  ;;  %v1745_v12 = vmax.f32 %v1743_v29, %v1744_v61  ;;  %v5673_v45 = vld [vmem:[%s3256_s26 + $0x58] sm:$0xff]  ;;  %v5689_v7 = vld [vmem:[%s3256_s26 + $0x70] sm:$0xff]  ;;  %v5695_v61 = vld [vmem:[%s3256_s26 + $0x80] sm:$0xff]  ;;  %p2508_p2 = por %p6361_p11, %p3751_p12  ;;  %p2524_p4 = por %p6361_p11, %p3771_p13 }
 0x1a9   : > { %v1761_v33 = vmax.f32 %v1759_v44, %v1760_v19  ;;  %v1775_v49 = vmax.f32 %v1773_v43, %v1774_v60  ;;  %v1791_v57 = vmax.f32 %v1789_v40, %v1790_v52  ;;  %v1807_v35 = vmax.f32 %v1805_v42, %v1806_v4  ;;  %vm5619_vm1 = vmand %vm5591_vm7, %vm1836_vm10  ;;  %7870 = vst [vmem:[#allocation18_spill] sm:$0xff] %v5673_v45  ;;  %v5683_v42 = vld [vmem:[%s3256_s26 + $0x60] sm:$0xff]  ;;  %v5692_v11 = vld [vmem:[%s3256_s26 + $0x78] sm:$0xff]  ;;  %s6409_s29 = scalar_select %p2476_p0, 1, 0 }
 0x1aa   : > { %vm1837_vm6 = vcmp.lt.s32.totalorder %v7844_v36, %v1835_v10  ;;  %v1718_v22 = vsel %vm5570_vm5, 0.0, %v1713_v5  ;;  %v1734_v38 = vsel %vm5574_vm9, 0.0, %v1729_v24  ;;  %v1750_v20 = vsel %vm5578_vm13, 0.0, %v1745_v12  ;;  %7872 = vst [vmem:[#allocation19_spill] sm:$0xff] %v5683_v42  ;;  %v5686_v10 = vld [vmem:[%s3256_s26 + $0x68] sm:$0xff]  ;;  %7874 = vst [vmem:[#allocation21_spill] sm:$0xff] %v5689_v7  ;;  %p2540_p6 = por %p6361_p11, %p3858_p3  ;;  %p2556_p7 = por %p6361_p11, %p3986_p5 }
 0x1ab   : > { %v1766_v26 = vsel %vm5582_vm12, 0.0, %v1761_v33  ;;  %vm5639_vm10 = vmand %vm5596_vm8, %vm1837_vm6  ;;  %v1776_v63 = vrot.slane %v1775_v49, 1  ;;  %v1792_v62 = vrot.slane %v1791_v57, 1  ;;  %v1808_v32 = vrot.slane %v1807_v35, 1  ;;  %7873 = vst [vmem:[#allocation20_spill] sm:$0xff] %v5686_v10  ;;  %v5698_v19 = vld [vmem:[%s3256_s26 + $0x88] sm:$0xff]  ;;  %p2572_p0 = por %p6361_p11, %p4090_p8 }
 0x1ac   : > { %vm7861_vm7 = vcmask 1040384   ;;  %vm5661_vm6 = vcmp.eq.s32.totalorder %v1812_v39, 1  ;;  %vm7867_vm12 = vcmask 1041408   ;;  %v1876_v21 = vsel %vm5619_vm1, %v5611_v56, -inf  ;;  %7875 = vst [vmem:[#allocation22_spill] sm:$0xff] %v5692_v11  ;;  %s3119_s13 = sadd.s32 896, %s3185_s17  ;;  %s2591_s17 = sadd.s32 %s3121_s7, %s3189_s19 }
 0x1ad   : > { %v1815_v0 = vsel %vm7861_vm7, %v1718_v22, %v1734_v38  ;;  %v1877_v39 = vsel %vm5639_vm10, %v5614_v28, -inf  ;;  %v1777_v29 = vmax.f32 %v1775_v49, %v1776_v63  ;;  %v1793_v44 = vmax.f32 %v1791_v57, %v1792_v62  ;;  %v5719_v49 = vld [vmem:[%s3256_s26 + $0x90] sm:$0xff]  ;;  %v5722_v57 = vld [vmem:[%s3256_s26 + $0x98] sm:$0xff]  ;;  %v5729_v22 = vld [vmem:[%s3256_s26 + $0xa0] sm:$0xff]  ;;  %s6426_s11 = scalar_select %p2492_p1, 1, 0 }
 0x1ae   : > { %v1816_v55 = vsel %vm7867_vm12, %v1815_v0, %v1750_v20  ;;  %v1809_v43 = vmax.f32 %v1807_v35, %v1808_v32  ;;  %vm7871_vm5 = vcmask 1042432   ;;  %v1878_v60 = vsel %vm5619_vm1, %v5624_v50, -inf  ;;  %v5735_v38 = vld [vmem:[%s3256_s26 + $0xb0] sm:$0xff]  ;;  %v5748_v32 = vld [vmem:[%s3256_s26 + $0xb8] sm:$0xff]  ;;  %v5751_v0 = vld [vmem:[%s3256_s26 + $0xc0] sm:$0xff] }
 0x1af   : > { %v1817_v40 = vsel %vm7871_vm5, %v1816_v55, %v1766_v26  ;;  %v1879_v52 = vsel %vm5639_vm10, %v5627_v31, -inf  ;;  %v1880_v4 = vsel %vm5619_vm1, %v5644_v13, -inf  ;;  %v1881_v5 = vsel %vm5639_vm10, %v5647_v46, -inf  ;;  %s6501_s5 = scalar_select %p2572_p0, 1, 0 }
 0x1b0   : > { %v1782_v24 = vsel %vm5600_vm0, 0.0, %v1777_v29  ;;  %v1798_v12 = vsel %vm5604_vm15, 0.0, %v1793_v44  ;;  %v1814_v33 = vsel %vm5661_vm6, 0.0, %v1809_v43  ;;  %v1882_v35 = vsel %vm5619_vm1, %v5651_v17, -inf }
 0x1b1   : > { %vm7876_vm9 = vcmask 1043456   ;;  %v1883_v20 = vsel %vm5639_vm10, %v5654_v23, -inf  ;;  %v1884_v26 = vsel %vm5619_vm1, %v5657_v8, -inf  ;;  %v1885_v63 = vsel %vm5639_vm10, %v5667_v54, -inf }
 0x1b2   : > { %v1818_v6 = vsel %vm7876_vm9, %v1817_v40, %v1782_v24  ;;  %vm7877_vm13 = vcmask 1044480   ;;  %v1886_v55 = vsel %vm5619_vm1, %v5670_v34, -inf  ;;  %v1887_v29 = vsel %vm5639_vm10, %v5673_v45, -inf  ;;  %v5767_v40 = vld [vmem:[%s3256_s26 + $0xd0] sm:$0xff]  ;;  %v5770_v24 = vld [vmem:[%s3256_s26 + $0xd8] sm:$0xff] }
 0x1b3   : > { %v1819_v62 = vsel %vm7877_vm13, %v1818_v6, %v1798_v12  ;;  %v1888_v44 = vsel %vm5619_vm1, %v5683_v42, -inf  ;;  %vm7879_vm8 = vcmask 1045504   ;;  %7880 = vst [vmem:[#allocation25_spill] sm:$0xff] %v5767_v40  ;;  %7881 = vst [vmem:[#allocation26_spill] sm:$0xff] %v5770_v24  ;;  %v5773_v12 = vld [vmem:[%s3256_s26 + $0xe0] sm:$0xff]  ;;  %v1889_v6 = vsel %vm5639_vm10, %v5686_v10, -inf }
 0x1b4   : > { %v1820_v43 = vsel %vm7879_vm8, %v1819_v62, %v1814_v33  ;;  %7882 = vst [vmem:[#allocation27_spill] sm:$0xff] %v5773_v12  ;;  %v1890_v45 = vsel %vm5619_vm1, %v5689_v7, -inf  ;;  %v1891_v42 = vsel %vm5639_vm10, %v5692_v11, -inf  ;;  %vm7883_vm0 = vcmask 30720   ;;  %v5787_v33 = vld [vmem:[%s3256_s26 + $0xe8] sm:$0xff]  ;;  %v5790_v62 = vld [vmem:[%s3256_s26 + $0xf0] sm:$0xff] }
 0x1b5   : > { %3053 = vst.msk [vmem:[%s4209_s10 + $0x18] sm:$0x7f] %vm7883_vm0, %v1820_v43  ;;  %7884 = vst [vmem:[#allocation28_spill] sm:$0xff] %v5787_v33  ;;  %vm7885_vm15 = vcmask 31744  }
 0x1b6   : > { %v1908_v54 = vsel %vm7885_vm15, %v1876_v21, -inf  ;;  %vm7886_vm7 = vmmov %vm7885_vm15 }
 0x1b7   : > { %v1909_v34 = vsel %vm7886_vm7, %v1877_v39, -inf  ;;  %vm7887_vm6 = vmmov %vm7886_vm7 }
 0x1b8   : > { %v1917_v8 = vsel %vm7887_vm6, %v1878_v60, -inf  ;;  %vm7888_vm12 = vmmov %vm7887_vm6  ;;  %v1910_v17 = vmax.f32 %v1908_v54, %v1909_v34 }
 0x1b9   : > { %v1918_v10 = vsel %vm7888_vm12, %v1879_v52, -inf  ;;  %vm7889_vm5 = vmmov %vm7887_vm6 }
 0x1ba   : > { %v1926_v23 = vsel %vm7889_vm5, %v1880_v4, -inf  ;;  %v1919_v7 = vmax.f32 %v1917_v8, %v1918_v10  ;;  %vm7890_vm9 = vmmov %vm7889_vm5  ;;  %v1911_v39 = vrot.slane %v1910_v17, 4 }
 0x1bb   : > { %v1927_v46 = vsel %vm7890_vm9, %v1881_v5, -inf  ;;  %vm7891_vm13 = vmmov %vm7889_vm5 }
 0x1bc   : > { %v1935_v43 = vsel %vm7891_vm13, %v1882_v35, -inf  ;;  %v1928_v31 = vmax.f32 %v1926_v23, %v1927_v46  ;;  %vm7892_vm8 = vmmov %vm7889_vm5  ;;  %v1920_v13 = vrot.slane %v1919_v7, 4  ;;  %v1912_v34 = vmax.f32 %v1910_v17, %v1911_v39 }
 0x1bd   : > { %v1936_v28 = vsel %vm7892_vm8, %v1883_v20, -inf  ;;  %vm7893_vm0 = vmmov %vm7889_vm5 }
 0x1be   : > { %v1944_v11 = vsel %vm7893_vm0, %v1884_v26, -inf  ;;  %vm7894_vm15 = vmmov %vm7893_vm0  ;;  %v1937_v60 = vmax.f32 %v1935_v43, %v1936_v28  ;;  %v1929_v52 = vrot.slane %v1928_v31, 4  ;;  %v1921_v10 = vmax.f32 %v1919_v7, %v1920_v13 }
 0x1bf   : > { %v1945_v21 = vsel %vm7894_vm15, %v1885_v63, -inf  ;;  %vm7895_vm7 = vmmov %vm7893_vm0  ;;  %v1913_v28 = vrot.slane %v1912_v34, 2 }
 0x1c0   : > { %v1946_v50 = vmax.f32 %v1944_v11, %v1945_v21  ;;  %v1953_v4 = vsel %vm7895_vm7, %v1886_v55, -inf  ;;  %vm7896_vm6 = vmmov %vm7893_vm0  ;;  %v1938_v46 = vrot.slane %v1937_v60, 4  ;;  %v1930_v5 = vmax.f32 %v1928_v31, %v1929_v52  ;;  %v5854_v31 = vld [vmem:[%s3256_s26 + $0xf8] sm:$0xff] }
 0x1c1   : > { %v1954_v8 = vsel %vm7896_vm6, %v1887_v29, -inf  ;;  %vm7897_vm12 = vmmov %vm7893_vm0  ;;  %v1922_v11 = vrot.slane %v1921_v10, 2  ;;  %v1914_v17 = vmax.f32 %v1912_v34, %v1913_v28 }
 0x1c2   : > { %v1962_v54 = vsel %vm7897_vm12, %v1888_v44, -inf  ;;  %v1947_v23 = vrot.slane %v1946_v50, 4  ;;  %v1955_v35 = vmax.f32 %v1953_v4, %v1954_v8  ;;  %vm7898_vm5 = vmmov %vm7893_vm0  ;;  %v1939_v63 = vmax.f32 %v1937_v60, %v1938_v46 }
 0x1c3   : > { %v1963_v20 = vsel %vm7898_vm5, %v1889_v6, -inf  ;;  %vm7899_vm9 = vmmov %vm7893_vm0  ;;  %v1931_v55 = vrot.slane %v1930_v5, 2  ;;  %v1923_v13 = vmax.f32 %v1921_v10, %v1922_v11 }
 0x1c4   : > { %v1971_v26 = vsel %vm7899_vm9, %v1890_v45, -inf  ;;  %v1948_v43 = vmax.f32 %v1946_v50, %v1947_v23  ;;  %v1956_v21 = vrot.slane %v1955_v35, 4  ;;  %v1964_v29 = vmax.f32 %v1962_v54, %v1963_v20  ;;  %vm7900_vm13 = vmmov %vm7893_vm0 }
 0x1c5   : > { %v1972_v44 = vsel %vm7900_vm13, %v1891_v42, -inf  ;;  %v1940_v7 = vrot.slane %v1939_v63, 2  ;;  %v1932_v52 = vmax.f32 %v1930_v5, %v1931_v55  ;;  %v1915_v45 = vrot.slane %v1914_v17, 1  ;;  %vm7902_vm8 = vmmov %vm7893_vm0 }
 0x1c6   : > { %v1949_v39 = vrot.slane %v1948_v43, 2  ;;  %v1957_v4 = vmax.f32 %v1955_v35, %v1956_v21  ;;  %v1965_v6 = vrot.slane %v1964_v29, 4  ;;  %v1973_v8 = vmax.f32 %v1971_v26, %v1972_v44  ;;  %vm7905_vm15 = vmmov %vm7893_vm0 }
 0x1c7   : > { %v1924_v56 = vrot.slane %v1923_v13, 1  ;;  %v1941_v36 = vmax.f32 %v1939_v63, %v1940_v7  ;;  %v1933_v50 = vrot.slane %v1932_v52, 1  ;;  %v5859_v34 = vmax.f32 %v1914_v17, %v1915_v45  ;;  %vm7907_vm7 = vmmov %vm7893_vm0 }
 0x1c8   : > { %v1950_v60 = vmax.f32 %v1948_v43, %v1949_v39  ;;  %v1958_v46 = vrot.slane %v1957_v4, 2  ;;  %v1966_v23 = vmax.f32 %v1964_v29, %v1965_v6  ;;  %v1974_v54 = vrot.slane %v1973_v8, 4  ;;  %vm7909_vm6 = vmmov %vm7893_vm0 }
 0x1c9   : > { %v5861_v10 = vmax.f32 %v1923_v13, %v1924_v56  ;;  %v1942_v5 = vrot.slane %v1941_v36, 1  ;;  %v5863_v11 = vmax.f32 %v1932_v52, %v1933_v50  ;;  %v7901_v43 = vsel %vm5619_vm1, %v5695_v61, -inf  ;;  %vm7911_vm12 = vmmov %vm7893_vm0 }
 0x1ca   : > { %v1951_v35 = vrot.slane %v1950_v60, 1  ;;  %v1959_v20 = vmax.f32 %v1957_v4, %v1958_v46  ;;  %v1967_v26 = vrot.slane %v1966_v23, 2  ;;  %v1975_v28 = vmax.f32 %v1973_v8, %v1974_v54  ;;  %vm7913_vm5 = vmmov %vm7893_vm0 }
 0x1cb   : > { %v5865_v63 = vmax.f32 %v1941_v36, %v1942_v5  ;;  %v1980_v55 = vsel %vm7902_vm8, %v7901_v43, -inf  ;;  %v7903_v56 = vsel %vm5639_vm10, %v5698_v19, -inf  ;;  %v7904_v36 = vsel %vm5619_vm1, %v5719_v49, -inf  ;;  %vm7915_vm9 = vmmov %vm7893_vm0 }
 0x1cc   : > { %v1981_v21 = vsel %vm7893_vm0, %v7903_v56, -inf  ;;  %v1960_v29 = vrot.slane %v1959_v20, 1  ;;  %v1968_v44 = vmax.f32 %v1966_v23, %v1967_v26  ;;  %v1976_v17 = vrot.slane %v1975_v28, 2  ;;  %vm7917_vm13 = vmmov %vm7893_vm0 }
 0x1cd   : > { %v1982_v13 = vmax.f32 %v1980_v55, %v1981_v21  ;;  %v1989_v7 = vsel %vm7905_vm15, %v7904_v36, -inf  ;;  %v7906_v39 = vsel %vm5639_vm10, %v5722_v57, -inf  ;;  %v7908_v4 = vsel %vm5619_vm1, %v5729_v22, -inf  ;;  %vm7919_vm8 = vmmov %vm7893_vm0 }
 0x1ce   : > { %v1990_v52 = vsel %vm7907_vm7, %v7906_v39, -inf  ;;  %v1998_v6 = vsel %vm7909_vm6, %v7908_v4, -inf  ;;  %v7910_v8 = vsel %vm5639_vm10, %v5732_v58, -inf  ;;  %v5897_v50 = vmax.f32 %v1950_v60, %v1951_v35  ;;  %vm7922_vm15 = vmmov %vm7893_vm0 }
 0x1cf   : > { %v1999_v45 = vsel %vm7911_vm12, %v7910_v8, -inf  ;;  %v1969_v46 = vrot.slane %v1968_v44, 1  ;;  %v1977_v23 = vmax.f32 %v1975_v28, %v1976_v17  ;;  %v1983_v54 = vrot.slane %v1982_v13, 4  ;;  %vm7924_vm7 = vmmov %vm7893_vm0 }
 0x1d0   : > { %v1991_v5 = vmax.f32 %v1989_v7, %v1990_v52  ;;  %v2000_v26 = vmax.f32 %v1998_v6, %v1999_v45  ;;  %v7912_v43 = vsel %vm5619_vm1, %v5735_v38, -inf  ;;  %v7914_v56 = vsel %vm5639_vm10, %v5748_v32, -inf  ;;  %vm7926_vm6 = vmmov %vm7893_vm0 }
 0x1d1   : > { %v2007_v55 = vsel %vm7913_vm5, %v7912_v43, -inf  ;;  %v2008_v21 = vsel %vm7915_vm9, %v7914_v56, -inf  ;;  %v5909_v36 = vmax.f32 %v1959_v20, %v1960_v29  ;;  %v5911_v60 = vmax.f32 %v1968_v44, %v1969_v46  ;;  %vm7929_vm12 = vmmov %vm7893_vm0 }
 0x1d2   : > { %v1984_v35 = vmax.f32 %v1982_v13, %v1983_v54  ;;  %v2009_v28 = vmax.f32 %v2007_v55, %v2008_v21  ;;  %v1992_v17 = vrot.slane %v1991_v5, 4  ;;  %v2001_v7 = vrot.slane %v2000_v26, 4  ;;  %vm7931_vm5 = vmmov %vm7893_vm0 }
 0x1d3   : > { %v7916_v39 = vsel %vm5619_vm1, %v5751_v0, -inf  ;;  %v7918_v4 = vsel %vm5639_vm10, %v5754_v27, -inf  ;;  %v1978_v20 = vrot.slane %v1977_v23, 1  ;;  %v7920_v46 = vsel %vm5619_vm1, %v5767_v40, -inf }
 0x1d4   : > { %v2016_v52 = vsel %vm7917_vm13, %v7916_v39, -inf  ;;  %v2017_v6 = vsel %vm7919_vm8, %v7918_v4, -inf  ;;  %v1985_v29 = vrot.slane %v1984_v35, 2  ;;  %v2010_v44 = vrot.slane %v2009_v28, 4 }
 0x1d5   : > { %v2018_v13 = vmax.f32 %v2016_v52, %v2017_v6  ;;  %v1993_v8 = vmax.f32 %v1991_v5, %v1992_v17  ;;  %v2002_v45 = vmax.f32 %v2000_v26, %v2001_v7  ;;  %v2025_v54 = vsel %vm7893_vm0, %v7920_v46, -inf }
 0x1d6   : > { %v7921_v43 = vsel %vm5639_vm10, %v5770_v24, -inf  ;;  %v1986_v56 = vmax.f32 %v1984_v35, %v1985_v29  ;;  %v2011_v21 = vmax.f32 %v2009_v28, %v2010_v44  ;;  %v7923_v5 = vsel %vm5619_vm1, %v5773_v12, -inf }
 0x1d7   : > { %v2026_v55 = vsel %vm7922_vm15, %v7921_v43, -inf  ;;  %v2019_v39 = vrot.slane %v2018_v13, 4  ;;  %v1994_v42 = vrot.slane %v1993_v8, 2  ;;  %v2003_v52 = vrot.slane %v2002_v45, 2 }
 0x1d8   : > { %v2027_v4 = vmax.f32 %v2025_v54, %v2026_v55  ;;  %v2034_v26 = vsel %vm7924_vm7, %v7923_v5, -inf  ;;  %v7925_v17 = vsel %vm5639_vm10, %v5787_v33, -inf  ;;  %v1987_v35 = vrot.slane %v1986_v56, 1 }
 0x1d9   : > { %v2035_v7 = vsel %vm7926_vm6, %v7925_v17, -inf  ;;  %v2012_v28 = vrot.slane %v2011_v21, 2  ;;  %v2020_v6 = vmax.f32 %v2018_v13, %v2019_v39  ;;  %v1995_v44 = vmax.f32 %v1993_v8, %v1994_v42 }
 0x1da   : > { %v2028_v29 = vrot.slane %v2027_v4, 4  ;;  %v2004_v46 = vmax.f32 %v2002_v45, %v2003_v52  ;;  %v2036_v54 = vmax.f32 %v2034_v26, %v2035_v7  ;;  %v7928_v43 = vsel %vm5619_vm1, %v5790_v62, -inf }
 0x1db   : > { %v2043_v55 = vsel %vm7929_vm12, %v7928_v43, -inf  ;;  %v1988_v5 = vmax.f32 %v1986_v56, %v1987_v35  ;;  %v2013_v17 = vmax.f32 %v2011_v21, %v2012_v28  ;;  %v2021_v33 = vrot.slane %v2020_v6, 2 }
 0x1dc   : > { %v2029_v12 = vmax.f32 %v2027_v4, %v2028_v29  ;;  %v1996_v24 = vrot.slane %v1995_v44, 1  ;;  %v2005_v40 = vrot.slane %v2004_v46, 1  ;;  %v2037_v27 = vrot.slane %v2036_v54, 4 }
 0x1dd   : > { %v7930_v42 = vsel %vm5639_vm10, %v5854_v31, -inf  ;;  %v2014_v8 = vrot.slane %v2013_v17, 1  ;;  %v2022_v45 = vmax.f32 %v2020_v6, %v2021_v33  ;;  %vm7932_vm1 = vcmask 1041409  }
 0x1de   : > { %v2044_v13 = vsel %vm7931_vm5, %v7930_v42, -inf  ;;  %v2030_v14 = vrot.slane %v2029_v12, 2  ;;  %v1997_v21 = vmax.f32 %v1995_v44, %v1996_v24  ;;  %v2006_v39 = vmax.f32 %v2004_v46, %v2005_v40  ;;  %vm7934_vm9 = vmmov %vm7932_vm1 }
 0x1df   : > { %v2045_v56 = vmax.f32 %v2043_v55, %v2044_v13  ;;  %v2038_v4 = vmax.f32 %v2036_v54, %v2037_v27  ;;  %v2068_v2 = vsel %vm7932_vm1, %v5861_v10, %v5859_v34  ;;  %v2015_v52 = vmax.f32 %v2013_v17, %v2014_v8 }
 0x1e0   : > { %v2023_v33 = vrot.slane %v2022_v45, 1  ;;  %v2031_v26 = vmax.f32 %v2029_v12, %v2030_v14  ;;  %v1979_v35 = vmax.f32 %v1977_v23, %v1978_v20  ;;  %vm7933_vm10 = vcmask 1042434  }
 0x1e1   : > { %v2046_v7 = vrot.slane %v2045_v56, 4  ;;  %v2039_v28 = vrot.slane %v2038_v4, 2  ;;  %v2069_v6 = vsel %vm7933_vm10, %v5863_v11, %v2068_v2  ;;  %v2075_v40 = vsel %vm7934_vm9, %v1997_v21, %v1988_v5  ;;  %vm7937_vm0 = vmmov %vm7933_vm10 }
 0x1e2   : > { %v2024_v27 = vmax.f32 %v2022_v45, %v2023_v33  ;;  %v2032_v24 = vrot.slane %v2031_v26, 1  ;;  %vm7935_vm13 = vcmask 1043459   ;;  %vm7936_vm8 = vcmask 1044484  }
 0x1e3   : > { %v2047_v12 = vmax.f32 %v2045_v56, %v2046_v7  ;;  %v2070_v34 = vsel %vm7935_vm13, %v5865_v63, %v2069_v6  ;;  %v2040_v10 = vmax.f32 %v2038_v4, %v2039_v28  ;;  %v2076_v23 = vsel %vm7937_vm0, %v2006_v39, %v2075_v40  ;;  %vm7939_vm7 = vmmov %vm7935_vm13 }
 0x1e4   : > { %v2071_v11 = vsel %vm7936_vm8, %v5897_v50, %v2070_v34  ;;  %v2033_v20 = vmax.f32 %v2031_v26, %v2032_v24  ;;  %vm7938_vm15 = vcmask 1045509   ;;  %v2077_v44 = vsel %vm7939_vm7, %v2015_v52, %v2076_v23  ;;  %vm7941_vm12 = vmmov %vm7936_vm8 }
 0x1e5   : > { %v2048_v29 = vrot.slane %v2047_v12, 2  ;;  %v2072_v63 = vsel %vm7938_vm15, %v5909_v36, %v2071_v11  ;;  %v2041_v50 = vrot.slane %v2040_v10, 1  ;;  %vm7940_vm6 = vcmask 1046534   ;;  %vm7943_vm1 = vmmov %vm7938_vm15 }
 0x1e6   : > { %v2073_v46 = vsel %vm7940_vm6, %v5911_v60, %v2072_v63  ;;  %v2078_v54 = vsel %vm7941_vm12, %v2024_v27, %v2077_v44  ;;  %vm7942_vm5 = vcmask 1047559   ;;  %vm7944_vm10 = vmmov %vm7940_vm6  ;;  %v2097_v45 = vstv %s5984_s21  ;;  %s6435_s21 = scalar_select %p2508_p2, 1, 0 }
 0x1e7   : > { %v2049_v36 = vmax.f32 %v2047_v12, %v2048_v29  ;;  %v2074_v43 = vsel %vm7942_vm5, %v1979_v35, %v2073_v46  ;;  %v2079_v55 = vsel %vm7943_vm1, %v2033_v20, %v2078_v54  ;;  %v2042_v60 = vmax.f32 %v2040_v10, %v2041_v50  ;;  %vm7949_vm15 = vmmov %vm7942_vm5 }
 0x1e8   : > { %v2084_v5 = vsel %vm7546_vm2, %v2074_v43, -inf  ;;  %v2100_v17 = vsel %vm7548_vm14, %v2074_v43, -inf  ;;  %v2116_v42 = vsel %vm7549_vm3, %v2074_v43, -inf  ;;  %v2113_v14 = vstv %s6008_s23  ;;  %s6455_s23 = scalar_select %p2524_p4, 1, 0 }
 0x1e9   : > { %v2050_v13 = vrot.slane %v2049_v36, 1  ;;  %v2080_v8 = vsel %vm7944_vm10, %v2042_v60, %v2079_v55  ;;  %v2132_v56 = vsel %vm7552_vm11, %v2074_v43, -inf  ;;  %vm7945_vm9 = vcmask 31744  }
 0x1ea   : > { %v2086_v39 = vsel %vm7945_vm9, %v2084_v5, -inf  ;;  %vm7946_vm13 = vmmov %vm7945_vm9  ;;  %v2129_v52 = vstv %s6017_s15  ;;  %v2145_v26 = vstv %s6030_s30  ;;  %v2148_v7 = vsel %vm3969_vm4, %v2074_v43, -inf  ;;  %s2587_s15 = sadd.s32 %s3119_s13, %s3189_s19  ;;  %s6545_s19 = sld [smem:[#allocation3 + %s2591_s17]] }
 0x1eb   : > { %v2051_v21 = vmax.f32 %v2049_v36, %v2050_v13  ;;  %v2102_v4 = vsel %vm7946_vm13, %v2100_v17, -inf  ;;  %vm7947_vm8 = vmmov %vm7945_vm9  ;;  %v2161_v6 = vstv %s6037_s3  ;;  %vm7951_vm6 = vnez %v7411_v18  ;;  %v7982_v13 = vld [vmem:[#allocation6_spill] sm:$0xff]  ;;  %s6478_s30 = scalar_select %p2540_p6, 1, 0 }
 0x1ec   : > { %v2118_v2 = vsel %vm7947_vm8, %v2116_v42, -inf  ;;  %vm7948_vm0 = vmmov %vm7947_vm8  ;;  %v2164_v40 = vsel %vm7951_vm6, %v2074_v43, -inf  ;;  %vm7952_vm12 = vnez %v7372_v47  ;;  %vm7953_vm5 = vnez %v7382_v3  ;;  %s6491_s3 = scalar_select %p2556_p7, 1, 0 }
 0x1ed   : > { %v2134_v33 = vsel %vm7948_vm0, %v2132_v56, -inf  ;;  %v2081_v35 = vsel %vm7949_vm15, %v2051_v21, %v2080_v8  ;;  %vm7950_vm7 = vmmov %vm7948_vm0  ;;  %vm7954_vm1 = vnez %v7396_v16  ;;  %vm7955_vm10 = vnez %v7417_v15 }
 0x1ee   : > { %v2150_v28 = vsel %vm7950_vm7, %v2148_v7, -inf  ;;  %v2085_v27 = vsel %vm7952_vm12, %v2081_v35, -inf  ;;  %v2101_v24 = vsel %vm7953_vm5, %v2081_v35, -inf  ;;  %v2117_v12 = vsel %vm7954_vm1, %v2081_v35, -inf  ;;  %vm7956_vm9 = vmmov %vm7948_vm0 }
 0x1ef   : > { %v2133_v34 = vsel %vm7955_vm10, %v2081_v35, -inf  ;;  %v2087_v10 = vsel %vm7956_vm9, %v2085_v27, -inf  ;;  %vm7957_vm13 = vmmov %vm7948_vm0  ;;  %vm7959_vm15 = vnez %v7422_v48  ;;  %vm7960_vm7 = vnez %v7428_v25 }
 0x1f0   : > { %v2103_v11 = vsel %vm7957_vm13, %v2101_v24, -inf  ;;  %vm7958_vm8 = vmmov %vm7948_vm0  ;;  %v2135_v20 = vsel %vm7948_vm0, %v2133_v34, -inf  ;;  %v2088_v29 = vmax.f32 %v2086_v39, %v2087_v10  ;;  %v2149_v46 = vsel %vm7959_vm15, %v2081_v35, -inf }
 0x1f1   : > { %v2119_v23 = vsel %vm7958_vm8, %v2117_v12, -inf  ;;  %v2104_v63 = vmax.f32 %v2102_v4, %v2103_v11  ;;  %v2136_v50 = vmax.f32 %v2134_v33, %v2135_v20  ;;  %v2165_v54 = vsel %vm7960_vm7, %v2081_v35, -inf  ;;  %vm7961_vm9 = vmmov %vm7948_vm0 }
 0x1f2   : > { %v2120_v44 = vmax.f32 %v2118_v2, %v2119_v23  ;;  %v2166_v36 = vsel %vm7961_vm9, %v2164_v40, -inf  ;;  %vm7962_vm13 = vnez %v7430_v41  ;;  %v2089_v60 = vrot.slane %v2088_v29, 4 }
 0x1f3   : > { %v2180_v55 = vsel %vm7962_vm13, %v2074_v43, -inf  ;;  %v2105_v5 = vrot.slane %v2104_v63, 4  ;;  %v2137_v42 = vrot.slane %v2136_v50, 4  ;;  %vm6090_vm8 = vcmp.eq.s32.totalorder %v2097_v45, 1 }
 0x1f4   : > { %v2121_v17 = vrot.slane %v2120_v44, 4  ;;  %vm6094_vm0 = vcmp.eq.s32.totalorder %v2113_v14, 1  ;;  %vm6098_vm9 = vcmp.eq.s32.totalorder %v2129_v52, 1  ;;  %vm7969_vm7 = vcmask 31744  }
 0x1f5   : > { %v2151_v43 = vsel %vm7969_vm7, %v2149_v46, -inf  ;;  %vm7970_vm15 = vmmov %vm7969_vm7  ;;  %vm7971_vm10 = vnez %v7828_v30  ;;  %v2090_v14 = vmax.f32 %v2088_v29, %v2089_v60  ;;  %v2106_v4 = vmax.f32 %v2104_v63, %v2105_v5 }
 0x1f6   : > { %v2167_v21 = vsel %vm7970_vm15, %v2165_v54, -inf  ;;  %v2181_v39 = vsel %vm7971_vm10, %v2081_v35, -inf  ;;  %vm7972_vm1 = vmmov %vm7969_vm7  ;;  %v2122_v2 = vmax.f32 %v2120_v44, %v2121_v17  ;;  %v2138_v52 = vmax.f32 %v2136_v50, %v2137_v42 }
 0x1f7   : > { %v2182_v45 = vsel %vm7972_vm1, %v2180_v55, -inf  ;;  %v2152_v33 = vmax.f32 %v2150_v28, %v2151_v43  ;;  %v2168_v7 = vmax.f32 %v2166_v36, %v2167_v21  ;;  %v2177_v40 = vstv %s6084_s0  ;;  %vm7973_vm7 = vmmov %vm7972_vm1  ;;  %s6512_s0 = sld [smem:[#allocation3 + %s2587_s15]] }
 0x1f8   : > { %v2183_v27 = vsel %vm7973_vm7, %v2181_v39, -inf  ;;  %v2091_v35 = vrot.slane %v2090_v14, 2  ;;  %v2107_v24 = vrot.slane %v2106_v4, 2  ;;  %v2123_v12 = vrot.slane %v2122_v2, 2 }
 0x1f9   : > { %v2139_v34 = vrot.slane %v2138_v52, 2  ;;  %vm6116_vm1 = vcmp.eq.s32.totalorder %v2145_v26, 1  ;;  %v2153_v11 = vrot.slane %v2152_v33, 4  ;;  %v2169_v23 = vrot.slane %v2168_v7, 4 }
 0x1fa   : > { %v2184_v20 = vmax.f32 %v2182_v45, %v2183_v27  ;;  %v2092_v28 = vmax.f32 %v2090_v14, %v2091_v35  ;;  %v2108_v29 = vmax.f32 %v2106_v4, %v2107_v24  ;;  %v2124_v63 = vmax.f32 %v2122_v2, %v2123_v12 }
 0x1fb   : > { %v2140_v44 = vmax.f32 %v2138_v52, %v2139_v34  ;;  %vm6127_vm15 = vcmp.eq.s32.totalorder %v2161_v6, 1  ;;  %v2154_v26 = vmax.f32 %v2152_v33, %v2153_v11  ;;  %v2170_v46 = vmax.f32 %v2168_v7, %v2169_v23 }
 0x1fc   : > { %vm6133_vm7 = vcmp.eq.s32.totalorder %v2177_v40, 1  ;;  %v2185_v36 = vrot.slane %v2184_v20, 4  ;;  %v2093_v55 = vrot.slane %v2092_v28, 1  ;;  %v2109_v60 = vrot.slane %v2108_v29, 1 }
 0x1fd   : > { %v2125_v5 = vrot.slane %v2124_v63, 1  ;;  %v2141_v17 = vrot.slane %v2140_v44, 1  ;;  %v2155_v42 = vrot.slane %v2154_v26, 2  ;;  %v2171_v43 = vrot.slane %v2170_v46, 2  ;;  %p6927_p11 = scmp.le.s32.totalorder %s6545_s19, %s6512_s0 }
 0x1fe   : > { %v2186_v6 = vmax.f32 %v2184_v20, %v2185_v36  ;;  %v2193_v21 = vstv %s6125_s16  ;;  %v2094_v39 = vmax.f32 %v2092_v28, %v2093_v55  ;;  %v2110_v45 = vmax.f32 %v2108_v29, %v2109_v60 }
 0x1ff   : > { %v2126_v14 = vmax.f32 %v2124_v63, %v2125_v5  ;;  %v2142_v4 = vmax.f32 %v2140_v44, %v2141_v17  ;;  %v2156_v2 = vmax.f32 %v2154_v26, %v2155_v42  ;;  %v2172_v52 = vmax.f32 %v2170_v46, %v2171_v43  ;;  %v7991_v5 = vld [vmem:[#allocation7_spill] sm:$0xff]  ;;  %v7993_v42 = vld [vmem:[#allocation10_spill] sm:$0xff]  ;;  %p2857_p1 = por %p6927_p11, %p3676_p9  ;;  %p2873_p2 = por %p6927_p11, %p3703_p10 }
 0x200   : > { %v2187_v33 = vrot.slane %v2186_v6, 2  ;;  %v2213_v7 = vstv %s6113_s4  ;;  %v2099_v40 = vsel %vm6090_vm8, 0.0, %v2094_v39  ;;  %v2115_v27 = vsel %vm6094_vm0, 0.0, %v2110_v45  ;;  %v7992_v17 = vld [vmem:[#allocation11_spill] sm:$0xff]  ;;  %v7995_v39 = vld [vmem:[#allocation9_spill] sm:$0xff]  ;;  %p2889_p4 = por %p6927_p11, %p3751_p12  ;;  %p2905_p6 = por %p6927_p11, %p3771_p13 }
 0x201   : > { %v2131_v35 = vsel %vm6098_vm9, 0.0, %v2126_v14  ;;  %v2147_v24 = vsel %vm6116_vm1, 0.0, %v2142_v4  ;;  %v2157_v12 = vrot.slane %v2156_v2, 1  ;;  %v2173_v34 = vrot.slane %v2172_v52, 1  ;;  %v7996_v14 = vld [vmem:[#allocation8_spill] sm:$0xff]  ;;  %p2921_p9 = por %p6927_p11, %p3858_p3  ;;  %p2937_p10 = por %p6927_p11, %p3986_p5 }
 0x202   : > { %v2188_v11 = vmax.f32 %v2186_v6, %v2187_v33  ;;  %vm7980_vm10 = vcmask 1040384   ;;  %vm7981_vm5 = vcmask 1041408   ;;  %vm2214_vm12 = vcmp.ge.s32.totalorder %v7841_v1, %v2213_v7  ;;  %s6971_s28 = scalar_select %p2857_p1, 1, 0 }
 0x203   : > { %v2196_v23 = vsel %vm7980_vm10, %v2099_v40, %v2115_v27  ;;  %vm2215_vm8 = vcmp.ge.s32.totalorder %v7982_v13, %v2213_v7  ;;  %v2216_v28 = vstv %s6131_s24  ;;  %v2158_v8 = vmax.f32 %v2156_v2, %v2157_v12  ;;  %v7999_v7 = vld [vmem:[#allocation13_spill] sm:$0xff]  ;;  %v8000_v27 = vld [vmem:[#allocation14_spill] sm:$0xff]  ;;  %s6981_s4 = scalar_select %p2873_p2, 1, 0 }
 0x204   : > { %v2197_v20 = vsel %vm7981_vm5, %v2196_v23, %v2131_v35  ;;  %v2174_v29 = vmax.f32 %v2172_v52, %v2173_v34  ;;  %v2189_v63 = vrot.slane %v2188_v11, 1  ;;  %vm7983_vm0 = vcmask 1042432   ;;  %v7998_v52 = vld [vmem:[#allocation12_spill] sm:$0xff]  ;;  %v8004_v23 = vld [vmem:[#allocation17_spill] sm:$0xff]  ;;  %s6990_s8 = scalar_select %p2889_p4, 1, 0 }
 0x205   : > { %v2198_v56 = vsel %vm7983_vm0, %v2197_v20, %v2147_v24  ;;  %vm6153_vm9 = vcmp.eq.s32.totalorder %v2193_v21, 1  ;;  %vm2217_vm1 = vcmp.lt.s32.totalorder %v7841_v1, %v2216_v28  ;;  %vm2218_vm10 = vcmp.lt.s32.totalorder %v7982_v13, %v2216_v28  ;;  %v8002_v24 = vld [vmem:[#allocation15_spill] sm:$0xff]  ;;  %v8003_v34 = vld [vmem:[#allocation16_spill] sm:$0xff]  ;;  %v8005_v28 = vld [vmem:[#allocation18_spill] sm:$0xff]  ;;  %s7001_s25 = scalar_select %p2905_p6, 1, 0 }
 0x206   : > { %v2163_v44 = vsel %vm6127_vm15, 0.0, %v2158_v8  ;;  %v2179_v26 = vsel %vm6133_vm7, 0.0, %v2174_v29  ;;  %v2190_v46 = vmax.f32 %v2188_v11, %v2189_v63  ;;  %vm6163_vm5 = vmand %vm2214_vm12, %vm2217_vm1  ;;  %vm7988_vm0 = vcmask 1043456   ;;  %v8006_v29 = vld [vmem:[#allocation19_spill] sm:$0xff]  ;;  %s7067_s9 = scalar_select %p2921_p9, 1, 0 }
 0x207   : > { %v2199_v55 = vsel %vm7988_vm0, %v2198_v56, %v2163_v44  ;;  %vm6168_vm13 = vmand %vm2215_vm8, %vm2218_vm10  ;;  %v2257_v50 = vsel %vm6163_vm5, %v7991_v5, -inf  ;;  %v2259_v54 = vsel %vm6163_vm5, %v7992_v17, -inf  ;;  %v2261_v43 = vsel %vm6163_vm5, %v7993_v42, -inf  ;;  %v8007_v56 = vld [vmem:[#allocation20_spill] sm:$0xff]  ;;  %v8008_v44 = vld [vmem:[#allocation21_spill] sm:$0xff]  ;;  %p2953_p12 = por %p6927_p11, %p4090_p8 }
 0x208   : > { %v2195_v6 = vsel %vm6153_vm9, 0.0, %v2190_v46  ;;  %vm7994_vm12 = vcmask 1044480   ;;  %v2258_v45 = vsel %vm6168_vm13, %v7995_v39, -inf  ;;  %v2260_v4 = vsel %vm6168_vm13, %v7996_v14, -inf  ;;  %v8009_v46 = vld [vmem:[#allocation22_spill] sm:$0xff] }
 0x209   : > { %v2200_v21 = vsel %vm7994_vm12, %v2199_v55, %v2179_v26  ;;  %vm7997_vm15 = vcmask 1045504   ;;  %v2262_v33 = vsel %vm6168_vm13, %v7998_v52, -inf  ;;  %v2263_v40 = vsel %vm6163_vm5, %v7999_v7, -inf  ;;  %v8010_v7 = vld [vmem:[#allocation23_spill] sm:$0xff]  ;;  %s7087_s12 = scalar_select %p2937_p10, 1, 0 }
 0x20a   : > { %v2201_v2 = vsel %vm7997_vm15, %v2200_v21, %v2195_v6  ;;  %v2264_v35 = vsel %vm6168_vm13, %v8000_v27, -inf  ;;  %vm8001_vm7 = vcmask 30720   ;;  %v2265_v12 = vsel %vm6163_vm5, %v8002_v24, -inf  ;;  %v8011_v24 = vld [vmem:[#allocation25_spill] sm:$0xff]  ;;  %s7095_s22 = scalar_select %p2953_p12, 1, 0 }
 0x20b   : > { %3056 = vst.msk [vmem:[%s4209_s10 + $0x20] sm:$0x7f] %vm8001_vm7, %v2201_v2  ;;  %v2266_v11 = vsel %vm6168_vm13, %v8003_v34, -inf  ;;  %v2267_v20 = vsel %vm6163_vm5, %v8004_v23, -inf  ;;  %v2268_v8 = vsel %vm6168_vm13, %v8005_v28, -inf  ;;  %v2269_v63 = vsel %vm6163_vm5, %v8006_v29, -inf }
 0x20c   : > { %v2270_v10 = vsel %vm6168_vm13, %v8007_v56, -inf  ;;  %v2271_v26 = vsel %vm6163_vm5, %v8008_v44, -inf  ;;  %v2272_v55 = vsel %vm6168_vm13, %v8009_v46, -inf  ;;  %v8012_v23 = vld [vmem:[#allocation26_spill] sm:$0xff]  ;;  %v8013_v29 = vld [vmem:[#allocation27_spill] sm:$0xff]  ;;  %v8014_v44 = vld [vmem:[#allocation28_spill] sm:$0xff] }
 0x20d   : > { %vm8015_vm8 = vcmask 31744  }
 0x20e   : > { %v2289_v52 = vsel %vm8015_vm8, %v2257_v50, -inf  ;;  %vm8016_vm9 = vmmov %vm8015_vm8 }
 0x20f   : > { %v2290_v28 = vsel %vm8016_vm9, %v2258_v45, -inf  ;;  %vm8017_vm1 = vmmov %vm8015_vm8 }
 0x210   : > { %v2298_v2 = vsel %vm8017_vm1, %v2259_v54, -inf  ;;  %vm8018_vm10 = vmmov %vm8017_vm1  ;;  %v2291_v14 = vmax.f32 %v2289_v52, %v2290_v28 }
 0x211   : > { %v2299_v56 = vsel %vm8018_vm10, %v2260_v4, -inf  ;;  %vm8019_vm0 = vmmov %vm8017_vm1 }
 0x212   : > { %v2300_v39 = vmax.f32 %v2298_v2, %v2299_v56  ;;  %v2307_v46 = vsel %vm8019_vm0, %v2261_v43, -inf  ;;  %vm8020_vm12 = vmmov %vm8019_vm0  ;;  %v2292_v50 = vrot.slane %v2291_v14, 4 }
 0x213   : > { %v2308_v21 = vsel %vm8020_vm12, %v2262_v33, -inf  ;;  %vm8021_vm15 = vmmov %vm8019_vm0 }
 0x214   : > { %v2309_v6 = vmax.f32 %v2307_v46, %v2308_v21  ;;  %v2316_v27 = vsel %vm8021_vm15, %v2263_v40, -inf  ;;  %vm8022_vm7 = vmmov %vm8019_vm0  ;;  %v2301_v17 = vrot.slane %v2300_v39, 4  ;;  %v2293_v52 = vmax.f32 %v2291_v14, %v2292_v50 }
 0x215   : > { %v2317_v42 = vsel %vm8022_vm7, %v2264_v35, -inf  ;;  %vm8023_vm6 = vmmov %vm8019_vm0 }
 0x216   : > { %v2325_v34 = vsel %vm8023_vm6, %v2265_v12, -inf  ;;  %v2318_v45 = vmax.f32 %v2316_v27, %v2317_v42  ;;  %vm8024_vm8 = vmmov %vm8019_vm0  ;;  %v2310_v5 = vrot.slane %v2309_v6, 4  ;;  %v2302_v33 = vmax.f32 %v2300_v39, %v2301_v17 }
 0x217   : > { %v2326_v54 = vsel %vm8024_vm8, %v2266_v11, -inf  ;;  %vm8025_vm9 = vmmov %vm8019_vm0  ;;  %v2294_v46 = vrot.slane %v2293_v52, 2 }
 0x218   : > { %v2327_v4 = vmax.f32 %v2325_v34, %v2326_v54  ;;  %v2334_v2 = vsel %vm8025_vm9, %v2267_v20, -inf  ;;  %vm8026_vm1 = vmmov %vm8019_vm0  ;;  %v2319_v21 = vrot.slane %v2318_v45, 4  ;;  %v2311_v40 = vmax.f32 %v2309_v6, %v2310_v5 }
 0x219   : > { %v2335_v43 = vsel %vm8026_vm1, %v2268_v8, -inf  ;;  %vm8027_vm10 = vmmov %vm8019_vm0  ;;  %v2303_v42 = vrot.slane %v2302_v33, 2  ;;  %v2352_v20 = vsel %vm8019_vm0, %v2271_v26, -inf  ;;  %v2295_v8 = vmax.f32 %v2293_v52, %v2294_v46 }
 0x21a   : > { %v2336_v28 = vmax.f32 %v2334_v2, %v2335_v43  ;;  %v2328_v56 = vrot.slane %v2327_v4, 4  ;;  %v2343_v35 = vsel %vm8027_vm10, %v2269_v63, -inf  ;;  %vm8028_vm6 = vmmov %vm8019_vm0  ;;  %v2320_v27 = vmax.f32 %v2318_v45, %v2319_v21 }
 0x21b   : > { %v2344_v12 = vsel %vm8028_vm6, %v2270_v10, -inf  ;;  %v2312_v13 = vrot.slane %v2311_v40, 2  ;;  %v2304_v14 = vmax.f32 %v2302_v33, %v2303_v42  ;;  %vm8029_vm12 = vmmov %vm8019_vm0  ;;  %v2296_v2 = vrot.slane %v2295_v8, 1 }
 0x21c   : > { %v2337_v11 = vrot.slane %v2336_v28, 4  ;;  %v2329_v34 = vmax.f32 %v2327_v4, %v2328_v56  ;;  %v2345_v54 = vmax.f32 %v2343_v35, %v2344_v12  ;;  %v2321_v17 = vrot.slane %v2320_v27, 2  ;;  %vm8031_vm15 = vmmov %vm8019_vm0 }
 0x21d   : > { %v2313_v50 = vmax.f32 %v2311_v40, %v2312_v13  ;;  %v2353_v63 = vsel %vm8029_vm12, %v2272_v55, -inf  ;;  %v2305_v10 = vrot.slane %v2304_v14, 1  ;;  %v6290_v56 = vmax.f32 %v2295_v8, %v2296_v2  ;;  %vm8033_vm7 = vmmov %vm8019_vm0 }
 0x21e   : > { %v2338_v39 = vmax.f32 %v2336_v28, %v2337_v11  ;;  %v2330_v5 = vrot.slane %v2329_v34, 2  ;;  %v2346_v6 = vrot.slane %v2345_v54, 4  ;;  %v2322_v43 = vmax.f32 %v2320_v27, %v2321_v17  ;;  %vm8035_vm8 = vmmov %vm8019_vm0 }
 0x21f   : > { %v2314_v45 = vrot.slane %v2313_v50, 1  ;;  %v2354_v4 = vmax.f32 %v2352_v20, %v2353_v63  ;;  %v6292_v26 = vmax.f32 %v2304_v14, %v2305_v10  ;;  %v8030_v46 = vsel %vm6163_vm5, %v5695_v61, -inf  ;;  %vm8037_vm9 = vmmov %vm8019_vm0 }
 0x220   : > { %v2339_v1 = vrot.slane %v2338_v39, 2  ;;  %v2331_v21 = vmax.f32 %v2329_v34, %v2330_v5  ;;  %v2347_v30 = vmax.f32 %v2345_v54, %v2346_v6  ;;  %v2323_v52 = vrot.slane %v2322_v43, 1  ;;  %vm8039_vm1 = vmmov %vm8019_vm0 }
 0x221   : > { %v6294_v28 = vmax.f32 %v2313_v50, %v2314_v45  ;;  %v2355_v35 = vrot.slane %v2354_v4, 4  ;;  %v2361_v42 = vsel %vm8031_vm15, %v8030_v46, -inf  ;;  %v8032_v27 = vsel %vm6168_vm13, %v5698_v19, -inf  ;;  %vm8041_vm10 = vmmov %vm8019_vm0 }
 0x222   : > { %v2340_v33 = vmax.f32 %v2338_v39, %v2339_v1  ;;  %v2332_v13 = vrot.slane %v2331_v21, 1  ;;  %v2348_v40 = vrot.slane %v2347_v30, 2  ;;  %v6296_v55 = vmax.f32 %v2322_v43, %v2323_v52  ;;  %vm8043_vm6 = vmmov %vm8019_vm0 }
 0x223   : > { %v2362_v1 = vsel %vm8033_vm7, %v8032_v27, -inf  ;;  %v2356_v54 = vmax.f32 %v2354_v4, %v2355_v35  ;;  %v8034_v14 = vsel %vm6163_vm5, %v5719_v49, -inf  ;;  %v8036_v17 = vsel %vm6168_vm13, %v5722_v57, -inf  ;;  %vm8046_vm12 = vmmov %vm8019_vm0 }
 0x224   : > { %v2341_v12 = vrot.slane %v2340_v33, 1  ;;  %v6308_v11 = vmax.f32 %v2331_v21, %v2332_v13  ;;  %v2349_v34 = vmax.f32 %v2347_v30, %v2348_v40  ;;  %v2363_v20 = vmax.f32 %v2361_v42, %v2362_v1  ;;  %vm8048_vm15 = vmmov %vm8019_vm0 }
 0x225   : > { %v2370_v61 = vsel %vm8035_vm8, %v8034_v14, -inf  ;;  %v2371_v19 = vsel %vm8037_vm9, %v8036_v17, -inf  ;;  %v8038_v30 = vsel %vm6163_vm5, %v5729_v22, -inf  ;;  %v2357_v5 = vrot.slane %v2356_v54, 2  ;;  %vm8050_vm7 = vmmov %vm8019_vm0 }
 0x226   : > { %v6310_v8 = vmax.f32 %v2340_v33, %v2341_v12  ;;  %v2379_v39 = vsel %vm8039_vm1, %v8038_v30, -inf  ;;  %v2350_v50 = vrot.slane %v2349_v34, 1  ;;  %v2364_v6 = vrot.slane %v2363_v20, 4  ;;  %vm8053_vm8 = vmmov %vm8019_vm0 }
 0x227   : > { %v2372_v49 = vmax.f32 %v2370_v61, %v2371_v19  ;;  %v8040_v63 = vsel %vm6168_vm13, %v5732_v58, -inf  ;;  %v8042_v2 = vsel %vm6163_vm5, %v5735_v38, -inf  ;;  %v8044_v10 = vsel %vm6168_vm13, %v5748_v32, -inf  ;;  %vm8055_vm9 = vmmov %vm8019_vm0 }
 0x228   : > { %v2380_v57 = vsel %vm8041_vm10, %v8040_v63, -inf  ;;  %v2388_v22 = vsel %vm8043_vm6, %v8042_v2, -inf  ;;  %v2389_v43 = vsel %vm8019_vm0, %v8044_v10, -inf  ;;  %v8045_v45 = vsel %vm6163_vm5, %v5751_v0, -inf  ;;  %vm8057_vm1 = vmmov %vm8019_vm0 }
 0x229   : > { %v2397_v58 = vsel %vm8046_vm12, %v8045_v45, -inf  ;;  %v6347_v21 = vmax.f32 %v2349_v34, %v2350_v50  ;;  %v2358_v4 = vmax.f32 %v2356_v54, %v2357_v5  ;;  %v2365_v52 = vmax.f32 %v2363_v20, %v2364_v6  ;;  %vm8059_vm10 = vmmov %vm8019_vm0 }
 0x22a   : > { %v2373_v33 = vrot.slane %v2372_v49, 4  ;;  %v2381_v38 = vmax.f32 %v2379_v39, %v2380_v57  ;;  %v2390_v13 = vmax.f32 %v2388_v22, %v2389_v43  ;;  %v8047_v40 = vsel %vm6168_vm13, %v8010_v7, -inf }
 0x22b   : > { %v2398_v32 = vsel %vm8048_vm15, %v8047_v40, -inf  ;;  %v8049_v35 = vsel %vm6163_vm5, %v8011_v24, -inf  ;;  %v2359_v12 = vrot.slane %v2358_v4, 1  ;;  %v2366_v46 = vrot.slane %v2365_v52, 2 }
 0x22c   : > { %v2406_v0 = vsel %vm8050_vm7, %v8049_v35, -inf  ;;  %v2374_v42 = vmax.f32 %v2372_v49, %v2373_v33  ;;  %v2399_v27 = vmax.f32 %v2397_v58, %v2398_v32  ;;  %v2382_v1 = vrot.slane %v2381_v38, 4 }
 0x22d   : > { %v2391_v7 = vrot.slane %v2390_v13, 4  ;;  %v8052_v34 = vsel %vm6168_vm13, %v8012_v23, -inf  ;;  %v8054_v54 = vsel %vm6163_vm5, %v8013_v29, -inf  ;;  %v6375_v14 = vmax.f32 %v2358_v4, %v2359_v12 }
 0x22e   : > { %v2407_v24 = vsel %vm8053_vm8, %v8052_v34, -inf  ;;  %v2415_v20 = vsel %vm8055_vm9, %v8054_v54, -inf  ;;  %v2367_v61 = vmax.f32 %v2365_v52, %v2366_v46  ;;  %v2375_v17 = vrot.slane %v2374_v42, 2 }
 0x22f   : > { %v2400_v19 = vrot.slane %v2399_v27, 4  ;;  %v2383_v30 = vmax.f32 %v2381_v38, %v2382_v1  ;;  %v2392_v39 = vmax.f32 %v2390_v13, %v2391_v7  ;;  %v2408_v50 = vmax.f32 %v2406_v0, %v2407_v24 }
 0x230   : > { %v8056_v23 = vsel %vm6168_vm13, %v8014_v44, -inf  ;;  %v2368_v6 = vrot.slane %v2367_v61, 1  ;;  %v2376_v29 = vmax.f32 %v2374_v42, %v2375_v17  ;;  %v8058_v10 = vsel %vm6163_vm5, %v5790_v62, -inf  ;;  %vm8061_vm5 = vmmov %vm8019_vm0 }
 0x231   : > { %v2416_v5 = vsel %vm8057_vm1, %v8056_v23, -inf  ;;  %v2401_v49 = vmax.f32 %v2399_v27, %v2400_v19  ;;  %v2384_v57 = vrot.slane %v2383_v30, 2  ;;  %v2393_v2 = vrot.slane %v2392_v39, 2 }
 0x232   : > { %v2417_v63 = vmax.f32 %v2415_v20, %v2416_v5  ;;  %v2409_v22 = vrot.slane %v2408_v50, 4  ;;  %v2424_v44 = vsel %vm8059_vm10, %v8058_v10, -inf  ;;  %v2369_v43 = vmax.f32 %v2367_v61, %v2368_v6 }
 0x233   : > { %v2377_v45 = vrot.slane %v2376_v29, 1  ;;  %v2402_v58 = vrot.slane %v2401_v49, 2  ;;  %v2385_v52 = vmax.f32 %v2383_v30, %v2384_v57  ;;  %v2394_v33 = vmax.f32 %v2392_v39, %v2393_v2 }
 0x234   : > { %v2418_v4 = vrot.slane %v2417_v63, 4  ;;  %v2410_v38 = vmax.f32 %v2408_v50, %v2409_v22  ;;  %v8060_v62 = vsel %vm6168_vm13, %v5854_v31, -inf  ;;  %vm8062_vm13 = vcmask 1041409  }
 0x235   : > { %v2425_v36 = vsel %vm8061_vm5, %v8060_v62, -inf  ;;  %v2378_v13 = vmax.f32 %v2376_v29, %v2377_v45  ;;  %v2403_v40 = vmax.f32 %v2401_v49, %v2402_v58  ;;  %v2386_v60 = vrot.slane %v2385_v52, 1  ;;  %vm8067_vm7 = vmmov %vm8062_vm13 }
 0x236   : > { %v2419_v32 = vmax.f32 %v2417_v63, %v2418_v4  ;;  %v2426_v35 = vmax.f32 %v2424_v44, %v2425_v36  ;;  %v2395_v31 = vrot.slane %v2394_v33, 1  ;;  %v2411_v0 = vrot.slane %v2410_v38, 2 }
 0x237   : > { %v2449_v12 = vsel %vm8062_vm13, %v6292_v26, %v6290_v56  ;;  %v2404_v46 = vrot.slane %v2403_v40, 1  ;;  %vm8063_vm6 = vcmask 1042434   ;;  %v2387_v56 = vmax.f32 %v2385_v52, %v2386_v60 }
 0x238   : > { %v2420_v42 = vrot.slane %v2419_v32, 2  ;;  %v2427_v27 = vrot.slane %v2426_v35, 4  ;;  %v2450_v1 = vsel %vm8063_vm6, %v6294_v28, %v2449_v12  ;;  %v2396_v26 = vmax.f32 %v2394_v33, %v2395_v31  ;;  %vm8069_vm9 = vmmov %vm8063_vm6 }
 0x239   : > { %v2412_v7 = vmax.f32 %v2410_v38, %v2411_v0  ;;  %vm8064_vm0 = vcmask 1043459   ;;  %v2405_v28 = vmax.f32 %v2403_v40, %v2404_v46  ;;  %vm8065_vm12 = vcmask 1044484  }
 0x23a   : > { %v2451_v34 = vsel %vm8064_vm0, %v6296_v55, %v2450_v1  ;;  %v2421_v24 = vmax.f32 %v2419_v32, %v2420_v42  ;;  %v2428_v54 = vmax.f32 %v2426_v35, %v2427_v27  ;;  %vm8066_vm15 = vcmask 1045509   ;;  %vm8071_vm10 = vmmov %vm8064_vm0 }
 0x23b   : > { %v2452_v20 = vsel %vm8065_vm12, %v6308_v11, %v2451_v34  ;;  %v2413_v55 = vrot.slane %v2412_v7, 1  ;;  %v2456_v17 = vsel %vm8067_vm7, %v2378_v13, %v2369_v43  ;;  %vm8068_vm8 = vcmask 1046534   ;;  %vm8072_vm5 = vmmov %vm8065_vm12 }
 0x23c   : > { %v2453_v61 = vsel %vm8066_vm15, %v6310_v8, %v2452_v20  ;;  %v2422_v11 = vrot.slane %v2421_v24, 1  ;;  %v2429_v19 = vrot.slane %v2428_v54, 2  ;;  %v2457_v39 = vsel %vm8069_vm9, %v2387_v56, %v2456_v17  ;;  %vm8073_vm13 = vmmov %vm8066_vm15 }
 0x23d   : > { %v2454_v30 = vsel %vm8068_vm8, %v6347_v21, %v2453_v61  ;;  %v2414_v8 = vmax.f32 %v2412_v7, %v2413_v55  ;;  %vm8070_vm1 = vcmask 1047559   ;;  %v2458_v23 = vsel %vm8071_vm10, %v2396_v26, %v2457_v39  ;;  %vm8074_vm6 = vmmov %vm8068_vm8  ;;  %v8092_v61 = vld [vmem:[#allocation24_spill] sm:$0xff] }
 0x23e   : > { %v2455_v50 = vsel %vm8070_vm1, %v6375_v14, %v2454_v30  ;;  %v2423_v21 = vmax.f32 %v2421_v24, %v2422_v11  ;;  %v2430_v5 = vmax.f32 %v2428_v54, %v2429_v19  ;;  %v2459_v6 = vsel %vm8072_vm5, %v2405_v28, %v2458_v23 }
 0x23f   : > { %v2465_v29 = vsel %vm7546_vm2, %v2455_v50, -inf  ;;  %v2460_v14 = vsel %vm8073_vm13, %v2414_v8, %v2459_v6  ;;  %v2478_v49 = vstv %s6409_s29  ;;  %v2481_v63 = vsel %vm7548_vm14, %v2455_v50, -inf }
 0x240   : > { %v2497_v57 = vsel %vm7549_vm3, %v2455_v50, -inf  ;;  %v2431_v2 = vrot.slane %v2430_v5, 1  ;;  %v2494_v22 = vstv %s6426_s11  ;;  %v2510_v10 = vstv %s6435_s21 }
 0x241   : > { %v2526_v44 = vstv %s6455_s23  ;;  %v2461_v43 = vsel %vm8074_vm6, %v2423_v21, %v2460_v14  ;;  %vm8075_vm0 = vcmask 31744   ;;  %v2513_v58 = vsel %vm7552_vm11, %v2455_v50, -inf }
 0x242   : > { %v2467_v45 = vsel %vm8075_vm0, %v2465_v29, -inf  ;;  %v2529_v4 = vsel %vm3969_vm4, %v2455_v50, -inf  ;;  %v2432_v52 = vmax.f32 %v2430_v5, %v2431_v2  ;;  %vm8076_vm12 = vmmov %vm8075_vm0  ;;  %v2542_v62 = vstv %s6478_s30  ;;  %v6628_v5 = vld [vmem:[%s3256_s26 + $0x30] sm:$0xff] }
 0x243   : > { %v2483_v33 = vsel %vm8076_vm12, %v2481_v63, -inf  ;;  %vm8077_vm15 = vmmov %vm8075_vm0  ;;  %vm8080_vm9 = vnez %v7411_v18  ;;  %v2558_v32 = vstv %s6491_s3  ;;  %vm8082_vm5 = vnez %v7430_v41 }
 0x244   : > { %v2499_v38 = vsel %vm8077_vm15, %v2497_v57, -inf  ;;  %vm8078_vm7 = vmmov %vm8075_vm0  ;;  %v2545_v40 = vsel %vm8080_vm9, %v2455_v50, -inf  ;;  %v2462_v35 = vsel %vm8070_vm1, %v2432_v52, %v2461_v43  ;;  %v2561_v31 = vsel %vm8082_vm5, %v2455_v50, -inf  ;;  %v6621_v50 = vld [vmem:[%s3256_s26 + $0x20] sm:$0xff] }
 0x245   : > { %v2515_v36 = vsel %vm8078_vm7, %v2513_v58, -inf  ;;  %vm8079_vm8 = vmmov %vm8075_vm0  ;;  %v2574_v0 = vstv %s6501_s5  ;;  %vm8083_vm13 = vnez %v7372_v47  ;;  %vm8084_vm6 = vnez %v7382_v3  ;;  %v8105_v58 = vld [vmem:[#allocation5_spill] sm:$0xff] }
 0x246   : > { %v2531_v13 = vsel %vm8079_vm8, %v2529_v4, -inf  ;;  %vm8081_vm10 = vmmov %vm8075_vm0  ;;  %v2466_v12 = vsel %vm8083_vm13, %v2462_v35, -inf  ;;  %v2482_v46 = vsel %vm8084_vm6, %v2462_v35, -inf  ;;  %vm8085_vm0 = vnez %v7396_v16 }
 0x247   : > { %v2547_v60 = vsel %vm8081_vm10, %v2545_v40, -inf  ;;  %v2498_v42 = vsel %vm8085_vm0, %v2462_v35, -inf  ;;  %vm8086_vm12 = vnez %v7417_v15  ;;  %vm8087_vm15 = vmmov %vm8078_vm7  ;;  %v2484_v56 = vsel %vm8078_vm7, %v2482_v46, -inf }
 0x248   : > { %v2514_v27 = vsel %vm8086_vm12, %v2462_v35, -inf  ;;  %v2468_v1 = vsel %vm8087_vm15, %v2466_v12, -inf  ;;  %vm8088_vm8 = vmmov %vm8078_vm7  ;;  %v2485_v28 = vmax.f32 %v2483_v33, %v2484_v56  ;;  %vm8090_vm10 = vnez %v7422_v48 }
 0x249   : > { %v2500_v26 = vsel %vm8088_vm8, %v2498_v42, -inf  ;;  %vm8089_vm1 = vmmov %vm8078_vm7  ;;  %v2469_v34 = vmax.f32 %v2467_v45, %v2468_v1  ;;  %v2530_v20 = vsel %vm8090_vm10, %v2462_v35, -inf  ;;  %vm8091_vm5 = vnez %v7428_v25  ;;  %v6709_v1 = vld [vmem:[%s3256_s26 + $0xa8] sm:$0xff] }
 0x24a   : > { %v2516_v7 = vsel %vm8089_vm1, %v2514_v27, -inf  ;;  %v2501_v24 = vmax.f32 %v2499_v38, %v2500_v26  ;;  %v2546_v55 = vsel %vm8091_vm5, %v2462_v35, -inf  ;;  %vm8093_vm12 = vnez %v8092_v61  ;;  %vm8094_vm15 = vmmov %vm8089_vm1 }
 0x24b   : > { %v2517_v54 = vmax.f32 %v2515_v36, %v2516_v7  ;;  %v2562_v17 = vsel %vm8093_vm12, %v2462_v35, -inf  ;;  %v2563_v11 = vsel %vm8094_vm15, %v2561_v31, -inf  ;;  %v2470_v19 = vrot.slane %v2469_v34, 4  ;;  %vm8103_vm5 = vmmov %vm8094_vm15  ;;  %v8108_v31 = vld [vmem:[#allocation6_spill] sm:$0xff] }
 0x24c   : > { %v2486_v30 = vrot.slane %v2485_v28, 4  ;;  %v2502_v39 = vrot.slane %v2501_v24, 4  ;;  %vm6547_vm7 = vcmp.eq.s32.totalorder %v2478_v49, 1  ;;  %vm6551_vm8 = vcmp.eq.s32.totalorder %v2494_v22, 1  ;;  %vm8104_vm10 = vmmov %vm8103_vm5 }
 0x24d   : > { %v2518_v8 = vrot.slane %v2517_v54, 4  ;;  %vm6555_vm1 = vcmp.eq.s32.totalorder %v2510_v10, 1  ;;  %vm6559_vm12 = vcmp.eq.s32.totalorder %v2526_v44, 1  ;;  %v2532_v6 = vsel %vm8094_vm15, %v2530_v20, -inf }
 0x24e   : > { %v2548_v29 = vsel %vm8103_vm5, %v2546_v55, -inf  ;;  %v2564_v14 = vsel %vm8104_vm10, %v2562_v17, -inf  ;;  %v2594_v49 = vstv %s6512_s0  ;;  %v2471_v63 = vmax.f32 %v2469_v34, %v2470_v19 }
 0x24f   : > { %v2487_v57 = vmax.f32 %v2485_v28, %v2486_v30  ;;  %v2503_v2 = vmax.f32 %v2501_v24, %v2502_v39  ;;  %v2519_v22 = vmax.f32 %v2517_v54, %v2518_v8  ;;  %v2533_v43 = vmax.f32 %v2531_v13, %v2532_v6  ;;  %v6588_v39 = vld [vmem:[%s3256_s26] sm:$0xff]  ;;  %v6591_v8 = vld [vmem:[%s3256_s26 + $0x8] sm:$0xff] }
 0x250   : > { %v2549_v10 = vmax.f32 %v2547_v60, %v2548_v29  ;;  %v2565_v45 = vmax.f32 %v2563_v11, %v2564_v14  ;;  %vm6568_vm0 = vcmp.ge.s32.totalorder %v8105_v58, %v2594_v49  ;;  %v2472_v4 = vrot.slane %v2471_v63, 2 }
 0x251   : > { %v2488_v52 = vrot.slane %v2487_v57, 2  ;;  %v2504_v33 = vrot.slane %v2503_v2, 2  ;;  %v2520_v38 = vrot.slane %v2519_v22, 2  ;;  %v2534_v36 = vrot.slane %v2533_v43, 4 }
 0x252   : > { %v2550_v40 = vrot.slane %v2549_v10, 4  ;;  %v2566_v35 = vrot.slane %v2565_v45, 4  ;;  %vm6573_vm5 = vcmp.ge.s32.totalorder %v8108_v31, %v2594_v49  ;;  %v2473_v13 = vmax.f32 %v2471_v63, %v2472_v4  ;;  %v6601_v63 = vld [vmem:[%s3256_s26 + $0x10] sm:$0xff] }
 0x253   : > { %v2489_v60 = vmax.f32 %v2487_v57, %v2488_v52  ;;  %v2505_v46 = vmax.f32 %v2503_v2, %v2504_v33  ;;  %v2521_v42 = vmax.f32 %v2519_v22, %v2520_v38  ;;  %vm6577_vm10 = vcmp.eq.s32.totalorder %v2542_v62, 1  ;;  %v6604_v57 = vld [vmem:[%s3256_s26 + $0x18] sm:$0xff]  ;;  %v6634_v33 = vld [vmem:[%s3256_s26 + $0x40] sm:$0xff]  ;;  %v6764_v38 = vld [vmem:[%s3256_s26 + $0xe8] sm:$0xff] }
 0x254   : > { %vm6581_vm15 = vcmp.eq.s32.totalorder %v2558_v32, 1  ;;  %v2535_v56 = vmax.f32 %v2533_v43, %v2534_v36  ;;  %v2551_v26 = vmax.f32 %v2549_v10, %v2550_v40  ;;  %v2567_v7 = vmax.f32 %v2565_v45, %v2566_v35  ;;  %v6631_v52 = vld [vmem:[%s3256_s26 + $0x38] sm:$0xff]  ;;  %v6644_v40 = vld [vmem:[%s3256_s26 + $0x48] sm:$0xff]  ;;  %v6647_v35 = vld [vmem:[%s3256_s26 + $0x50] sm:$0xff] }
 0x255   : > { %v2597_v34 = vstv %s6545_s19  ;;  %v2474_v28 = vrot.slane %v2473_v13, 1  ;;  %v2490_v24 = vrot.slane %v2489_v60, 1  ;;  %v2506_v54 = vrot.slane %v2505_v46, 1 }
 0x256   : > { %v2522_v20 = vrot.slane %v2521_v42, 1  ;;  %v2536_v55 = vrot.slane %v2535_v56, 2  ;;  %v2552_v62 = vrot.slane %v2551_v26, 2  ;;  %v2568_v17 = vrot.slane %v2567_v7, 2 }
 0x257   : > { %vm2598_vm6 = vcmp.lt.s32.totalorder %v8105_v58, %v2597_v34  ;;  %v2475_v32 = vmax.f32 %v2473_v13, %v2474_v28  ;;  %v2491_v11 = vmax.f32 %v2489_v60, %v2490_v24  ;;  %v2507_v19 = vmax.f32 %v2505_v46, %v2506_v54  ;;  %v6624_v58 = vld [vmem:[%s3256_s26 + $0x28] sm:$0xff]  ;;  %v6672_v28 = vld [vmem:[%s3256_s26 + $0x80] sm:$0xff] }
 0x258   : > { %v2523_v30 = vmax.f32 %v2521_v42, %v2522_v20  ;;  %v2537_v6 = vmax.f32 %v2535_v56, %v2536_v55  ;;  %v2553_v29 = vmax.f32 %v2551_v26, %v2552_v62  ;;  %v2569_v14 = vmax.f32 %v2567_v7, %v2568_v17  ;;  %vm6596_vm9 = vmand %vm6568_vm0, %vm2598_vm6  ;;  %v6660_v56 = vld [vmem:[%s3256_s26 + $0x60] sm:$0xff]  ;;  %v6663_v26 = vld [vmem:[%s3256_s26 + $0x68] sm:$0xff] }
 0x259   : > { %vm2599_vm13 = vcmp.lt.s32.totalorder %v8108_v31, %v2597_v34  ;;  %v2480_v2 = vsel %vm6547_vm7, 0.0, %v2475_v32  ;;  %v2496_v22 = vsel %vm6551_vm8, 0.0, %v2491_v11  ;;  %v2512_v43 = vsel %vm6555_vm1, 0.0, %v2507_v19  ;;  %v6650_v31 = vld [vmem:[%s3256_s26 + $0x58] sm:$0xff]  ;;  %v6666_v7 = vld [vmem:[%s3256_s26 + $0x70] sm:$0xff]  ;;  %v6675_v24 = vld [vmem:[%s3256_s26 + $0x88] sm:$0xff] }
 0x25a   : > { %v2528_v10 = vsel %vm6559_vm12, 0.0, %v2523_v30  ;;  %vm6616_vm6 = vmand %vm6573_vm5, %vm2599_vm13  ;;  %v2538_v23 = vrot.slane %v2537_v6, 1  ;;  %v2554_v44 = vrot.slane %v2553_v29, 1  ;;  %v2570_v4 = vrot.slane %v2569_v14, 1  ;;  %v6669_v34 = vld [vmem:[%s3256_s26 + $0x78] sm:$0xff]  ;;  %v6696_v19 = vld [vmem:[%s3256_s26 + $0x90] sm:$0xff] }
 0x25b   : > { %vm8119_vm0 = vcmask 1040384   ;;  %vm6638_vm13 = vcmp.eq.s32.totalorder %v2574_v0, 1  ;;  %vm8122_vm12 = vcmask 1041408   ;;  %v2638_v12 = vsel %vm6596_vm9, %v6588_v39, -inf  ;;  %v6699_v30 = vld [vmem:[%s3256_s26 + $0x98] sm:$0xff] }
 0x25c   : > { %v2577_v21 = vsel %vm8119_vm0, %v2480_v2, %v2496_v22  ;;  %v2639_v0 = vsel %vm6616_vm6, %v6591_v8, -inf  ;;  %v2539_v13 = vmax.f32 %v2537_v6, %v2538_v23  ;;  %v2555_v60 = vmax.f32 %v2553_v29, %v2554_v44  ;;  %v6706_v8 = vld [vmem:[%s3256_s26 + $0xa0] sm:$0xff]  ;;  %v6712_v6 = vld [vmem:[%s3256_s26 + $0xb0] sm:$0xff]  ;;  %v6725_v2 = vld [vmem:[%s3256_s26 + $0xb8] sm:$0xff] }
 0x25d   : > { %v2578_v36 = vsel %vm8122_vm12, %v2577_v21, %v2512_v43  ;;  %v2571_v46 = vmax.f32 %v2569_v14, %v2570_v4  ;;  %vm8123_vm7 = vcmask 1042432   ;;  %v2640_v54 = vsel %vm6596_vm9, %v6601_v63, -inf  ;;  %v6728_v22 = vld [vmem:[%s3256_s26 + $0xc0] sm:$0xff]  ;;  %v6731_v43 = vld [vmem:[%s3256_s26 + $0xc8] sm:$0xff]  ;;  %v6744_v44 = vld [vmem:[%s3256_s26 + $0xd0] sm:$0xff] }
 0x25e   : > { %v2579_v42 = vsel %vm8123_vm7, %v2578_v36, %v2528_v10  ;;  %v2641_v20 = vsel %vm6616_vm6, %v6604_v57, -inf  ;;  %v2642_v55 = vsel %vm6596_vm9, %v6621_v50, -inf  ;;  %v2643_v62 = vsel %vm6616_vm6, %v6624_v58, -inf  ;;  %v6747_v4 = vld [vmem:[%s3256_s26 + $0xd8] sm:$0xff]  ;;  %v6750_v21 = vld [vmem:[%s3256_s26 + $0xe0] sm:$0xff]  ;;  %v6767_v36 = vld [vmem:[%s3256_s26 + $0xf0] sm:$0xff] }
 0x25f   : > { %v2544_v17 = vsel %vm6577_vm10, 0.0, %v2539_v13  ;;  %v2560_v32 = vsel %vm6581_vm15, 0.0, %v2555_v60  ;;  %v2576_v11 = vsel %vm6638_vm13, 0.0, %v2571_v46  ;;  %v2644_v39 = vsel %vm6596_vm9, %v6628_v5, -inf }
 0x260   : > { %vm8124_vm8 = vcmask 1043456   ;;  %v2645_v29 = vsel %vm6616_vm6, %v6631_v52, -inf  ;;  %v2646_v14 = vsel %vm6596_vm9, %v6634_v33, -inf  ;;  %v2647_v63 = vsel %vm6616_vm6, %v6644_v40, -inf }
 0x261   : > { %v2580_v27 = vsel %vm8124_vm8, %v2579_v42, %v2544_v17  ;;  %vm8125_vm1 = vcmask 1044480   ;;  %v2648_v10 = vsel %vm6596_vm9, %v6647_v35, -inf  ;;  %v2649_v50 = vsel %vm6616_vm6, %v6650_v31, -inf }
 0x262   : > { %v2581_v57 = vsel %vm8125_vm1, %v2580_v27, %v2560_v32  ;;  %v2650_v58 = vsel %vm6596_vm9, %v6660_v56, -inf  ;;  %vm8126_vm5 = vcmask 1045504   ;;  %v2651_v5 = vsel %vm6616_vm6, %v6663_v26, -inf }
 0x263   : > { %v2582_v23 = vsel %vm8126_vm5, %v2581_v57, %v2576_v11  ;;  %v2652_v52 = vsel %vm6596_vm9, %v6666_v7, -inf  ;;  %v2653_v33 = vsel %vm6616_vm6, %v6669_v34, -inf  ;;  %vm8127_vm10 = vcmask 30720  }
 0x264   : > { %3059 = vst.msk [vmem:[%s4209_s10 + $0x28] sm:$0x7f] %vm8127_vm10, %v2582_v23  ;;  %v2654_v40 = vsel %vm6596_vm9, %v6672_v28, -inf  ;;  %vm8128_vm15 = vcmask 31744   ;;  %v8148_v28 = vsel %vm6616_vm6, %v6699_v30, -inf }
 0x265   : > { %v2670_v57 = vsel %vm8128_vm15, %v2638_v12, -inf  ;;  %vm8129_vm0 = vmmov %vm8128_vm15 }
 0x266   : > { %v2671_v23 = vsel %vm8129_vm0, %v2639_v0, -inf  ;;  %vm8130_vm13 = vmmov %vm8129_vm0 }
 0x267   : > { %v2679_v34 = vsel %vm8130_vm13, %v2640_v54, -inf  ;;  %vm8131_vm12 = vmmov %vm8129_vm0  ;;  %v2672_v26 = vmax.f32 %v2670_v57, %v2671_v23 }
 0x268   : > { %v2680_v17 = vsel %vm8131_vm12, %v2641_v20, -inf  ;;  %vm8132_vm7 = vmmov %vm8129_vm0 }
 0x269   : > { %v2688_v7 = vsel %vm8132_vm7, %v2642_v55, -inf  ;;  %v2681_v32 = vmax.f32 %v2679_v34, %v2680_v17  ;;  %vm8133_vm8 = vmmov %vm8129_vm0  ;;  %v2673_v0 = vrot.slane %v2672_v26, 4  ;;  %v2715_v55 = vsel %vm8129_vm0, %v2648_v10, -inf }
 0x26a   : > { %v2689_v56 = vsel %vm8133_vm8, %v2643_v62, -inf  ;;  %vm8134_vm1 = vmmov %vm8129_vm0 }
 0x26b   : > { %v2697_v11 = vsel %vm8134_vm1, %v2644_v39, -inf  ;;  %v2690_v42 = vmax.f32 %v2688_v7, %v2689_v56  ;;  %vm8135_vm5 = vmmov %vm8129_vm0  ;;  %v2682_v60 = vrot.slane %v2681_v32, 4  ;;  %v2674_v17 = vmax.f32 %v2672_v26, %v2673_v0 }
 0x26c   : > { %v2698_v46 = vsel %vm8135_vm5, %v2645_v29, -inf  ;;  %vm8136_vm10 = vmmov %vm8129_vm0 }
 0x26d   : > { %v2706_v27 = vsel %vm8136_vm10, %v2646_v14, -inf  ;;  %vm8137_vm15 = vmmov %vm8129_vm0  ;;  %v2699_v54 = vmax.f32 %v2697_v11, %v2698_v46  ;;  %v2691_v20 = vrot.slane %v2690_v42, 4  ;;  %v2683_v39 = vmax.f32 %v2681_v32, %v2682_v60 }
 0x26e   : > { %v2707_v12 = vsel %vm8137_vm15, %v2647_v63, -inf  ;;  %vm8138_vm13 = vmmov %vm8129_vm0  ;;  %v2675_v46 = vrot.slane %v2674_v17, 2 }
 0x26f   : > { %v2708_v13 = vmax.f32 %v2706_v27, %v2707_v12  ;;  %v2716_v34 = vsel %vm8138_vm13, %v2649_v50, -inf  ;;  %vm8139_vm12 = vmmov %vm8129_vm0  ;;  %v2700_v56 = vrot.slane %v2699_v54, 4  ;;  %v2692_v29 = vmax.f32 %v2690_v42, %v2691_v20  ;;  %v6831_v42 = vld [vmem:[%s3256_s26 + $0xf8] sm:$0xff] }
 0x270   : > { %v2724_v62 = vsel %vm8139_vm12, %v2650_v58, -inf  ;;  %v2717_v14 = vmax.f32 %v2715_v55, %v2716_v34  ;;  %vm8140_vm7 = vmmov %vm8129_vm0  ;;  %v2684_v11 = vrot.slane %v2683_v39, 2  ;;  %v2676_v26 = vmax.f32 %v2674_v17, %v2675_v46 }
 0x271   : > { %v2709_v7 = vrot.slane %v2708_v13, 4  ;;  %v2725_v63 = vsel %vm8140_vm7, %v2651_v5, -inf  ;;  %vm8141_vm8 = vmmov %vm8129_vm0  ;;  %v2701_v27 = vmax.f32 %v2699_v54, %v2700_v56  ;;  %v2693_v10 = vrot.slane %v2692_v29, 2 }
 0x272   : > { %v2733_v57 = vsel %vm8141_vm8, %v2652_v52, -inf  ;;  %v2718_v12 = vrot.slane %v2717_v14, 4  ;;  %v2726_v50 = vmax.f32 %v2724_v62, %v2725_v63  ;;  %vm8142_vm1 = vmmov %vm8129_vm0  ;;  %v2685_v60 = vmax.f32 %v2683_v39, %v2684_v11 }
 0x273   : > { %v2710_v23 = vmax.f32 %v2708_v13, %v2709_v7  ;;  %v2734_v58 = vsel %vm8142_vm1, %v2653_v33, -inf  ;;  %v2702_v32 = vrot.slane %v2701_v27, 2  ;;  %v2694_v20 = vmax.f32 %v2692_v29, %v2693_v10  ;;  %vm8143_vm5 = vmmov %vm8129_vm0 }
 0x274   : > { %v2719_v55 = vmax.f32 %v2717_v14, %v2718_v12  ;;  %v2727_v5 = vrot.slane %v2726_v50, 4  ;;  %v2735_v34 = vmax.f32 %v2733_v57, %v2734_v58  ;;  %v2677_v52 = vrot.slane %v2676_v26, 1  ;;  %vm8145_vm10 = vmmov %vm8129_vm0 }
 0x275   : > { %v2711_v0 = vrot.slane %v2710_v23, 2  ;;  %v2686_v31 = vrot.slane %v2685_v60, 1  ;;  %v2703_v35 = vmax.f32 %v2701_v27, %v2702_v32  ;;  %v2695_v13 = vrot.slane %v2694_v20, 1  ;;  %vm8147_vm15 = vmmov %vm8129_vm0 }
 0x276   : > { %v2720_v56 = vrot.slane %v2719_v55, 2  ;;  %v2728_v7 = vmax.f32 %v2726_v50, %v2727_v5  ;;  %v2736_v62 = vrot.slane %v2735_v34, 4  ;;  %v2669_v33 = vsel %vm6616_vm6, %v6831_v42, -inf  ;;  %vm8150_vm13 = vmmov %vm8129_vm0 }
 0x277   : > { %v2712_v54 = vmax.f32 %v2710_v23, %v2711_v0  ;;  %v6836_v17 = vmax.f32 %v2676_v26, %v2677_v52  ;;  %v6838_v39 = vmax.f32 %v2685_v60, %v2686_v31  ;;  %v2704_v29 = vrot.slane %v2703_v35, 1  ;;  %vm8152_vm12 = vmmov %vm8129_vm0 }
 0x278   : > { %v2721_v63 = vmax.f32 %v2719_v55, %v2720_v56  ;;  %v2729_v57 = vrot.slane %v2728_v7, 2  ;;  %v2737_v46 = vmax.f32 %v2735_v34, %v2736_v62  ;;  %v6840_v11 = vmax.f32 %v2694_v20, %v2695_v13  ;;  %vm8154_vm7 = vmmov %vm8129_vm0 }
 0x279   : > { %v2713_v14 = vrot.slane %v2712_v54, 1  ;;  %v6842_v27 = vmax.f32 %v2703_v35, %v2704_v29  ;;  %v2742_v23 = vsel %vm8143_vm5, %v2654_v40, -inf  ;;  %v8144_v31 = vsel %vm6616_vm6, %v6675_v24, -inf  ;;  %vm8156_vm8 = vmmov %vm8129_vm0 }
 0x27a   : > { %v2743_v10 = vsel %vm8145_vm10, %v8144_v31, -inf  ;;  %v2722_v12 = vrot.slane %v2721_v63, 1  ;;  %v2730_v50 = vmax.f32 %v2728_v7, %v2729_v57  ;;  %v2738_v58 = vrot.slane %v2737_v46, 2  ;;  %vm8158_vm1 = vmmov %vm8129_vm0 }
 0x27b   : > { %v2744_v26 = vmax.f32 %v2742_v23, %v2743_v10  ;;  %v8146_v35 = vsel %vm6596_vm9, %v6696_v19, -inf  ;;  %v2752_v40 = vsel %vm8129_vm0, %v8148_v28, -inf  ;;  %v8149_v24 = vsel %vm6596_vm9, %v6706_v8, -inf  ;;  %vm8160_vm5 = vmmov %vm8129_vm0 }
 0x27c   : > { %v2751_v60 = vsel %vm8147_vm15, %v8146_v35, -inf  ;;  %v2760_v32 = vsel %vm8150_vm13, %v8149_v24, -inf  ;;  %v8151_v0 = vsel %vm6616_vm6, %v6709_v1, -inf  ;;  %v6874_v20 = vmax.f32 %v2712_v54, %v2713_v14  ;;  %vm8162_vm10 = vmmov %vm8129_vm0 }
 0x27d   : > { %v2761_v19 = vsel %vm8152_vm12, %v8151_v0, -inf  ;;  %v2731_v55 = vrot.slane %v2730_v50, 1  ;;  %v2739_v5 = vmax.f32 %v2737_v46, %v2738_v58  ;;  %v2745_v34 = vrot.slane %v2744_v26, 4  ;;  %vm8164_vm15 = vmmov %vm8129_vm0 }
 0x27e   : > { %v2753_v30 = vmax.f32 %v2751_v60, %v2752_v40  ;;  %v2762_v52 = vmax.f32 %v2760_v32, %v2761_v19  ;;  %v8153_v13 = vsel %vm6596_vm9, %v6712_v6, -inf  ;;  %v8155_v56 = vsel %vm6616_vm6, %v6725_v2, -inf  ;;  %vm8167_vm13 = vmmov %vm8129_vm0 }
 0x27f   : > { %v2769_v8 = vsel %vm8154_vm7, %v8153_v13, -inf  ;;  %v2770_v1 = vsel %vm8156_vm8, %v8155_v56, -inf  ;;  %v6886_v7 = vmax.f32 %v2721_v63, %v2722_v12  ;;  %v6888_v54 = vmax.f32 %v2730_v50, %v2731_v55  ;;  %vm8169_vm12 = vmmov %vm8129_vm0 }
 0x280   : > { %v2746_v62 = vmax.f32 %v2744_v26, %v2745_v34  ;;  %v2771_v29 = vmax.f32 %v2769_v8, %v2770_v1  ;;  %v2754_v14 = vrot.slane %v2753_v30, 4  ;;  %v2763_v57 = vrot.slane %v2762_v52, 4 }
 0x281   : > { %v8157_v6 = vsel %vm6596_vm9, %v6728_v22, -inf  ;;  %v8159_v2 = vsel %vm6616_vm6, %v6731_v43, -inf  ;;  %v2740_v63 = vrot.slane %v2739_v5, 1  ;;  %v8161_v26 = vsel %vm6596_vm9, %v6744_v44, -inf }
 0x282   : > { %v2778_v46 = vsel %vm8158_vm1, %v8157_v6, -inf  ;;  %v2779_v23 = vsel %vm8160_vm5, %v8159_v2, -inf  ;;  %v2747_v31 = vrot.slane %v2746_v62, 2  ;;  %v2772_v10 = vrot.slane %v2771_v29, 4 }
 0x283   : > { %v2780_v12 = vmax.f32 %v2778_v46, %v2779_v23  ;;  %v2755_v50 = vmax.f32 %v2753_v30, %v2754_v14  ;;  %v2764_v58 = vmax.f32 %v2762_v52, %v2763_v57  ;;  %v2787_v22 = vsel %vm8162_vm10, %v8161_v26, -inf }
 0x284   : > { %v8163_v35 = vsel %vm6616_vm6, %v6747_v4, -inf  ;;  %v2748_v60 = vmax.f32 %v2746_v62, %v2747_v31  ;;  %v2773_v28 = vmax.f32 %v2771_v29, %v2772_v10  ;;  %v8165_v44 = vsel %vm6596_vm9, %v6750_v21, -inf }
 0x285   : > { %v2788_v43 = vsel %vm8164_vm15, %v8163_v35, -inf  ;;  %v2781_v40 = vrot.slane %v2780_v12, 4  ;;  %v2756_v32 = vrot.slane %v2755_v50, 2  ;;  %v2765_v0 = vrot.slane %v2764_v58, 2 }
 0x286   : > { %v2789_v24 = vmax.f32 %v2787_v22, %v2788_v43  ;;  %v2796_v19 = vsel %vm8129_vm0, %v8165_v44, -inf  ;;  %v8166_v4 = vsel %vm6616_vm6, %v6764_v38, -inf  ;;  %v2749_v34 = vrot.slane %v2748_v60, 1 }
 0x287   : > { %v2797_v55 = vsel %vm8167_vm13, %v8166_v4, -inf  ;;  %v2774_v30 = vrot.slane %v2773_v28, 2  ;;  %v2782_v52 = vmax.f32 %v2780_v12, %v2781_v40  ;;  %v2757_v8 = vmax.f32 %v2755_v50, %v2756_v32 }
 0x288   : > { %v2790_v13 = vrot.slane %v2789_v24, 4  ;;  %v2766_v56 = vmax.f32 %v2764_v58, %v2765_v0  ;;  %v2798_v1 = vmax.f32 %v2796_v19, %v2797_v55  ;;  %v8168_v62 = vsel %vm6596_vm9, %v6767_v36, -inf  ;;  %vm8171_vm9 = vmmov %vm8129_vm0 }
 0x289   : > { %v2805_v21 = vsel %vm8169_vm12, %v8168_v62, -inf  ;;  %v2750_v38 = vmax.f32 %v2748_v60, %v2749_v34  ;;  %v2775_v29 = vmax.f32 %v2773_v28, %v2774_v30  ;;  %v2783_v14 = vrot.slane %v2782_v52, 2 }
 0x28a   : > { %v2791_v57 = vmax.f32 %v2789_v24, %v2790_v13  ;;  %v2758_v6 = vrot.slane %v2757_v8, 1  ;;  %v2767_v46 = vrot.slane %v2766_v56, 1  ;;  %v2799_v2 = vrot.slane %v2798_v1, 4 }
 0x28b   : > { %v2806_v49 = vsel %vm8171_vm9, %v2669_v33, -inf  ;;  %v2776_v36 = vrot.slane %v2775_v29, 1  ;;  %v2784_v23 = vmax.f32 %v2782_v52, %v2783_v14  ;;  %vm8172_vm7 = vcmask 1041409  }
 0x28c   : > { %v2792_v31 = vrot.slane %v2791_v57, 2  ;;  %v2807_v10 = vmax.f32 %v2805_v21, %v2806_v49  ;;  %v2759_v12 = vmax.f32 %v2757_v8, %v2758_v6  ;;  %v2768_v50 = vmax.f32 %v2766_v56, %v2767_v46  ;;  %vm8174_vm8 = vmmov %vm8172_vm7 }
 0x28d   : > { %v2800_v58 = vmax.f32 %v2798_v1, %v2799_v2  ;;  %v2830_v26 = vsel %vm8172_vm7, %v6838_v39, %v6836_v17  ;;  %v2777_v45 = vmax.f32 %v2775_v29, %v2776_v36  ;;  %v2785_v22 = vrot.slane %v2784_v23, 1 }
 0x28e   : > { %v2793_v42 = vmax.f32 %v2791_v57, %v2792_v31  ;;  %v2808_v33 = vrot.slane %v2807_v10, 4  ;;  %v2741_v35 = vmax.f32 %v2739_v5, %v2740_v63  ;;  %vm8173_vm6 = vcmask 1042434  }
 0x28f   : > { %v2801_v43 = vrot.slane %v2800_v58, 2  ;;  %v2831_v60 = vsel %vm8173_vm6, %v6840_v11, %v2830_v26  ;;  %v2837_v28 = vsel %vm8174_vm8, %v2759_v12, %v2750_v38  ;;  %v2786_v17 = vmax.f32 %v2784_v23, %v2785_v22  ;;  %vm8177_vm10 = vmmov %vm8173_vm6 }
 0x290   : > { %v2794_v39 = vrot.slane %v2793_v42, 1  ;;  %v2809_v40 = vmax.f32 %v2807_v10, %v2808_v33  ;;  %vm8175_vm1 = vcmask 1043459   ;;  %vm8176_vm5 = vcmask 1044484  }
 0x291   : > { %v2832_v24 = vsel %vm8175_vm1, %v6842_v27, %v2831_v60  ;;  %v2802_v5 = vmax.f32 %v2800_v58, %v2801_v43  ;;  %v2838_v63 = vsel %vm8177_vm10, %v2768_v50, %v2837_v28  ;;  %vm8178_vm15 = vcmask 1045509   ;;  %vm8179_vm0 = vmmov %vm8175_vm1 }
 0x292   : > { %v2833_v11 = vsel %vm8176_vm5, %v6874_v20, %v2832_v24  ;;  %v2795_v32 = vmax.f32 %v2793_v42, %v2794_v39  ;;  %v2810_v0 = vrot.slane %v2809_v40, 2  ;;  %v2839_v44 = vsel %vm8179_vm0, %v2777_v45, %v2838_v63  ;;  %vm8181_vm12 = vmmov %vm8176_vm5 }
 0x293   : > { %v2834_v27 = vsel %vm8178_vm15, %v6886_v7, %v2833_v11  ;;  %v2803_v20 = vrot.slane %v2802_v5, 1  ;;  %vm8180_vm13 = vcmask 1046534   ;;  %v2840_v4 = vsel %vm8181_vm12, %v2786_v17, %v2839_v44  ;;  %vm8183_vm7 = vmmov %vm8178_vm15 }
 0x294   : > { %v2835_v19 = vsel %vm8180_vm13, %v6888_v54, %v2834_v27  ;;  %v2811_v7 = vmax.f32 %v2809_v40, %v2810_v0  ;;  %vm8182_vm9 = vcmask 1047559   ;;  %v2841_v34 = vsel %vm8183_vm7, %v2795_v32, %v2840_v4  ;;  %vm8184_vm6 = vmmov %vm8180_vm13 }
 0x295   : > { %v2836_v55 = vsel %vm8182_vm9, %v2741_v35, %v2835_v19  ;;  %v2804_v54 = vmax.f32 %v2802_v5, %v2803_v20  ;;  %v2859_v1 = vstv %s6971_s28  ;;  %v2875_v38 = vstv %s6981_s4 }
 0x296   : > { %v2846_v30 = vsel %vm7546_vm2, %v2836_v55, -inf  ;;  %v2862_v52 = vsel %vm7548_vm14, %v2836_v55, -inf  ;;  %v2812_v13 = vrot.slane %v2811_v7, 1  ;;  %v2878_v8 = vsel %vm7549_vm3, %v2836_v55, -inf  ;;  %vm8188_vm3 = vmmov %vm8182_vm9 }
 0x297   : > { %v2842_v56 = vsel %vm8184_vm6, %v2804_v54, %v2841_v34  ;;  %v2894_v9 = vsel %vm7552_vm11, %v2836_v55, -inf  ;;  %vm8185_vm2 = vcmask 31744   ;;  %v2891_v14 = vstv %s6990_s8 }
 0x298   : > { %v2813_v62 = vmax.f32 %v2811_v7, %v2812_v13  ;;  %v2848_v59 = vsel %vm8185_vm2, %v2846_v30, -inf  ;;  %vm8186_vm14 = vmmov %vm8185_vm2  ;;  %v2907_v57 = vstv %s7001_s25  ;;  %v2910_v53 = vsel %vm3969_vm4, %v2836_v55, -inf }
 0x299   : > { %v2864_v21 = vsel %vm8186_vm14, %v2862_v52, -inf  ;;  %vm8187_vm8 = vmmov %vm8185_vm2  ;;  %vm8191_vm5 = vnez %v7411_v18  ;;  %vm8192_vm10 = vnez %v7372_v47  ;;  %vm8193_vm15 = vnez %v7382_v3 }
 0x29a   : > { %v2880_v29 = vsel %vm8187_vm8, %v2878_v8, -inf  ;;  %v2843_v6 = vsel %vm8188_vm3, %v2813_v62, %v2842_v56  ;;  %vm8189_vm1 = vmmov %vm8185_vm2  ;;  %v2926_v2 = vsel %vm8191_vm5, %v2836_v55, -inf  ;;  %vm8194_vm0 = vnez %v7396_v16 }
 0x29b   : > { %v2896_v37 = vsel %vm8189_vm1, %v2894_v9, -inf  ;;  %vm8190_vm11 = vmmov %vm8189_vm1  ;;  %v2847_v49 = vsel %vm8192_vm10, %v2843_v6, -inf  ;;  %v2863_v36 = vsel %vm8193_vm15, %v2843_v6, -inf  ;;  %v2879_v51 = vsel %vm8194_vm0, %v2843_v6, -inf }
 0x29c   : > { %v2912_v46 = vsel %vm8190_vm11, %v2910_v53, -inf  ;;  %vm8195_vm4 = vnez %v7417_v15  ;;  %vm8196_vm13 = vmmov %vm8189_vm1  ;;  %vm8200_vm6 = vnez %v7422_v48  ;;  %vm8201_vm2 = vnez %v7428_v25 }
 0x29d   : > { %v2895_v23 = vsel %vm8195_vm4, %v2843_v6, -inf  ;;  %v2849_v31 = vsel %vm8196_vm13, %v2847_v49, -inf  ;;  %vm8197_vm12 = vmmov %vm8189_vm1  ;;  %v2911_v16 = vsel %vm8200_vm6, %v2843_v6, -inf  ;;  %v2927_v15 = vsel %vm8201_vm2, %v2843_v6, -inf }
 0x29e   : > { %v2865_v10 = vsel %vm8197_vm12, %v2863_v36, -inf  ;;  %vm8198_vm9 = vmmov %vm8189_vm1  ;;  %v2850_v50 = vmax.f32 %v2848_v59, %v2849_v31  ;;  %vm8203_vm8 = vnez %v7430_v41  ;;  %vm7045_vm3 = vcmp.eq.s32.totalorder %v2859_v1, 1 }
 0x29f   : > { %v2881_v12 = vsel %vm8198_vm9, %v2879_v51, -inf  ;;  %vm8199_vm7 = vmmov %vm8189_vm1  ;;  %v2866_v47 = vmax.f32 %v2864_v21, %v2865_v10  ;;  %v2942_v45 = vsel %vm8203_vm8, %v2836_v55, -inf  ;;  %vm8210_vm10 = vnez %v8092_v61 }
 0x2a0   : > { %v2897_v18 = vsel %vm8199_vm7, %v2895_v23, -inf  ;;  %v2882_v3 = vmax.f32 %v2880_v29, %v2881_v12  ;;  %vm8202_vm14 = vmmov %vm8189_vm1  ;;  %v2851_v22 = vrot.slane %v2850_v50, 4  ;;  %vm7049_vm1 = vcmp.eq.s32.totalorder %v2875_v38, 1 }
 0x2a1   : > { %v2898_v58 = vmax.f32 %v2896_v37, %v2897_v18  ;;  %v2928_v26 = vsel %vm8202_vm14, %v2926_v2, -inf  ;;  %v2867_v42 = vrot.slane %v2866_v47, 4  ;;  %vm8208_vm11 = vmmov %vm8199_vm7  ;;  %v2943_v60 = vsel %vm8210_vm10, %v2843_v6, -inf }
 0x2a2   : > { %v2883_v33 = vrot.slane %v2882_v3, 4  ;;  %v2913_v25 = vsel %vm8208_vm11, %v2911_v16, -inf  ;;  %vm8209_vm5 = vmmov %vm8199_vm7  ;;  %v2852_v17 = vmax.f32 %v2850_v50, %v2851_v22  ;;  %vm7069_vm0 = vcmp.eq.s32.totalorder %v2891_v14, 1 }
 0x2a3   : > { %v2899_v35 = vrot.slane %v2898_v58, 4  ;;  %v2929_v41 = vsel %vm8209_vm5, %v2927_v15, -inf  ;;  %vm8211_vm15 = vmmov %vm8209_vm5  ;;  %v2868_v39 = vmax.f32 %v2866_v47, %v2867_v42  ;;  %v2914_v11 = vmax.f32 %v2912_v46, %v2913_v25 }
 0x2a4   : > { %v2944_v28 = vsel %vm8211_vm15, %v2942_v45, -inf  ;;  %v2884_v40 = vmax.f32 %v2882_v3, %v2883_v33  ;;  %v2930_v61 = vmax.f32 %v2928_v26, %v2929_v41  ;;  %vm8214_vm4 = vmmov %vm8209_vm5  ;;  %v2853_v32 = vrot.slane %v2852_v17, 2 }
 0x2a5   : > { %v2900_v24 = vmax.f32 %v2898_v58, %v2899_v35  ;;  %v2945_v63 = vsel %vm8214_vm4, %v2943_v60, -inf  ;;  %v2869_v0 = vrot.slane %v2868_v39, 2  ;;  %vm7078_vm13 = vcmp.eq.s32.totalorder %v2907_v57, 1 }
 0x2a6   : > { %v2885_v27 = vrot.slane %v2884_v40, 2  ;;  %v2915_v19 = vrot.slane %v2914_v11, 4  ;;  %v2931_v4 = vrot.slane %v2930_v61, 4  ;;  %v2946_v7 = vmax.f32 %v2944_v28, %v2945_v63 }
 0x2a7   : > { %v2901_v44 = vrot.slane %v2900_v24, 2  ;;  %v2854_v55 = vmax.f32 %v2852_v17, %v2853_v32  ;;  %v2870_v34 = vmax.f32 %v2868_v39, %v2869_v0  ;;  %v2923_v13 = vstv %s7067_s9 }
 0x2a8   : > { %v2886_v54 = vmax.f32 %v2884_v40, %v2885_v27  ;;  %v2916_v52 = vmax.f32 %v2914_v11, %v2915_v19  ;;  %v2932_v8 = vmax.f32 %v2930_v61, %v2931_v4  ;;  %v2947_v56 = vrot.slane %v2946_v7, 4 }
 0x2a9   : > { %v2902_v30 = vmax.f32 %v2900_v24, %v2901_v44  ;;  %v2855_v1 = vrot.slane %v2854_v55, 1  ;;  %v2871_v9 = vrot.slane %v2870_v34, 1  ;;  %v2939_v29 = vstv %s7087_s12 }
 0x2aa   : > { %v2887_v62 = vrot.slane %v2886_v54, 1  ;;  %v2917_v21 = vrot.slane %v2916_v52, 2  ;;  %v2933_v38 = vrot.slane %v2932_v8, 2  ;;  %v2948_v14 = vmax.f32 %v2946_v7, %v2947_v56 }
 0x2ab   : > { %v2903_v59 = vrot.slane %v2902_v30, 1  ;;  %v2856_v57 = vmax.f32 %v2854_v55, %v2855_v1  ;;  %v2872_v53 = vmax.f32 %v2870_v34, %v2871_v9  ;;  %v2955_v36 = vstv %s7095_s22 }
 0x2ac   : > { %v2888_v6 = vmax.f32 %v2886_v54, %v2887_v62  ;;  %v2918_v46 = vmax.f32 %v2916_v52, %v2917_v21  ;;  %v2934_v2 = vmax.f32 %v2932_v8, %v2933_v38  ;;  %v2949_v49 = vrot.slane %v2948_v14, 2 }
 0x2ad   : > { %v2904_v37 = vmax.f32 %v2902_v30, %v2903_v59  ;;  %v2861_v51 = vsel %vm7045_vm3, 0.0, %v2856_v57  ;;  %v2877_v23 = vsel %vm7049_vm1, 0.0, %v2872_v53  ;;  %vm8217_vm12 = vcmask 1040384  }
 0x2ae   : > { %v2893_v31 = vsel %vm7069_vm0, 0.0, %v2888_v6  ;;  %v2919_v12 = vrot.slane %v2918_v46, 1  ;;  %v2935_v18 = vrot.slane %v2934_v2, 1  ;;  %v2950_v50 = vmax.f32 %v2948_v14, %v2949_v49 }
 0x2af   : > { %v2909_v10 = vsel %vm7078_vm13, 0.0, %v2904_v37  ;;  %v2958_v47 = vsel %vm8217_vm12, %v2861_v51, %v2877_v23  ;;  %vm2924_vm9 = vcmp.eq.s32.totalorder %v2923_v13, 1  ;;  %vm2940_vm7 = vcmp.eq.s32.totalorder %v2939_v29, 1 }
 0x2b0   : > { %vm8218_vm6 = vcmask 1041408   ;;  %v2920_v58 = vmax.f32 %v2918_v46, %v2919_v12  ;;  %v2936_v16 = vmax.f32 %v2934_v2, %v2935_v18  ;;  %v2951_v15 = vrot.slane %v2950_v50, 1 }
 0x2b1   : > { %v2959_v3 = vsel %vm8218_vm6, %v2958_v47, %v2893_v31  ;;  %vm8219_vm2 = vcmask 1042432   ;;  %vm2956_vm14 = vcmp.eq.s32.totalorder %v2955_v36, 1  ;;  %vm8220_vm8 = vcmask 1043456  }
 0x2b2   : > { %v2960_v26 = vsel %vm8219_vm2, %v2959_v3, %v2909_v10  ;;  %v2925_v45 = vsel %vm2924_vm9, 0.0, %v2920_v58  ;;  %v2941_v22 = vsel %vm2940_vm7, 0.0, %v2936_v16  ;;  %v2952_v42 = vmax.f32 %v2950_v50, %v2951_v15 }
 0x2b3   : > { %v2961_v33 = vsel %vm8220_vm8, %v2960_v26, %v2925_v45  ;;  %vm8221_vm3 = vcmask 1044480   ;;  %vm8222_vm1 = vcmask 1045504   ;;  %vm8223_vm11 = vcmask 30720  }
 0x2b4   : > { %v2957_v35 = vsel %vm2956_vm14, 0.0, %v2952_v42  ;;  %v2962_v43 = vsel %vm8221_vm3, %v2961_v33, %v2941_v22 }
 0x2b5   : > { %v2963_v48 = vsel %vm8222_vm1, %v2962_v43, %v2957_v35 }
 0x2b6   : > { %3062 = vst.msk [vmem:[%s4209_s10 + $0x30] sm:$0x7f] %vm8223_vm11, %v2963_v48 }
 0x2b7 PF: > { %s18_s14 = sadd.s32 1, %s3152_s14  }
 0x2b8   : > { %p15_p13 = scmp.ge.s32.totalorder %s18_s14, 6  }
 0x2ba   :  { %17 = sbr.rel (!%p15_p13) target bundleno = 16 (0x10), region = 60 }

</bundles_post_ra>
